<compile_context>
chip_gen: v6e
topology: v6e:2x2x1
jax: 0.10.0
libtpu: 0.0.40
codegen_flags: <defaults>
</compile_context>

<pallas_src>
import functools

import numpy as np

import jax
import jax.numpy as jnp
from jax.experimental import pallas as pl
from jax.experimental.pallas import tpu as pltpu

KH = KW = 5                      # LeNet uses 5x5 convolutions.
DOT_DTYPE = jnp.bfloat16         # MXU operand dtype; accumulation stays float32.
LANE = 128


def _round_up(v, m):
    return (v + m - 1) // m * m


def _softplus(x):
    # Matches torch.nn.Softplus(beta=1, threshold=20).
    return jnp.where(x > 20.0, x, jnp.log1p(jnp.exp(jnp.minimum(x, 20.0))))


def _pick_batch_tile(n, h, max_tile=8):
    """Largest batch tile B <= max_tile dividing n whose (B*h)-row input block is
    sublane aligned (or B == n, i.e. block == whole array); prefer >= 2 grid steps."""
    cands = [b for b in range(1, min(n, max_tile) + 1)
             if n % b == 0 and ((b * h) % 8 == 0 or b == n)]
    multi = [b for b in cands if n // b >= 2]
    if multi:
        return max(multi)
    return max(cands) if cands else n


def _pool_selectors(b_tile, h, hp, m, wo, wp, cout):
    """Exact 0/1 matmul operands implementing MaxPool2d(2,2):
    row selectors pick conv rows 2*hp / 2*hp+1 of every image (and compact away the
    rows that straddle image boundaries in the row-stacked layout); column selectors
    pick lane groups wo=2*wp / 2*wp+1 of the (wo*cout) lane axis."""
    r_even = np.zeros((b_tile * hp, m), np.float32)
    r_odd = np.zeros((b_tile * hp, m), np.float32)
    for b in range(b_tile):
        for i in range(hp):
            r_even[b * hp + i, b * h + 2 * i] = 1.0
            r_odd[b * hp + i, b * h + 2 * i + 1] = 1.0
    c_even = np.zeros((wo * cout, wp * cout), np.float32)
    c_odd = np.zeros((wo * cout, wp * cout), np.float32)
    for j in range(wp):
        for o in range(cout):
            c_even[(2 * j) * cout + o, j * cout + o] = 1.0
            c_odd[(2 * j + 1) * cout + o, j * cout + o] = 1.0
    return (jnp.asarray(r_even), jnp.asarray(r_odd),
            jnp.asarray(c_even), jnp.asarray(c_odd))


def _banded_conv_weight(w_oihw, width, dtype):
    """Fold the kw and Cin taps of a 5x5 VALID conv into a banded lane-dense weight:
        band[i, w*Cin + c, wo*Cout + o] = w[o, c, i, w - wo]   (0 outside the band)
    so that   conv == sum_i  X[rows + i, :] @ band[i]
    with X laid out as row-stacked (rows, W*Cin)."""
    w = np.transpose(np.asarray(w_oihw, np.float32), (2, 3, 1, 0))  # (kh, kw, Cin, Cout)
    kh, kw, cin, cout = w.shape
    wo_len = width - kw + 1
    band = np.zeros((kh, width * cin, wo_len * cout), np.float32)
    for j in range(kw):
        for wo in range(wo_len):
            band[:, (wo + j) * cin:(wo + j + 1) * cin,
                 wo * cout:(wo + 1) * cout] = w[:, j]
    return jnp.asarray(band, dtype)


# ---------------------------------------------------------------------------
# Fused Conv2d(5x5, stride=1, valid) + bias + Softplus + MaxPool2d(2, 2)
# One grid step == one batch tile of B images (row-stacked, lane-dense).
# ---------------------------------------------------------------------------
def _conv_pool_kernel(x_ref, wband_ref, re_ref, ro_ref, ce_ref, co_ref, b_ref, o_ref,
                      *, kh, m, b_tile, hp):
    dot_dt = wband_ref.dtype

    # Conv as kh lane-dense 2D matmuls against the banded weight; accumulate in a
    # loop-carried f32 value (no scratch read-modify-write).
    acc = None
    for i in range(kh):
        lhs = x_ref[i:i + m, :].astype(dot_dt)
        part = jnp.dot(lhs, wband_ref[i], preferred_element_type=jnp.float32)
        acc = part if acc is None else acc + part

    # MaxPool2d(2,2) fused BEFORE bias+Softplus (both commute with max, exactly):
    # row pairs (+ compaction of valid rows) and column pairs via exact 0/1
    # selection matmuls -- no per-row stores, no strided reads.
    rows = jnp.maximum(
        jnp.dot(re_ref[...], acc, preferred_element_type=jnp.float32),
        jnp.dot(ro_ref[...], acc, preferred_element_type=jnp.float32))
    pooled = jnp.maximum(
        jnp.dot(rows, ce_ref[...], preferred_element_type=jnp.float32),
        jnp.dot(rows, co_ref[...], preferred_element_type=jnp.float32))
    pooled = _softplus(pooled + b_ref[...])          # (b_tile*hp, wp*cout), f32

    # Lane-dense (84/80-wide) per-image stores.
    for b in range(b_tile):
        o_ref[b] = pooled[b * hp:(b + 1) * hp, :]


def conv_softplus_pool(x_rows, wband, bias_row, *, n, h, w, cin):
    """x_rows: (n*h, w*cin) row-stacked activations; wband: (KH, w*cin, wo*cout);
    bias_row: (1, wp*cout).  Returns (n, hp, wp*cout) float32."""
    kh = KH
    ho, wo = h - kh + 1, w - KW + 1
    hp, wp = ho // 2, wo // 2
    cout = wband.shape[2] // wo

    b_tile = _pick_batch_tile(n, h)
    m = b_tile * h - kh + 1
    r_even, r_odd, c_even, c_odd = _pool_selectors(b_tile, h, hp, m, wo, wp, cout)

    steps = n // b_tile
    flops = steps * (2 * kh * m * (w * cin) * (wo * cout)
                     + 4 * (b_tile * hp) * m * (wo * cout)
                     + 4 * (b_tile * hp) * (wo * cout) * (wp * cout))
    bytes_accessed = (4 * n * h * w * cin + 2 * wband.size
                      + 4 * (r_even.size + r_odd.size + c_even.size + c_odd.size
                             + bias_row.size)
                      + 4 * n * hp * wp * cout)

    kernel = functools.partial(_conv_pool_kernel, kh=kh, m=m, b_tile=b_tile, hp=hp)
    return pl.pallas_call(
        kernel,
        grid=(steps,),
        in_specs=[
            pl.BlockSpec((b_tile * h, w * cin), lambda i: (i, 0)),
            pl.BlockSpec(wband.shape, lambda i: (0, 0, 0)),
            pl.BlockSpec(r_even.shape, lambda i: (0, 0)),
            pl.BlockSpec(r_odd.shape, lambda i: (0, 0)),
            pl.BlockSpec(c_even.shape, lambda i: (0, 0)),
            pl.BlockSpec(c_odd.shape, lambda i: (0, 0)),
            pl.BlockSpec(bias_row.shape, lambda i: (0, 0)),
        ],
        out_specs=pl.BlockSpec((b_tile, hp, wp * cout), lambda i: (i, 0, 0)),
        out_shape=jax.ShapeDtypeStruct((n, hp, wp * cout), jnp.float32),
        compiler_params=pltpu.CompilerParams(dimension_semantics=("parallel",)),
        cost_estimate=pl.CostEstimate(flops=flops,
                                      transcendentals=2 * n * hp * wp * cout,
                                      bytes_accessed=bytes_accessed),
    )(x_rows, wband, r_even, r_odd, c_even, c_odd, bias_row)


# ---------------------------------------------------------------------------
# Fused classifier: Linear -> Softplus -> Linear -> Softplus -> Linear.
# Hidden dims are pre-padded to 128 lanes; weights stay resident in VMEM.
# ---------------------------------------------------------------------------
def _fc_stack_kernel(x_ref, w1_ref, b1_ref, w2_ref, b2_ref, w3_ref, b3_ref, o_ref):
    dt = w1_ref.dtype
    h = jnp.dot(x_ref[...].astype(dt), w1_ref[...],
                preferred_element_type=jnp.float32) + b1_ref[...]
    h = _softplus(h)
    h = jnp.dot(h.astype(dt), w2_ref[...],
                preferred_element_type=jnp.float32) + b2_ref[...]
    h = _softplus(h)
    o_ref[...] = (jnp.dot(h.astype(dt), w3_ref[...],
                          preferred_element_type=jnp.float32)
                  + b3_ref[...]).astype(o_ref.dtype)


def fc_stack(xf, w1, b1, w2, b2, w3, b3):
    m, k1 = xf.shape
    h1, h2, n_out = w1.shape[1], w2.shape[1], w3.shape[1]

    tm = min(512, _round_up(m, 8))           # large row tile; weights grid-invariant
    mp = _round_up(m, tm)
    if mp != m:
        xf = jnp.pad(xf, ((0, mp - m), (0, 0)))   # padded rows computed & discarded

    flops = 2 * mp * (k1 * h1 + h1 * h2 + h2 * n_out)
    bytes_accessed = (4 * mp * k1 + 2 * (k1 * h1 + h1 * h2 + h2 * n_out)
                      + 4 * (h1 + h2 + n_out) + 4 * mp * n_out)
    out = pl.pallas_call(
        _fc_stack_kernel,
        grid=(mp // tm,),
        in_specs=[
            pl.BlockSpec((tm, k1), lambda i: (i, 0)),
            pl.BlockSpec((k1, h1), lambda i: (0, 0)),
            pl.BlockSpec((1, h1), lambda i: (0, 0)),
            pl.BlockSpec((h1, h2), lambda i: (0, 0)),
            pl.BlockSpec((1, h2), lambda i: (0, 0)),
            pl.BlockSpec((h2, n_out), lambda i: (0, 0)),
            pl.BlockSpec((1, n_out), lambda i: (0, 0)),
        ],
        out_specs=pl.BlockSpec((tm, n_out), lambda i: (i, 0)),
        out_shape=jax.ShapeDtypeStruct((mp, n_out), jnp.float32),
        compiler_params=pltpu.CompilerParams(dimension_semantics=("parallel",)),
        cost_estimate=pl.CostEstimate(flops=flops,
                                      transcendentals=mp * (h1 + h2),
                                      bytes_accessed=bytes_accessed),
    )(xf, w1, b1, w2, b2, w3, b3)
    return out[:m]


# ---------------------------------------------------------------------------
# Parameters (PyTorch layout) and one-time layout preparation.
# ---------------------------------------------------------------------------
def init_params(key, inputs, outputs):
    ks = jax.random.split(key, 10)

    def rnd(k, shape, scale=0.1):
        return (scale * jax.random.normal(k, shape)).astype(jnp.float32)

    return {
        "conv1_w": rnd(ks[0], (6, inputs, 5, 5)),      # OIHW
        "conv1_b": rnd(ks[1], (6,)),
        "conv2_w": rnd(ks[2], (16, 6, 5, 5)),
        "conv2_b": rnd(ks[3], (16,)),
        "fc1_w": rnd(ks[4], (120, 5 * 5 * 16)),        # Linear: (out, in)
        "fc1_b": rnd(ks[5], (120,)),
        "fc2_w": rnd(ks[6], (84, 120)),
        "fc2_b": rnd(ks[7], (84,)),
        "fc3_w": rnd(ks[8], (outputs, 84)),
        "fc3_b": rnd(ks[9], (outputs,)),
    }


def prepare_params(p, image_hw=32):
    """One-time layout prep outside the jitted forward:
      * conv weights -> banded lane-dense (KH, W*Cin, Wo*Cout) matrices (DOT_DTYPE),
      * conv biases  -> (1, Wp*Cout) rows tiled over the pooled width,
      * fc1 rows permuted from torch NCHW-flatten order to our NHWC-flatten order,
      * fc hidden dims zero-padded to 128 lanes, weights cast to DOT_DTYPE."""
    c2_out = p["conv2_w"].shape[0]                     # 16

    w1 = image_hw
    wo1 = w1 - KW + 1
    hp1, wp1 = (image_hw - KH + 1) // 2, wo1 // 2      # 14, 14
    w2 = hp1
    wo2 = w2 - KW + 1
    hp2, wp2 = (w2 - KH + 1) // 2, wo2 // 2            # 5, 5

    d1 = p["fc1_w"].shape[0]                           # 120
    d2 = p["fc2_w"].shape[0]                           # 84
    d1p, d2p = _round_up(d1, LANE), _round_up(d2, LANE)

    fc1 = p["fc1_w"].reshape(d1, c2_out, hp2, wp2)     # (out, C, H, W) torch order
    fc1 = jnp.transpose(fc1, (2, 3, 1, 0)).reshape(hp2 * wp2 * c2_out, d1)  # NHWC rows

    def pad2(a, rows, cols):
        return jnp.pad(a, ((0, rows - a.shape[0]), (0, cols - a.shape[1])))

    return {
        "conv1_wband": _banded_conv_weight(p["conv1_w"], w1, DOT_DTYPE),
        "conv1_b": jnp.tile(p["conv1_b"].astype(jnp.float32), wp1).reshape(1, -1),
        "conv2_wband": _banded_conv_weight(p["conv2_w"], w2, DOT_DTYPE),
        "conv2_b": jnp.tile(p["conv2_b"].astype(jnp.float32), wp2).reshape(1, -1),
        "fc1_w": pad2(fc1, fc1.shape[0], d1p).astype(DOT_DTYPE),
        "fc1_b": jnp.pad(p["fc1_b"], (0, d1p - d1)).reshape(1, -1).astype(jnp.float32),
        "fc2_w": pad2(p["fc2_w"].T, d1p, d2p).astype(DOT_DTYPE),
        "fc2_b": jnp.pad(p["fc2_b"], (0, d2p - d2)).reshape(1, -1).astype(jnp.float32),
        "fc3_w": pad2(p["fc3_w"].T, d2p, p["fc3_w"].shape[0]).astype(DOT_DTYPE),
        "fc3_b": p["fc3_b"].reshape(1, -1).astype(jnp.float32),
    }


def lenet_forward(x_nchw, params):
    n, cin, h, w = x_nchw.shape

    # One-time activation relayout: NCHW -> row-stacked lane-dense (N*H, W*Cin).
    x = jnp.transpose(x_nchw, (0, 2, 3, 1)).reshape(n * h, w * cin)

    y1 = conv_softplus_pool(x, params["conv1_wband"], params["conv1_b"],
                            n=n, h=h, w=w, cin=cin)            # (N, 14, 14*6)
    hp1, wp1 = (h - KH + 1) // 2, (w - KW + 1) // 2
    c1 = y1.shape[-1] // wp1
    x2 = y1.reshape(n * hp1, wp1 * c1)                          # free row-major reshape

    y2 = conv_softplus_pool(x2, params["conv2_wband"], params["conv2_b"],
                            n=n, h=hp1, w=wp1, cin=c1)          # (N, 5, 5*16)
    xf = y2.reshape(n, -1)                                      # == NHWC flatten (free)

    return fc_stack(xf, params["fc1_w"], params["fc1_b"],
                    params["fc2_w"], params["fc2_b"],
                    params["fc3_w"], params["fc3_b"])


# ---------------------------------------------------------------------------
# Pure-JAX reference (PyTorch layout) for the in-script self-check.
# ---------------------------------------------------------------------------
def _reference_forward(x_nchw, tp):
    def conv(x, w, b):
        y = jax.lax.conv_general_dilated(x, w, (1, 1), "VALID",
                                         dimension_numbers=("NCHW", "OIHW", "NCHW"))
        return _softplus(y + b.reshape(1, -1, 1, 1))

    def pool(x):
        return jax.lax.reduce_window(x, -jnp.inf, jax.lax.max,
                                     (1, 1, 2, 2), (1, 1, 2, 2), "VALID")

    x = pool(conv(x_nchw, tp["conv1_w"], tp["conv1_b"]))
    x = pool(conv(x, tp["conv2_w"], tp["conv2_b"]))
    x = x.reshape(x.shape[0], -1)                     # NCHW flatten (torch order)
    x = _softplus(x @ tp["fc1_w"].T + tp["fc1_b"])
    x = _softplus(x @ tp["fc2_w"].T + tp["fc2_b"])
    return x @ tp["fc3_w"].T + tp["fc3_b"]


if __name__ == "__main__":
    key = jax.random.PRNGKey(0)
    kx, kp = jax.random.split(key)

    batch, inputs, outputs = 8, 3, 10
    # LeNet geometry requires 32x32 spatial input so the flatten is 5*5*16.
    x = jax.random.normal(kx, (batch, inputs, 32, 32), dtype=jnp.float32)
    torch_params = init_params(kp, inputs, outputs)
    params = prepare_params(torch_params)

    y = jax.jit(lenet_forward)(x, params)
    jax.block_until_ready(y)
    assert y.shape == (batch, outputs) and y.dtype == jnp.float32

    y_ref = _reference_forward(x, torch_params)
    # bf16 MXU operands (f32 accumulation/epilogue) -> looser tolerance; with
    # DOT_DTYPE = jnp.float32 the kernels agree with the reference to ~1e-5.
    tol = 5e-2 if DOT_DTYPE == jnp.bfloat16 else 1e-4
    assert bool(jnp.allclose(y, y_ref, rtol=tol, atol=tol)), "mismatch vs reference"

    print("KERNEL_OK")
</pallas_src>

<mosaic_0001>
module attributes {stable_mosaic.version = 11 : i64} {
  func.func @_conv_pool_kernel(%arg0: i32, %arg1: memref<56x84xf32, #tpu.memory_space<vmem>>, %arg2: memref<5x84x160xbf16, #tpu.memory_space<vmem>>, %arg3: memref<20x52xf32, #tpu.memory_space<vmem>>, %arg4: memref<20x52xf32, #tpu.memory_space<vmem>>, %arg5: memref<160x80xf32, #tpu.memory_space<vmem>>, %arg6: memref<160x80xf32, #tpu.memory_space<vmem>>, %arg7: memref<1x80xf32, #tpu.memory_space<vmem>>, %arg8: memref<4x5x80xf32, #tpu.memory_space<vmem>>) attributes {dimension_semantics = [#tpu.dimension_semantics<parallel>], iteration_bounds = array<i64: 2>, scalar_prefetch = 0 : i64, scratch_operands = 0 : i64, tpu.core_type = #tpu.core_type<tc>, window_params = [{transform_indices = @transform_0, window_bounds = array<i64: 56, 84>}, {pipeline_mode = #tpu.pipeline_mode<synchronous>, transform_indices = @transform_1, window_bounds = array<i64: 5, 84, 160>}, {pipeline_mode = #tpu.pipeline_mode<synchronous>, transform_indices = @transform_2, window_bounds = array<i64: 20, 52>}, {pipeline_mode = #tpu.pipeline_mode<synchronous>, transform_indices = @transform_3, window_bounds = array<i64: 20, 52>}, {pipeline_mode = #tpu.pipeline_mode<synchronous>, transform_indices = @transform_4, window_bounds = array<i64: 160, 80>}, {pipeline_mode = #tpu.pipeline_mode<synchronous>, transform_indices = @transform_5, window_bounds = array<i64: 160, 80>}, {pipeline_mode = #tpu.pipeline_mode<synchronous>, transform_indices = @transform_6, window_bounds = array<i64: 1, 80>}, {transform_indices = @transform_7, window_bounds = array<i64: 4, 5, 80>}]} {
    %c0 = arith.constant 0 : index
    %c0_0 = arith.constant 0 : index
    %0 = vector.load %arg1[%c0, %c0_0] : memref<56x84xf32, #tpu.memory_space<vmem>>, vector<52x84xf32>
    %1 = arith.truncf %0 : vector<52x84xf32> to vector<52x84xbf16>
    %c0_1 = arith.constant 0 : index
    %c0_2 = arith.constant 0 : index
    %c0_3 = arith.constant 0 : index
    %2 = vector.load %arg2[%c0_1, %c0_2, %c0_3] : memref<5x84x160xbf16, #tpu.memory_space<vmem>>, vector<1x84x160xbf16>
    %3 = vector.shape_cast %2 : vector<1x84x160xbf16> to vector<84x160xbf16>
    %cst = arith.constant dense<0.000000e+00> : vector<52x160xf32>
    %4 = tpu.matmul %1, %3, %cst {dimension_numbers = #tpu.dot_dimension_numbers<[1], [0], [0], [1], [0, 0, 1, 1], [], []>} : vector<52x84xbf16>, vector<84x160xbf16>, vector<52x160xf32> -> vector<52x160xf32>
    %c1 = arith.constant 1 : index
    %c0_4 = arith.constant 0 : index
    %5 = vector.load %arg1[%c1, %c0_4] : memref<56x84xf32, #tpu.memory_space<vmem>>, vector<52x84xf32>
    %6 = arith.truncf %5 : vector<52x84xf32> to vector<52x84xbf16>
    %c1_5 = arith.constant 1 : index
    %c0_6 = arith.constant 0 : index
    %c0_7 = arith.constant 0 : index
    %7 = vector.load %arg2[%c1_5, %c0_6, %c0_7] : memref<5x84x160xbf16, #tpu.memory_space<vmem>>, vector<1x84x160xbf16>
    %8 = vector.shape_cast %7 : vector<1x84x160xbf16> to vector<84x160xbf16>
    %cst_8 = arith.constant dense<0.000000e+00> : vector<52x160xf32>
    %9 = tpu.matmul %6, %8, %cst_8 {dimension_numbers = #tpu.dot_dimension_numbers<[1], [0], [0], [1], [0, 0, 1, 1], [], []>} : vector<52x84xbf16>, vector<84x160xbf16>, vector<52x160xf32> -> vector<52x160xf32>
    %10 = arith.addf %4, %9 : vector<52x160xf32>
    %c2 = arith.constant 2 : index
    %c0_9 = arith.constant 0 : index
    %11 = vector.load %arg1[%c2, %c0_9] : memref<56x84xf32, #tpu.memory_space<vmem>>, vector<52x84xf32>
    %12 = arith.truncf %11 : vector<52x84xf32> to vector<52x84xbf16>
    %c2_10 = arith.constant 2 : index
    %c0_11 = arith.constant 0 : index
    %c0_12 = arith.constant 0 : index
    %13 = vector.load %arg2[%c2_10, %c0_11, %c0_12] : memref<5x84x160xbf16, #tpu.memory_space<vmem>>, vector<1x84x160xbf16>
    %14 = vector.shape_cast %13 : vector<1x84x160xbf16> to vector<84x160xbf16>
    %cst_13 = arith.constant dense<0.000000e+00> : vector<52x160xf32>
    %15 = tpu.matmul %12, %14, %cst_13 {dimension_numbers = #tpu.dot_dimension_numbers<[1], [0], [0], [1], [0, 0, 1, 1], [], []>} : vector<52x84xbf16>, vector<84x160xbf16>, vector<52x160xf32> -> vector<52x160xf32>
    %16 = arith.addf %10, %15 : vector<52x160xf32>
    %c3 = arith.constant 3 : index
    %c0_14 = arith.constant 0 : index
    %17 = vector.load %arg1[%c3, %c0_14] : memref<56x84xf32, #tpu.memory_space<vmem>>, vector<52x84xf32>
    %18 = arith.truncf %17 : vector<52x84xf32> to vector<52x84xbf16>
    %c3_15 = arith.constant 3 : index
    %c0_16 = arith.constant 0 : index
    %c0_17 = arith.constant 0 : index
    %19 = vector.load %arg2[%c3_15, %c0_16, %c0_17] : memref<5x84x160xbf16, #tpu.memory_space<vmem>>, vector<1x84x160xbf16>
    %20 = vector.shape_cast %19 : vector<1x84x160xbf16> to vector<84x160xbf16>
    %cst_18 = arith.constant dense<0.000000e+00> : vector<52x160xf32>
    %21 = tpu.matmul %18, %20, %cst_18 {dimension_numbers = #tpu.dot_dimension_numbers<[1], [0], [0], [1], [0, 0, 1, 1], [], []>} : vector<52x84xbf16>, vector<84x160xbf16>, vector<52x160xf32> -> vector<52x160xf32>
    %22 = arith.addf %16, %21 : vector<52x160xf32>
    %c4 = arith.constant 4 : index
    %c0_19 = arith.constant 0 : index
    %23 = vector.load %arg1[%c4, %c0_19] : memref<56x84xf32, #tpu.memory_space<vmem>>, vector<52x84xf32>
    %24 = arith.truncf %23 : vector<52x84xf32> to vector<52x84xbf16>
    %c4_20 = arith.constant 4 : index
    %c0_21 = arith.constant 0 : index
    %c0_22 = arith.constant 0 : index
    %25 = vector.load %arg2[%c4_20, %c0_21, %c0_22] : memref<5x84x160xbf16, #tpu.memory_space<vmem>>, vector<1x84x160xbf16>
    %26 = vector.shape_cast %25 : vector<1x84x160xbf16> to vector<84x160xbf16>
    %cst_23 = arith.constant dense<0.000000e+00> : vector<52x160xf32>
    %27 = tpu.matmul %24, %26, %cst_23 {dimension_numbers = #tpu.dot_dimension_numbers<[1], [0], [0], [1], [0, 0, 1, 1], [], []>} : vector<52x84xbf16>, vector<84x160xbf16>, vector<52x160xf32> -> vector<52x160xf32>
    %28 = arith.addf %22, %27 : vector<52x160xf32>
    %c0_24 = arith.constant 0 : index
    %c0_25 = arith.constant 0 : index
    %29 = vector.load %arg3[%c0_24, %c0_25] : memref<20x52xf32, #tpu.memory_space<vmem>>, vector<20x52xf32>
    %cst_26 = arith.constant dense<0.000000e+00> : vector<20x160xf32>
    %30 = tpu.matmul %29, %28, %cst_26 {dimension_numbers = #tpu.dot_dimension_numbers<[1], [0], [0], [1], [0, 0, 1, 1], [], []>} : vector<20x52xf32>, vector<52x160xf32>, vector<20x160xf32> -> vector<20x160xf32>
    %c0_27 = arith.constant 0 : index
    %c0_28 = arith.constant 0 : index
    %31 = vector.load %arg4[%c0_27, %c0_28] : memref<20x52xf32, #tpu.memory_space<vmem>>, vector<20x52xf32>
    %cst_29 = arith.constant dense<0.000000e+00> : vector<20x160xf32>
    %32 = tpu.matmul %31, %28, %cst_29 {dimension_numbers = #tpu.dot_dimension_numbers<[1], [0], [0], [1], [0, 0, 1, 1], [], []>} : vector<20x52xf32>, vector<52x160xf32>, vector<20x160xf32> -> vector<20x160xf32>
    %33 = arith.maximumf %30, %32 : vector<20x160xf32>
    %c0_30 = arith.constant 0 : index
    %c0_31 = arith.constant 0 : index
    %34 = vector.load %arg5[%c0_30, %c0_31] : memref<160x80xf32, #tpu.memory_space<vmem>>, vector<160x80xf32>
    %cst_32 = arith.constant dense<0.000000e+00> : vector<20x80xf32>
    %35 = tpu.matmul %33, %34, %cst_32 {dimension_numbers = #tpu.dot_dimension_numbers<[1], [0], [0], [1], [0, 0, 1, 1], [], []>} : vector<20x160xf32>, vector<160x80xf32>, vector<20x80xf32> -> vector<20x80xf32>
    %c0_33 = arith.constant 0 : index
    %c0_34 = arith.constant 0 : index
    %36 = vector.load %arg6[%c0_33, %c0_34] : memref<160x80xf32, #tpu.memory_space<vmem>>, vector<160x80xf32>
    %cst_35 = arith.constant dense<0.000000e+00> : vector<20x80xf32>
    %37 = tpu.matmul %33, %36, %cst_35 {dimension_numbers = #tpu.dot_dimension_numbers<[1], [0], [0], [1], [0, 0, 1, 1], [], []>} : vector<20x160xf32>, vector<160x80xf32>, vector<20x80xf32> -> vector<20x80xf32>
    %38 = arith.maximumf %35, %37 : vector<20x80xf32>
    %c0_36 = arith.constant 0 : index
    %c0_37 = arith.constant 0 : index
    %39 = vector.load %arg7[%c0_36, %c0_37] : memref<1x80xf32, #tpu.memory_space<vmem>>, vector<1x80xf32>
    %40 = vector.broadcast %39 : vector<1x80xf32> to vector<20x80xf32>
    %41 = arith.addf %38, %40 : vector<20x80xf32>
    %cst_38 = arith.constant 2.000000e+01 : f32
    %42 = vector.broadcast %cst_38 : f32 to vector<20x80xf32>
    %43 = arith.cmpf ogt, %41, %42 : vector<20x80xf32>
    %cst_39 = arith.constant 2.000000e+01 : f32
    %44 = vector.broadcast %cst_39 : f32 to vector<20x80xf32>
    %45 = arith.minimumf %41, %44 : vector<20x80xf32>
    %46 = math.exp %45 : vector<20x80xf32>
    %47 = math.log1p %46 : vector<20x80xf32>
    %48 = arith.select %43, %41, %47 : vector<20x80xi1>, vector<20x80xf32>
    %49 = vector.extract_strided_slice %48 {offsets = [0, 0], sizes = [5, 80], strides = [1, 1]} : vector<20x80xf32> to vector<5x80xf32>
    %c0_40 = arith.constant 0 : index
    %c0_41 = arith.constant 0 : index
    %c0_42 = arith.constant 0 : index
    %50 = vector.load %arg8[%c0_40, %c0_41, %c0_42] : memref<4x5x80xf32, #tpu.memory_space<vmem>>, vector<1x5x80xf32>
    %51 = vector.shape_cast %50 : vector<1x5x80xf32> to vector<5x80xf32>
    %52 = vector.shape_cast %49 : vector<5x80xf32> to vector<1x5x80xf32>
    tpu.vector_store %arg8[%c0_40, %c0_41, %c0_42], %52 {strides = array<i32>} : memref<4x5x80xf32, #tpu.memory_space<vmem>>, vector<1x5x80xf32>,
    %53 = vector.extract_strided_slice %48 {offsets = [5, 0], sizes = [5, 80], strides = [1, 1]} : vector<20x80xf32> to vector<5x80xf32>
    %c1_43 = arith.constant 1 : index
    %c0_44 = arith.constant 0 : index
    %c0_45 = arith.constant 0 : index
    %54 = vector.load %arg8[%c1_43, %c0_44, %c0_45] : memref<4x5x80xf32, #tpu.memory_space<vmem>>, vector<1x5x80xf32>
    %55 = vector.shape_cast %54 : vector<1x5x80xf32> to vector<5x80xf32>
    %56 = vector.shape_cast %53 : vector<5x80xf32> to vector<1x5x80xf32>
    tpu.vector_store %arg8[%c1_43, %c0_44, %c0_45], %56 {strides = array<i32>} : memref<4x5x80xf32, #tpu.memory_space<vmem>>, vector<1x5x80xf32>,
    %57 = vector.extract_strided_slice %48 {offsets = [10, 0], sizes = [5, 80], strides = [1, 1]} : vector<20x80xf32> to vector<5x80xf32>
    %c2_46 = arith.constant 2 : index
    %c0_47 = arith.constant 0 : index
    %c0_48 = arith.constant 0 : index
    %58 = vector.load %arg8[%c2_46, %c0_47, %c0_48] : memref<4x5x80xf32, #tpu.memory_space<vmem>>, vector<1x5x80xf32>
    %59 = vector.shape_cast %58 : vector<1x5x80xf32> to vector<5x80xf32>
    %60 = vector.shape_cast %57 : vector<5x80xf32> to vector<1x5x80xf32>
    tpu.vector_store %arg8[%c2_46, %c0_47, %c0_48], %60 {strides = array<i32>} : memref<4x5x80xf32, #tpu.memory_space<vmem>>, vector<1x5x80xf32>,
    %61 = vector.extract_strided_slice %48 {offsets = [15, 0], sizes = [5, 80], strides = [1, 1]} : vector<20x80xf32> to vector<5x80xf32>
    %c3_49 = arith.constant 3 : index
    %c0_50 = arith.constant 0 : index
    %c0_51 = arith.constant 0 : index
    %62 = vector.load %arg8[%c3_49, %c0_50, %c0_51] : memref<4x5x80xf32, #tpu.memory_space<vmem>>, vector<1x5x80xf32>
    %63 = vector.shape_cast %62 : vector<1x5x80xf32> to vector<5x80xf32>
    %64 = vector.shape_cast %61 : vector<5x80xf32> to vector<1x5x80xf32>
    tpu.vector_store %arg8[%c3_49, %c0_50, %c0_51], %64 {strides = array<i32>} : memref<4x5x80xf32, #tpu.memory_space<vmem>>, vector<1x5x80xf32>,
    return
  }
  func.func @transform_0(%arg0: i32) -> (i32, i32) {
    %c0_i32 = arith.constant 0 : i32
    %c0_i32_0 = arith.constant 0 : i32
    return %arg0, %c0_i32 : i32, i32
  }
  func.func @transform_1(%arg0: i32) -> (i32, i32, i32) {
    %c0_i32 = arith.constant 0 : i32
    %c0_i32_0 = arith.constant 0 : i32
    %c0_i32_1 = arith.constant 0 : i32
    %c0_i32_2 = arith.constant 0 : i32
    return %c0_i32, %c0_i32_0, %c0_i32_1 : i32, i32, i32
  }
  func.func @transform_2(%arg0: i32) -> (i32, i32) {
    %c0_i32 = arith.constant 0 : i32
    %c0_i32_0 = arith.constant 0 : i32
    %c0_i32_1 = arith.constant 0 : i32
    return %c0_i32, %c0_i32_0 : i32, i32
  }
  func.func @transform_3(%arg0: i32) -> (i32, i32) {
    %c0_i32 = arith.constant 0 : i32
    %c0_i32_0 = arith.constant 0 : i32
    %c0_i32_1 = arith.constant 0 : i32
    return %c0_i32, %c0_i32_0 : i32, i32
  }
  func.func @transform_4(%arg0: i32) -> (i32, i32) {
    %c0_i32 = arith.constant 0 : i32
    %c0_i32_0 = arith.constant 0 : i32
    %c0_i32_1 = arith.constant 0 : i32
    return %c0_i32, %c0_i32_0 : i32, i32
  }
  func.func @transform_5(%arg0: i32) -> (i32, i32) {
    %c0_i32 = arith.constant 0 : i32
    %c0_i32_0 = arith.constant 0 : i32
    %c0_i32_1 = arith.constant 0 : i32
    return %c0_i32, %c0_i32_0 : i32, i32
  }
  func.func @transform_6(%arg0: i32) -> (i32, i32) {
    %c0_i32 = arith.constant 0 : i32
    %c0_i32_0 = arith.constant 0 : i32
    %c0_i32_1 = arith.constant 0 : i32
    return %c0_i32, %c0_i32_0 : i32, i32
  }
  func.func @transform_7(%arg0: i32) -> (i32, i32, i32) {
    %c0_i32 = arith.constant 0 : i32
    %c0_i32_0 = arith.constant 0 : i32
    %c0_i32_1 = arith.constant 0 : i32
    return %arg0, %c0_i32, %c0_i32_0 : i32, i32, i32
  }
}

module attributes {stable_mosaic.version = 11 : i64} {
  func.func @_conv_pool_kernel(%arg0: i32, %arg1: memref<128x96xf32, #tpu.memory_space<vmem>>, %arg2: memref<5x96x168xbf16, #tpu.memory_space<vmem>>, %arg3: memref<56x124xf32, #tpu.memory_space<vmem>>, %arg4: memref<56x124xf32, #tpu.memory_space<vmem>>, %arg5: memref<168x84xf32, #tpu.memory_space<vmem>>, %arg6: memref<168x84xf32, #tpu.memory_space<vmem>>, %arg7: memref<1x84xf32, #tpu.memory_space<vmem>>, %arg8: memref<4x14x84xf32, #tpu.memory_space<vmem>>) attributes {dimension_semantics = [#tpu.dimension_semantics<parallel>], iteration_bounds = array<i64: 2>, scalar_prefetch = 0 : i64, scratch_operands = 0 : i64, tpu.core_type = #tpu.core_type<tc>, window_params = [{transform_indices = @transform_0, window_bounds = array<i64: 128, 96>}, {pipeline_mode = #tpu.pipeline_mode<synchronous>, transform_indices = @transform_1, window_bounds = array<i64: 5, 96, 168>}, {pipeline_mode = #tpu.pipeline_mode<synchronous>, transform_indices = @transform_2, window_bounds = array<i64: 56, 124>}, {pipeline_mode = #tpu.pipeline_mode<synchronous>, transform_indices = @transform_3, window_bounds = array<i64: 56, 124>}, {pipeline_mode = #tpu.pipeline_mode<synchronous>, transform_indices = @transform_4, window_bounds = array<i64: 168, 84>}, {pipeline_mode = #tpu.pipeline_mode<synchronous>, transform_indices = @transform_5, window_bounds = array<i64: 168, 84>}, {pipeline_mode = #tpu.pipeline_mode<synchronous>, transform_indices = @transform_6, window_bounds = array<i64: 1, 84>}, {transform_indices = @transform_7, window_bounds = array<i64: 4, 14, 84>}]} {
    %c0 = arith.constant 0 : index
    %c0_0 = arith.constant 0 : index
    %0 = vector.load %arg1[%c0, %c0_0] : memref<128x96xf32, #tpu.memory_space<vmem>>, vector<124x96xf32>
    %1 = arith.truncf %0 : vector<124x96xf32> to vector<124x96xbf16>
    %c0_1 = arith.constant 0 : index
    %c0_2 = arith.constant 0 : index
    %c0_3 = arith.constant 0 : index
    %2 = vector.load %arg2[%c0_1, %c0_2, %c0_3] : memref<5x96x168xbf16, #tpu.memory_space<vmem>>, vector<1x96x168xbf16>
    %3 = vector.shape_cast %2 : vector<1x96x168xbf16> to vector<96x168xbf16>
    %cst = arith.constant dense<0.000000e+00> : vector<124x168xf32>
    %4 = tpu.matmul %1, %3, %cst {dimension_numbers = #tpu.dot_dimension_numbers<[1], [0], [0], [1], [0, 0, 1, 1], [], []>} : vector<124x96xbf16>, vector<96x168xbf16>, vector<124x168xf32> -> vector<124x168xf32>
    %c1 = arith.constant 1 : index
    %c0_4 = arith.constant 0 : index
    %5 = vector.load %arg1[%c1, %c0_4] : memref<128x96xf32, #tpu.memory_space<vmem>>, vector<124x96xf32>
    %6 = arith.truncf %5 : vector<124x96xf32> to vector<124x96xbf16>
    %c1_5 = arith.constant 1 : index
    %c0_6 = arith.constant 0 : index
    %c0_7 = arith.constant 0 : index
    %7 = vector.load %arg2[%c1_5, %c0_6, %c0_7] : memref<5x96x168xbf16, #tpu.memory_space<vmem>>, vector<1x96x168xbf16>
    %8 = vector.shape_cast %7 : vector<1x96x168xbf16> to vector<96x168xbf16>
    %cst_8 = arith.constant dense<0.000000e+00> : vector<124x168xf32>
    %9 = tpu.matmul %6, %8, %cst_8 {dimension_numbers = #tpu.dot_dimension_numbers<[1], [0], [0], [1], [0, 0, 1, 1], [], []>} : vector<124x96xbf16>, vector<96x168xbf16>, vector<124x168xf32> -> vector<124x168xf32>
    %10 = arith.addf %4, %9 : vector<124x168xf32>
    %c2 = arith.constant 2 : index
    %c0_9 = arith.constant 0 : index
    %11 = vector.load %arg1[%c2, %c0_9] : memref<128x96xf32, #tpu.memory_space<vmem>>, vector<124x96xf32>
    %12 = arith.truncf %11 : vector<124x96xf32> to vector<124x96xbf16>
    %c2_10 = arith.constant 2 : index
    %c0_11 = arith.constant 0 : index
    %c0_12 = arith.constant 0 : index
    %13 = vector.load %arg2[%c2_10, %c0_11, %c0_12] : memref<5x96x168xbf16, #tpu.memory_space<vmem>>, vector<1x96x168xbf16>
    %14 = vector.shape_cast %13 : vector<1x96x168xbf16> to vector<96x168xbf16>
    %cst_13 = arith.constant dense<0.000000e+00> : vector<124x168xf32>
    %15 = tpu.matmul %12, %14, %cst_13 {dimension_numbers = #tpu.dot_dimension_numbers<[1], [0], [0], [1], [0, 0, 1, 1], [], []>} : vector<124x96xbf16>, vector<96x168xbf16>, vector<124x168xf32> -> vector<124x168xf32>
    %16 = arith.addf %10, %15 : vector<124x168xf32>
    %c3 = arith.constant 3 : index
    %c0_14 = arith.constant 0 : index
    %17 = vector.load %arg1[%c3, %c0_14] : memref<128x96xf32, #tpu.memory_space<vmem>>, vector<124x96xf32>
    %18 = arith.truncf %17 : vector<124x96xf32> to vector<124x96xbf16>
    %c3_15 = arith.constant 3 : index
    %c0_16 = arith.constant 0 : index
    %c0_17 = arith.constant 0 : index
    %19 = vector.load %arg2[%c3_15, %c0_16, %c0_17] : memref<5x96x168xbf16, #tpu.memory_space<vmem>>, vector<1x96x168xbf16>
    %20 = vector.shape_cast %19 : vector<1x96x168xbf16> to vector<96x168xbf16>
    %cst_18 = arith.constant dense<0.000000e+00> : vector<124x168xf32>
    %21 = tpu.matmul %18, %20, %cst_18 {dimension_numbers = #tpu.dot_dimension_numbers<[1], [0], [0], [1], [0, 0, 1, 1], [], []>} : vector<124x96xbf16>, vector<96x168xbf16>, vector<124x168xf32> -> vector<124x168xf32>
    %22 = arith.addf %16, %21 : vector<124x168xf32>
    %c4 = arith.constant 4 : index
    %c0_19 = arith.constant 0 : index
    %23 = vector.load %arg1[%c4, %c0_19] : memref<128x96xf32, #tpu.memory_space<vmem>>, vector<124x96xf32>
    %24 = arith.truncf %23 : vector<124x96xf32> to vector<124x96xbf16>
    %c4_20 = arith.constant 4 : index
    %c0_21 = arith.constant 0 : index
    %c0_22 = arith.constant 0 : index
    %25 = vector.load %arg2[%c4_20, %c0_21, %c0_22] : memref<5x96x168xbf16, #tpu.memory_space<vmem>>, vector<1x96x168xbf16>
    %26 = vector.shape_cast %25 : vector<1x96x168xbf16> to vector<96x168xbf16>
    %cst_23 = arith.constant dense<0.000000e+00> : vector<124x168xf32>
    %27 = tpu.matmul %24, %26, %cst_23 {dimension_numbers = #tpu.dot_dimension_numbers<[1], [0], [0], [1], [0, 0, 1, 1], [], []>} : vector<124x96xbf16>, vector<96x168xbf16>, vector<124x168xf32> -> vector<124x168xf32>
    %28 = arith.addf %22, %27 : vector<124x168xf32>
    %c0_24 = arith.constant 0 : index
    %c0_25 = arith.constant 0 : index
    %29 = vector.load %arg3[%c0_24, %c0_25] : memref<56x124xf32, #tpu.memory_space<vmem>>, vector<56x124xf32>
    %cst_26 = arith.constant dense<0.000000e+00> : vector<56x168xf32>
    %30 = tpu.matmul %29, %28, %cst_26 {dimension_numbers = #tpu.dot_dimension_numbers<[1], [0], [0], [1], [0, 0, 1, 1], [], []>} : vector<56x124xf32>, vector<124x168xf32>, vector<56x168xf32> -> vector<56x168xf32>
    %c0_27 = arith.constant 0 : index
    %c0_28 = arith.constant 0 : index
    %31 = vector.load %arg4[%c0_27, %c0_28] : memref<56x124xf32, #tpu.memory_space<vmem>>, vector<56x124xf32>
    %cst_29 = arith.constant dense<0.000000e+00> : vector<56x168xf32>
    %32 = tpu.matmul %31, %28, %cst_29 {dimension_numbers = #tpu.dot_dimension_numbers<[1], [0], [0], [1], [0, 0, 1, 1], [], []>} : vector<56x124xf32>, vector<124x168xf32>, vector<56x168xf32> -> vector<56x168xf32>
    %33 = arith.maximumf %30, %32 : vector<56x168xf32>
    %c0_30 = arith.constant 0 : index
    %c0_31 = arith.constant 0 : index
    %34 = vector.load %arg5[%c0_30, %c0_31] : memref<168x84xf32, #tpu.memory_space<vmem>>, vector<168x84xf32>
    %cst_32 = arith.constant dense<0.000000e+00> : vector<56x84xf32>
    %35 = tpu.matmul %33, %34, %cst_32 {dimension_numbers = #tpu.dot_dimension_numbers<[1], [0], [0], [1], [0, 0, 1, 1], [], []>} : vector<56x168xf32>, vector<168x84xf32>, vector<56x84xf32> -> vector<56x84xf32>
    %c0_33 = arith.constant 0 : index
    %c0_34 = arith.constant 0 : index
    %36 = vector.load %arg6[%c0_33, %c0_34] : memref<168x84xf32, #tpu.memory_space<vmem>>, vector<168x84xf32>
    %cst_35 = arith.constant dense<0.000000e+00> : vector<56x84xf32>
    %37 = tpu.matmul %33, %36, %cst_35 {dimension_numbers = #tpu.dot_dimension_numbers<[1], [0], [0], [1], [0, 0, 1, 1], [], []>} : vector<56x168xf32>, vector<168x84xf32>, vector<56x84xf32> -> vector<56x84xf32>
    %38 = arith.maximumf %35, %37 : vector<56x84xf32>
    %c0_36 = arith.constant 0 : index
    %c0_37 = arith.constant 0 : index
    %39 = vector.load %arg7[%c0_36, %c0_37] : memref<1x84xf32, #tpu.memory_space<vmem>>, vector<1x84xf32>
    %40 = vector.broadcast %39 : vector<1x84xf32> to vector<56x84xf32>
    %41 = arith.addf %38, %40 : vector<56x84xf32>
    %cst_38 = arith.constant 2.000000e+01 : f32
    %42 = vector.broadcast %cst_38 : f32 to vector<56x84xf32>
    %43 = arith.cmpf ogt, %41, %42 : vector<56x84xf32>
    %cst_39 = arith.constant 2.000000e+01 : f32
    %44 = vector.broadcast %cst_39 : f32 to vector<56x84xf32>
    %45 = arith.minimumf %41, %44 : vector<56x84xf32>
    %46 = math.exp %45 : vector<56x84xf32>
    %47 = math.log1p %46 : vector<56x84xf32>
    %48 = arith.select %43, %41, %47 : vector<56x84xi1>, vector<56x84xf32>
    %49 = vector.extract_strided_slice %48 {offsets = [0, 0], sizes = [14, 84], strides = [1, 1]} : vector<56x84xf32> to vector<14x84xf32>
    %c0_40 = arith.constant 0 : index
    %c0_41 = arith.constant 0 : index
    %c0_42 = arith.constant 0 : index
    %50 = vector.load %arg8[%c0_40, %c0_41, %c0_42] : memref<4x14x84xf32, #tpu.memory_space<vmem>>, vector<1x14x84xf32>
    %51 = vector.shape_cast %50 : vector<1x14x84xf32> to vector<14x84xf32>
    %52 = vector.shape_cast %49 : vector<14x84xf32> to vector<1x14x84xf32>
    tpu.vector_store %arg8[%c0_40, %c0_41, %c0_42], %52 {strides = array<i32>} : memref<4x14x84xf32, #tpu.memory_space<vmem>>, vector<1x14x84xf32>,
    %53 = vector.extract_strided_slice %48 {offsets = [14, 0], sizes = [14, 84], strides = [1, 1]} : vector<56x84xf32> to vector<14x84xf32>
    %c1_43 = arith.constant 1 : index
    %c0_44 = arith.constant 0 : index
    %c0_45 = arith.constant 0 : index
    %54 = vector.load %arg8[%c1_43, %c0_44, %c0_45] : memref<4x14x84xf32, #tpu.memory_space<vmem>>, vector<1x14x84xf32>
    %55 = vector.shape_cast %54 : vector<1x14x84xf32> to vector<14x84xf32>
    %56 = vector.shape_cast %53 : vector<14x84xf32> to vector<1x14x84xf32>
    tpu.vector_store %arg8[%c1_43, %c0_44, %c0_45], %56 {strides = array<i32>} : memref<4x14x84xf32, #tpu.memory_space<vmem>>, vector<1x14x84xf32>,
    %57 = vector.extract_strided_slice %48 {offsets = [28, 0], sizes = [14, 84], strides = [1, 1]} : vector<56x84xf32> to vector<14x84xf32>
    %c2_46 = arith.constant 2 : index
    %c0_47 = arith.constant 0 : index
    %c0_48 = arith.constant 0 : index
    %58 = vector.load %arg8[%c2_46, %c0_47, %c0_48] : memref<4x14x84xf32, #tpu.memory_space<vmem>>, vector<1x14x84xf32>
    %59 = vector.shape_cast %58 : vector<1x14x84xf32> to vector<14x84xf32>
    %60 = vector.shape_cast %57 : vector<14x84xf32> to vector<1x14x84xf32>
    tpu.vector_store %arg8[%c2_46, %c0_47, %c0_48], %60 {strides = array<i32>} : memref<4x14x84xf32, #tpu.memory_space<vmem>>, vector<1x14x84xf32>,
    %61 = vector.extract_strided_slice %48 {offsets = [42, 0], sizes = [14, 84], strides = [1, 1]} : vector<56x84xf32> to vector<14x84xf32>
    %c3_49 = arith.constant 3 : index
    %c0_50 = arith.constant 0 : index
    %c0_51 = arith.constant 0 : index
    %62 = vector.load %arg8[%c3_49, %c0_50, %c0_51] : memref<4x14x84xf32, #tpu.memory_space<vmem>>, vector<1x14x84xf32>
    %63 = vector.shape_cast %62 : vector<1x14x84xf32> to vector<14x84xf32>
    %64 = vector.shape_cast %61 : vector<14x84xf32> to vector<1x14x84xf32>
    tpu.vector_store %arg8[%c3_49, %c0_50, %c0_51], %64 {strides = array<i32>} : memref<4x14x84xf32, #tpu.memory_space<vmem>>, vector<1x14x84xf32>,
    return
  }
  func.func @transform_0(%arg0: i32) -> (i32, i32) {
    %c0_i32 = arith.constant 0 : i32
    %c0_i32_0 = arith.constant 0 : i32
    return %arg0, %c0_i32 : i32, i32
  }
  func.func @transform_1(%arg0: i32) -> (i32, i32, i32) {
    %c0_i32 = arith.constant 0 : i32
    %c0_i32_0 = arith.constant 0 : i32
    %c0_i32_1 = arith.constant 0 : i32
    %c0_i32_2 = arith.constant 0 : i32
    return %c0_i32, %c0_i32_0, %c0_i32_1 : i32, i32, i32
  }
  func.func @transform_2(%arg0: i32) -> (i32, i32) {
    %c0_i32 = arith.constant 0 : i32
    %c0_i32_0 = arith.constant 0 : i32
    %c0_i32_1 = arith.constant 0 : i32
    return %c0_i32, %c0_i32_0 : i32, i32
  }
  func.func @transform_3(%arg0: i32) -> (i32, i32) {
    %c0_i32 = arith.constant 0 : i32
    %c0_i32_0 = arith.constant 0 : i32
    %c0_i32_1 = arith.constant 0 : i32
    return %c0_i32, %c0_i32_0 : i32, i32
  }
  func.func @transform_4(%arg0: i32) -> (i32, i32) {
    %c0_i32 = arith.constant 0 : i32
    %c0_i32_0 = arith.constant 0 : i32
    %c0_i32_1 = arith.constant 0 : i32
    return %c0_i32, %c0_i32_0 : i32, i32
  }
  func.func @transform_5(%arg0: i32) -> (i32, i32) {
    %c0_i32 = arith.constant 0 : i32
    %c0_i32_0 = arith.constant 0 : i32
    %c0_i32_1 = arith.constant 0 : i32
    return %c0_i32, %c0_i32_0 : i32, i32
  }
  func.func @transform_6(%arg0: i32) -> (i32, i32) {
    %c0_i32 = arith.constant 0 : i32
    %c0_i32_0 = arith.constant 0 : i32
    %c0_i32_1 = arith.constant 0 : i32
    return %c0_i32, %c0_i32_0 : i32, i32
  }
  func.func @transform_7(%arg0: i32) -> (i32, i32, i32) {
    %c0_i32 = arith.constant 0 : i32
    %c0_i32_0 = arith.constant 0 : i32
    %c0_i32_1 = arith.constant 0 : i32
    return %arg0, %c0_i32, %c0_i32_0 : i32, i32, i32
  }
}

module attributes {stable_mosaic.version = 11 : i64} {
  func.func @_fc_stack_kernel(%arg0: i32, %arg1: memref<8x400xf32, #tpu.memory_space<vmem>>, %arg2: memref<400x128xbf16, #tpu.memory_space<vmem>>, %arg3: memref<1x128xf32, #tpu.memory_space<vmem>>, %arg4: memref<128x128xbf16, #tpu.memory_space<vmem>>, %arg5: memref<1x128xf32, #tpu.memory_space<vmem>>, %arg6: memref<128x10xbf16, #tpu.memory_space<vmem>>, %arg7: memref<1x10xf32, #tpu.memory_space<vmem>>, %arg8: memref<8x10xf32, #tpu.memory_space<vmem>>) attributes {dimension_semantics = [#tpu.dimension_semantics<parallel>], iteration_bounds = array<i64: 1>, scalar_prefetch = 0 : i64, scratch_operands = 0 : i64, tpu.core_type = #tpu.core_type<tc>, window_params = [{transform_indices = @transform_0, window_bounds = array<i64: 8, 400>}, {pipeline_mode = #tpu.pipeline_mode<synchronous>, transform_indices = @transform_1, window_bounds = array<i64: 400, 128>}, {pipeline_mode = #tpu.pipeline_mode<synchronous>, transform_indices = @transform_2, window_bounds = array<i64: 1, 128>}, {pipeline_mode = #tpu.pipeline_mode<synchronous>, transform_indices = @transform_3, window_bounds = array<i64: 128, 128>}, {pipeline_mode = #tpu.pipeline_mode<synchronous>, transform_indices = @transform_4, window_bounds = array<i64: 1, 128>}, {pipeline_mode = #tpu.pipeline_mode<synchronous>, transform_indices = @transform_5, window_bounds = array<i64: 128, 10>}, {pipeline_mode = #tpu.pipeline_mode<synchronous>, transform_indices = @transform_6, window_bounds = array<i64: 1, 10>}, {transform_indices = @transform_7, window_bounds = array<i64: 8, 10>}]} {
    %c0 = arith.constant 0 : index
    %c0_0 = arith.constant 0 : index
    %0 = vector.load %arg1[%c0, %c0_0] : memref<8x400xf32, #tpu.memory_space<vmem>>, vector<8x400xf32>
    %1 = arith.truncf %0 : vector<8x400xf32> to vector<8x400xbf16>
    %c0_1 = arith.constant 0 : index
    %c0_2 = arith.constant 0 : index
    %2 = vector.load %arg2[%c0_1, %c0_2] : memref<400x128xbf16, #tpu.memory_space<vmem>>, vector<400x128xbf16>
    %cst = arith.constant dense<0.000000e+00> : vector<8x128xf32>
    %3 = tpu.matmul %1, %2, %cst {dimension_numbers = #tpu.dot_dimension_numbers<[1], [0], [0], [1], [0, 0, 1, 1], [], []>} : vector<8x400xbf16>, vector<400x128xbf16>, vector<8x128xf32> -> vector<8x128xf32>
    %c0_3 = arith.constant 0 : index
    %c0_4 = arith.constant 0 : index
    %4 = vector.load %arg3[%c0_3, %c0_4] : memref<1x128xf32, #tpu.memory_space<vmem>>, vector<1x128xf32>
    %5 = vector.broadcast %4 : vector<1x128xf32> to vector<8x128xf32>
    %6 = arith.addf %3, %5 : vector<8x128xf32>
    %cst_5 = arith.constant 2.000000e+01 : f32
    %7 = vector.broadcast %cst_5 : f32 to vector<8x128xf32>
    %8 = arith.cmpf ogt, %6, %7 : vector<8x128xf32>
    %cst_6 = arith.constant 2.000000e+01 : f32
    %9 = vector.broadcast %cst_6 : f32 to vector<8x128xf32>
    %10 = arith.minimumf %6, %9 : vector<8x128xf32>
    %11 = math.exp %10 : vector<8x128xf32>
    %12 = math.log1p %11 : vector<8x128xf32>
    %13 = arith.select %8, %6, %12 : vector<8x128xi1>, vector<8x128xf32>
    %14 = arith.truncf %13 : vector<8x128xf32> to vector<8x128xbf16>
    %c0_7 = arith.constant 0 : index
    %c0_8 = arith.constant 0 : index
    %15 = vector.load %arg4[%c0_7, %c0_8] : memref<128x128xbf16, #tpu.memory_space<vmem>>, vector<128x128xbf16>
    %cst_9 = arith.constant dense<0.000000e+00> : vector<8x128xf32>
    %16 = tpu.matmul %14, %15, %cst_9 {dimension_numbers = #tpu.dot_dimension_numbers<[1], [0], [0], [1], [0, 0, 1, 1], [], []>} : vector<8x128xbf16>, vector<128x128xbf16>, vector<8x128xf32> -> vector<8x128xf32>
    %c0_10 = arith.constant 0 : index
    %c0_11 = arith.constant 0 : index
    %17 = vector.load %arg5[%c0_10, %c0_11] : memref<1x128xf32, #tpu.memory_space<vmem>>, vector<1x128xf32>
    %18 = vector.broadcast %17 : vector<1x128xf32> to vector<8x128xf32>
    %19 = arith.addf %16, %18 : vector<8x128xf32>
    %cst_12 = arith.constant 2.000000e+01 : f32
    %20 = vector.broadcast %cst_12 : f32 to vector<8x128xf32>
    %21 = arith.cmpf ogt, %19, %20 : vector<8x128xf32>
    %cst_13 = arith.constant 2.000000e+01 : f32
    %22 = vector.broadcast %cst_13 : f32 to vector<8x128xf32>
    %23 = arith.minimumf %19, %22 : vector<8x128xf32>
    %24 = math.exp %23 : vector<8x128xf32>
    %25 = math.log1p %24 : vector<8x128xf32>
    %26 = arith.select %21, %19, %25 : vector<8x128xi1>, vector<8x128xf32>
    %27 = arith.truncf %26 : vector<8x128xf32> to vector<8x128xbf16>
    %c0_14 = arith.constant 0 : index
    %c0_15 = arith.constant 0 : index
    %28 = vector.load %arg6[%c0_14, %c0_15] : memref<128x10xbf16, #tpu.memory_space<vmem>>, vector<128x10xbf16>
    %cst_16 = arith.constant dense<0.000000e+00> : vector<8x10xf32>
    %29 = tpu.matmul %27, %28, %cst_16 {dimension_numbers = #tpu.dot_dimension_numbers<[1], [0], [0], [1], [0, 0, 1, 1], [], []>} : vector<8x128xbf16>, vector<128x10xbf16>, vector<8x10xf32> -> vector<8x10xf32>
    %c0_17 = arith.constant 0 : index
    %c0_18 = arith.constant 0 : index
    %30 = vector.load %arg7[%c0_17, %c0_18] : memref<1x10xf32, #tpu.memory_space<vmem>>, vector<1x10xf32>
    %31 = vector.broadcast %30 : vector<1x10xf32> to vector<8x10xf32>
    %32 = arith.addf %29, %31 : vector<8x10xf32>
    %c0_19 = arith.constant 0 : index
    %c0_20 = arith.constant 0 : index
    %33 = vector.load %arg8[%c0_19, %c0_20] : memref<8x10xf32, #tpu.memory_space<vmem>>, vector<8x10xf32>
    tpu.vector_store %arg8[%c0_19, %c0_20], %32 {strides = array<i32>} : memref<8x10xf32, #tpu.memory_space<vmem>>, vector<8x10xf32>,
    return
  }
  func.func @transform_0(%arg0: i32) -> (i32, i32) {
    %c0_i32 = arith.constant 0 : i32
    %c0_i32_0 = arith.constant 0 : i32
    return %arg0, %c0_i32 : i32, i32
  }
  func.func @transform_1(%arg0: i32) -> (i32, i32) {
    %c0_i32 = arith.constant 0 : i32
    %c0_i32_0 = arith.constant 0 : i32
    %c0_i32_1 = arith.constant 0 : i32
    return %c0_i32, %c0_i32_0 : i32, i32
  }
  func.func @transform_2(%arg0: i32) -> (i32, i32) {
    %c0_i32 = arith.constant 0 : i32
    %c0_i32_0 = arith.constant 0 : i32
    %c0_i32_1 = arith.constant 0 : i32
    return %c0_i32, %c0_i32_0 : i32, i32
  }
  func.func @transform_3(%arg0: i32) -> (i32, i32) {
    %c0_i32 = arith.constant 0 : i32
    %c0_i32_0 = arith.constant 0 : i32
    %c0_i32_1 = arith.constant 0 : i32
    return %c0_i32, %c0_i32_0 : i32, i32
  }
  func.func @transform_4(%arg0: i32) -> (i32, i32) {
    %c0_i32 = arith.constant 0 : i32
    %c0_i32_0 = arith.constant 0 : i32
    %c0_i32_1 = arith.constant 0 : i32
    return %c0_i32, %c0_i32_0 : i32, i32
  }
  func.func @transform_5(%arg0: i32) -> (i32, i32) {
    %c0_i32 = arith.constant 0 : i32
    %c0_i32_0 = arith.constant 0 : i32
    %c0_i32_1 = arith.constant 0 : i32
    return %c0_i32, %c0_i32_0 : i32, i32
  }
  func.func @transform_6(%arg0: i32) -> (i32, i32) {
    %c0_i32 = arith.constant 0 : i32
    %c0_i32_0 = arith.constant 0 : i32
    %c0_i32_1 = arith.constant 0 : i32
    return %c0_i32, %c0_i32_0 : i32, i32
  }
  func.func @transform_7(%arg0: i32) -> (i32, i32) {
    %c0_i32 = arith.constant 0 : i32
    %c0_i32_0 = arith.constant 0 : i32
    return %arg0, %c0_i32 : i32, i32
  }
}

</mosaic_0001>

<bundles_post_ra>
// kernel: lenet_forward.5
= control target key start
LH: loop header
LB: loop body
LE: loop exit
PB: predicated region body
PF: predicated region fallthrough
CT: control target
= control target key end

     0   :  { %v795_v1 = vmov 0   ;;  %vm243_vm0 = vcmask 130048   ;;  %s1013_s0 = inlined_call_operand.vmem [shape: f32[8,400], index: 0, kind: input, shape index: {}]   ;;  %s1014_s1 = inlined_call_operand.vmem [shape: bf16[400,128], index: 1, kind: input, shape index: {}]   ;;  %s1015_s2 = inlined_call_operand.vmem [shape: f32[1,128], index: 2, kind: input, shape index: {}]   ;;  %s1016_s3 = inlined_call_operand.vmem [shape: bf16[128,128], index: 3, kind: input, shape index: {}]   ;;  %s1017_s4 = inlined_call_operand.vmem [shape: f32[1,128], index: 4, kind: input, shape index: {}]   ;;  %s1018_s5 = inlined_call_operand.vmem [shape: bf16[128,10], index: 5, kind: input, shape index: {}]   ;;  %s1019_s6 = inlined_call_operand.vmem [shape: f32[1,10], index: 6, kind: input, shape index: {}]   ;;  %s1020_s7 = inlined_call_operand.hbm [shape: f32[8,10], index: 7, kind: output, shape index: {}]  }
   0x1   :  { %v724_v0 = vld [vmem:[%s1014_s1 + $0x78] sm:$0xff]   ;;  %287 = vmatprep.subr.bf16.mxu1 %v795_v1  ;;  %v727_v4 = vld [vmem:[%s1014_s1 + $0x70] sm:$0xff]   ;;  %v730_v7 = vld [vmem:[%s1014_s1 + $0x68] sm:$0xff]  }
   0x2   :  { %v725_v2 = vld [vmem:[%s1014_s1 + $0xb8] sm:$0xff]   ;;  %640 = vmatprep.subr.bf16.mxu0 %v724_v0  ;;  %v728_v5 = vld [vmem:[%s1014_s1 + $0xb0] sm:$0xff]   ;;  %v731_v8 = vld [vmem:[%s1014_s1 + $0xa8] sm:$0xff]  }
   0x3   :  { %v726_v3 = vld [vmem:[%s1014_s1 + $0x38] sm:$0xff]   ;;  %288 = vmatpush1.bf16.msra.mxu1 %v725_v2  ;;  %v729_v6 = vld [vmem:[%s1014_s1 + $0x30] sm:$0xff]   ;;  %v732_v9 = vld [vmem:[%s1014_s1 + $0x28] sm:$0xff]  }
   0x4   :  { %641 = vmatpush3.bf16.msra.mxu0 %v726_v3  ;;  %289 = vmatprep.subr.bf16.mxu1 %v795_v1  ;;  %v733_v10 = vld [vmem:[%s1014_s1 + $0x60] sm:$0xff]   ;;  %v736_v13 = vld [vmem:[%s1014_s1 + $0x58] sm:$0xff]   ;;  %v739_v16 = vld [vmem:[%s1014_s1 + $0x50] sm:$0xff]  }
   0x5   :  { %642 = vmatprep.subr.bf16.mxu0 %v727_v4  ;;  %v734_v11 = vld [vmem:[%s1014_s1 + $0xa0] sm:$0xff]   ;;  %v737_v14 = vld [vmem:[%s1014_s1 + $0x98] sm:$0xff]   ;;  %v740_v17 = vld [vmem:[%s1014_s1 + $0x90] sm:$0xff]  }
   0x6   :  { %v735_v12 = vld [vmem:[%s1014_s1 + $0x20] sm:$0xff]   ;;  %v738_v15 = vld [vmem:[%s1014_s1 + $0x18] sm:$0xff]   ;;  %v741_v18 = vld [vmem:[%s1014_s1 + $0x10] sm:$0xff]  }
   0x7   :  { %290 = vmatpush1.bf16.msra.mxu1 %v728_v5  ;;  %v742_v19 = vld [vmem:[%s1014_s1 + $0x48] sm:$0xff]   ;;  %v745_v22 = vld [vmem:[%s1014_s1 + $0x40] sm:$0xff]   ;;  %v31_v26 = vld [vmem:[%s1013_s0 + $0x18] sm:$0xff] }
   0x8   :  { %643 = vmatpush3.bf16.msra.mxu0 %v729_v6  ;;  %291 = vmatprep.subr.bf16.mxu1 %v795_v1  ;;  %v743_v20 = vld [vmem:[%s1014_s1 + $0x88] sm:$0xff]   ;;  %v746_v24 = vld [vmem:[%s1014_s1 + $0x80] sm:$0xff]   ;;  %v35_v29 = vpack.c.bf16 %v31_v26, %v31_v26  ;;  %v30_v31 = vld [vmem:[%s1013_s0 + $0x10] sm:$0xff] }
   0x9   :  { %644 = vmatprep.subr.bf16.mxu0 %v730_v7  ;;  %v744_v21 = vld [vmem:[%s1014_s1 + $0x8] sm:$0xff]   ;;  %v747_v27 = vld [vmem:[%s1014_s1] sm:$0xff]   ;;  %v34_v33 = vpack.c.bf16 %v30_v31, %v30_v31 }
   0xa   :  { %v29_v23 = vld [vmem:[%s1013_s0 + $0x8] sm:$0xff]  ;;  %v28_v28 = vld [vmem:[%s1013_s0] sm:$0xff]  ;;  %621 = vmatprep.mubr.msk.bf16.mxu1 %vm243_vm0, %v35_v29 }
   0xb   :  { %292 = vmatpush1.bf16.msra.mxu1 %v731_v8  ;;  %v33_v25 = vpack.c.bf16 %v29_v23, %v29_v23  ;;  %v748_v30 = vld [vmem:[%s1014_s1 + $0xc0] sm:$0xff]   ;;  %v32_v32 = vpack.c.bf16 %v28_v28, %v28_v28 }
   0xc   :  { %645 = vmatpush3.bf16.msra.mxu0 %v732_v9  ;;  %293 = vmatprep.subr.bf16.mxu1 %v795_v1 }
   0xd   :  { %646 = vmatprep.subr.bf16.mxu0 %v733_v10  ;;  %279 = vmatprep.mubr.bf16.mxu0 %v33_v25 }
   0xf   :  { %294 = vmatpush1.bf16.msra.mxu1 %v734_v11 }
  0x10   :  { %647 = vmatpush3.bf16.msra.mxu0 %v735_v12  ;;  %295 = vmatprep.subr.bf16.mxu1 %v795_v1 }
  0x11   :  { %648 = vmatprep.subr.bf16.mxu0 %v736_v13 }
  0x13   :  { %296 = vmatpush1.bf16.msra.mxu1 %v737_v14 }
  0x14   :  { %649 = vmatpush3.bf16.msra.mxu0 %v738_v15  ;;  %297 = vmatprep.subr.bf16.mxu1 %v795_v1 }
  0x15   :  { %650 = vmatprep.subr.bf16.mxu0 %v739_v16 }
  0x17   :  { %298 = vmatpush1.bf16.msra.mxu1 %v740_v17 }
  0x18   :  { %651 = vmatpush3.bf16.msra.mxu0 %v741_v18  ;;  %299 = vmatprep.subr.bf16.mxu1 %v795_v1 }
  0x19   :  { %652 = vmatprep.subr.bf16.mxu0 %v742_v19 }
  0x1b   :  { %300 = vmatpush1.bf16.msra.mxu1 %v743_v20 }
  0x1c   :  { %653 = vmatpush3.bf16.msra.mxu0 %v744_v21  ;;  %301 = vmatprep.subr.bf16.mxu1 %v795_v1 }
  0x1d   :  { %654 = vmatprep.subr.bf16.mxu0 %v745_v22 }
  0x1f   :  { %302 = vmatpush1.bf16.msra.mxu1 %v746_v24 }
  0x20   :  { %655 = vmatpush3.bf16.msra.mxu0 %v747_v27  ;;  %317 = vmatprep.subr.bf16.mxu1 %v795_v1 }
  0x23   :  { %280 = vmatmul.mubr.bf16.vlgmr.msra.gmra.mxu0 %v32_v32  ;;  %318 = vmatpush2.bf16.msra.mxu1 %v748_v30 }
  0x24   :  { %12 = vsyncpa [#allocation3], 0  ;;  %v749_v34 = vld [vmem:[%s1016_s3 + $0x38] sm:$0xff]   ;;  %v796_v35 = vmov 0.0   ;;  %v750_v36 = vld [vmem:[%s1016_s3 + $0x30] sm:$0xff]   ;;  %vm797_vm1 = vmmov 0  }
  0x25   :  { %680 = vmatprep.subr.bf16.mxu0 %v796_v35  ;;  %700 = vmatprep.subr.bf16.mxu1 %v796_v35  ;;  %v751_v37 = vld [vmem:[%s1016_s3 + $0x28] sm:$0xff]   ;;  %v752_v38 = vld [vmem:[%s1016_s3 + $0x20] sm:$0xff]   ;;  %v753_v39 = vld [vmem:[%s1016_s3 + $0x18] sm:$0xff]   ;;  %s798_s20 = smov [#allocation2]   ;;  %vm579_vm6 = vcmask 80896  }
  0x26   :  { %320 = vmatmul.mubr.bf16.vlgmr.msra.gmra.mxu1 %v34_v33  ;;  %681 = vmatpush3.bf16.msra.mxu0 %v749_v34  ;;  %v754_v40 = vld [vmem:[%s1016_s3 + $0x10] sm:$0xff]   ;;  %v755_v41 = vld [vmem:[%s1016_s3 + $0x8] sm:$0xff]   ;;  %v756_v42 = vld [vmem:[%s1016_s3] sm:$0xff]   ;;  %s587_s21 = sshll.u32 %s798_s20, 4  ;;  %s588_s21 = int_to_ptr.vmem [resolvable:$true] %s587_s21 }
  0x27   :  { %682 = vmatprep.subr.bf16.mxu0 %v796_v35  ;;  %696 = vmatprep.mubr.msk.bf16.mxu0 %vm797_vm1, %v796_v35  ;;  %v595_v45 = vld [vmem:[%s1015_s2] ss:$0 sm:$0xff]  ;;  %v757_v4 = vld [vmem:[%s1018_s5 + $0x38] sm:$0xff]   ;;  %v758_v5 = vld [vmem:[%s1018_s5 + $0x30] sm:$0xff]   ;;  %s773_s22 = scalar_lea.vmem %s588_s21, 128  ;;  %p778_p1 = scmp.lt.s32.totalorder %s588_s21, %s588_s21 }
  0x28   :  { %716 = vmatprep.mubr.msk.bf16.mxu1 %vm797_vm1, %v796_v35  ;;  %701 = vmatpush3.bf16.msra.mxu1 %v757_v4  ;;  %v759_v6 = vld [vmem:[%s1018_s5 + $0x28] sm:$0xff]   ;;  %v760_v7 = vld [vmem:[%s1018_s5 + $0x20] sm:$0xff]   ;;  %v761_v8 = vld [vmem:[%s1018_s5 + $0x18] sm:$0xff]   ;;  %p774_p0 = scmp.ne.s32.totalorder %s588_s21, %s773_s22  ;;  %p779_p2 = scmp.lt.s32.totalorder %s773_s22, %s773_s22 }
  0x29   :  { %702 = vmatprep.subr.bf16.mxu1 %v796_v35  ;;  %v762_v9 = vld [vmem:[%s1018_s5 + $0x10] sm:$0xff]   ;;  %v763_v10 = vld [vmem:[%s1018_s5 + $0x8] sm:$0xff]   ;;  %v764_v11 = vld [vmem:[%s1018_s5] sm:$0xff]  }
  0x2a   :  { %683 = vmatpush3.bf16.msra.mxu0 %v750_v36  ;;  %v622_v12 = vld [vmem:[%s1017_s4] ss:$0 sm:$0xff]  ;;  %p780_p3 = por %p779_p2, %p778_p1 }
  0x2b   :  { %684 = vmatprep.subr.bf16.mxu0 %v796_v35  ;;  %v631_v31 = vld [vmem:[%s1019_s6] ss:$0 sm:$0xff] }
  0x2c   :  { %703 = vmatpush3.bf16.msra.mxu1 %v758_v5  ;;  %p781_p4 = pnand %p780_p3, %p774_p0 }
  0x2d   :  { %704 = vmatprep.subr.bf16.mxu1 %v796_v35 }
  0x2e   :  { %685 = vmatpush3.bf16.msra.mxu0 %v751_v37 }
  0x2f   :  { %686 = vmatprep.subr.bf16.mxu0 %v796_v35 }
  0x30   :  { %705 = vmatpush3.bf16.msra.mxu1 %v759_v6 }
  0x31   :  { %706 = vmatprep.subr.bf16.mxu1 %v796_v35 }
  0x32   :  { %687 = vmatpush3.bf16.msra.mxu0 %v752_v38 }
  0x33   :  { %688 = vmatprep.subr.bf16.mxu0 %v796_v35 }
  0x34   :  { %707 = vmatpush3.bf16.msra.mxu1 %v760_v7 }
  0x35   :  { %708 = vmatprep.subr.bf16.mxu1 %v796_v35 }
  0x36   :  { %689 = vmatpush3.bf16.msra.mxu0 %v753_v39 }
  0x37   :  { %690 = vmatprep.subr.bf16.mxu0 %v796_v35 }
  0x38   :  { %709 = vmatpush3.bf16.msra.mxu1 %v761_v8 }
  0x39   :  { %710 = vmatprep.subr.bf16.mxu1 %v796_v35 }
  0x3a   :  { %691 = vmatpush3.bf16.msra.mxu0 %v754_v40 }
  0x3b   :  { %692 = vmatprep.subr.bf16.mxu0 %v796_v35 }
  0x3c   :  { %711 = vmatpush3.bf16.msra.mxu1 %v762_v9 }
  0x3d   :  { %712 = vmatprep.subr.bf16.mxu1 %v796_v35 }
  0x3e   :  { %693 = vmatpush3.bf16.msra.mxu0 %v755_v41 }
  0x3f   :  { %694 = vmatprep.subr.bf16.mxu0 %v796_v35 }
  0x40   :  { %713 = vmatpush3.bf16.msra.mxu1 %v763_v10 }
  0x41   :  { %714 = vmatprep.subr.bf16.mxu1 %v796_v35 }
  0x42   :  { %695 = vmatpush3.bf16.msra.mxu0 %v756_v42 }
  0x44   :  { %715 = vmatpush3.bf16.msra.mxu1 %v764_v11 }
  0xe3   :  { %v656_v43 = vpop.f32.mrf.mxu0 }
  0xe5   :  { %v657_v44 = vpop.f32.mrf.mxu0 }
  0xe6   :  { %v658_v46 = vadd.f32 %v657_v44, %v656_v43  ;;  %v321_v47 = vpop.f32.mrf.mxu1 }
  0xe7   :  { %v659_v48 = vpop.f32.mrf.mxu0 }
  0xe8   :  { %v282_v49 = vadd.f32 %v658_v46, %v595_v45  ;;  %v323_v50 = vpop.f32.mrf.mxu1 }
  0xe9   :  { %v660_v51 = vpop.f32.mrf.mxu0 }
  0xea   :  { %v322_v52 = vadd.f32 %v321_v47, %v282_v49  ;;  %v324_v53 = vpop.f32.mrf.mxu1 }
  0xec   :  { %v328_v54 = vmin.f32 %v322_v52, 20.0  ;;  %v325_v55 = vpop.f32.mrf.mxu1  ;;  %vm327_vm3 = vcmp.gt.f32.partialorder %v322_v52, 20.0 }
  0xee   :  { %v329_v56 = vmul.f32 1.442695, %v328_v54 }
  0xf0   :  { %765 = vpow2.f32 %v329_v56 }
  0xfd   :  { %v766_v57 = vpop.eup %765 }
  0xfe   :  { %v331_v58 = vadd.f32 1.0, %v766_v57  ;;  %v334_v59 = vmul.f32 -0.5, %v766_v57  ;;  %v337_v61 = vand.u32 2147483647, %v766_v57 }
 0x100   :  { %767 = vlog2.f32 %v331_v58  ;;  %v335_v60 = vadd.f32 1.0, %v334_v59  ;;  %vm338_vm2 = vcmp.lt.f32.partialorder %v337_v61, 0.0004427343 }
 0x102   :  { %v336_v0 = vmul.f32 %v766_v57, %v335_v60 }
 0x10d   :  { %v768_v62 = vpop.eup %767 }
 0x10e   :  { %v333_v63 = vmul.f32 0.6931472, %v768_v62 }
 0x110   :  { %v339_v1 = vsel %vm338_vm2, %v336_v0, %v333_v63 }
 0x111   :  { %v340_v2 = vsel %vm327_vm3, %v322_v52, %v339_v1 }
 0x112   :  { %v341_v3 = vpack.c.bf16 %v340_v2, %v340_v2 }
 0x114   :  { %697 = vmatmul.mubr.bf16.vlgmr.msra.gmra.mxu0 %v341_v3 }
 0x1d4   :  { %v447_v13 = vpop.f32.mrf.mxu0 }
 0x1d5   :  { %v448_v14 = vadd.f32 %v622_v12, %v447_v13 }
 0x1d6   :  { %v698_v15 = vpop.f32.mrf.mxu0 }
 0x1d7   :  { %v454_v16 = vmin.f32 %v448_v14, 20.0  ;;  %vm453_vm5 = vcmp.gt.f32.partialorder %v448_v14, 20.0 }
 0x1d8   :  { %v450_v17 = vpop.f32.mrf.mxu0 }
 0x1d9   :  { %v455_v18 = vmul.f32 1.442695, %v454_v16 }
 0x1da   :  { %v699_v19 = vpop.f32.mrf.mxu0 }
 0x1db   :  { %769 = vpow2.f32 %v455_v18 }
 0x1e8   :  { %v770_v20 = vpop.eup %769 }
 0x1e9   :  { %v457_v21 = vadd.f32 1.0, %v770_v20  ;;  %v460_v22 = vmul.f32 -0.5, %v770_v20  ;;  %v463_v24 = vand.u32 2147483647, %v770_v20 }
 0x1eb   :  { %771 = vlog2.f32 %v457_v21  ;;  %v461_v23 = vadd.f32 1.0, %v460_v22  ;;  %vm464_vm4 = vcmp.lt.f32.partialorder %v463_v24, 0.0004427343 }
 0x1ed   :  { %v462_v27 = vmul.f32 %v770_v20, %v461_v23 }
 0x1f8   :  { %v772_v25 = vpop.eup %771 }
 0x1f9   :  { %v459_v26 = vmul.f32 0.6931472, %v772_v25 }
 0x1fb   :  { %v465_v28 = vsel %vm464_vm4, %v462_v27, %v459_v26 }
 0x1fc   :  { %v466_v29 = vsel %vm453_vm5, %v448_v14, %v465_v28 }
 0x1fd   :  { %v467_v30 = vpack.c.bf16 %v466_v29, %v466_v29 }
 0x1ff   :  { %717 = vmatmul.mubr.bf16.vlgmr.msra.gmra.mxu1 %v467_v30 }
 0x2bf   :  { %v573_v32 = vpop.f32.mrf.mxu1 }
 0x2c0   :  { %v574_v33 = vadd.f32 %v631_v31, %v573_v32 }
 0x2c1   :  { %v718_v34 = vpop.f32.mrf.mxu1 }
 0x2c2   :  { %580 = vst.msk [vmem:[#allocation2] sm:$0xff] %vm579_vm6, %v574_v33 }
 0x2c3   :  { %v576_v35 = vpop.f32.mrf.mxu1 }
 0x2c4   :  { %784 = shalt.err (!%p781_p4)
}
 0x2c5   :  { %590 = dma.vmem_to_hbm [thread:$0]  %s588_s21, 128, %s1020_s7, [#allocation3]   ;;  %v719_v36 = vpop.f32.mrf.mxu1 }
 0x2c6   :  { %793 = dma.done.wait [#allocation3], 128  }
 0x2c7   :  { %794 = vsyncadd [#allocation3], 4294967168 }
 0x2c8   :  { %594 = vsyncpa [#allocation3], 1 }

// kernel: lenet_forward.4
= control target key start
LH: loop header
LB: loop body
LE: loop exit
PB: predicated region body
PF: predicated region fallthrough
CT: control target
= control target key end

     0   :  { %s2019_s24 = smov 0   ;;  %s2569_s0 = inlined_call_operand.vmem [shape: f32[112,84], index: 0, kind: input, shape index: {}]   ;;  %s2570_s1 = inlined_call_operand.vmem [shape: bf16[5,84,160], index: 1, kind: input, shape index: {}]   ;;  %s2571_s2 = inlined_call_operand.vmem [shape: f32[20,52], index: 2, kind: input, shape index: {}]   ;;  %s2572_s3 = inlined_call_operand.vmem [shape: f32[20,52], index: 3, kind: input, shape index: {}]   ;;  %s2573_s4 = inlined_call_operand.vmem [shape: f32[160,80], index: 4, kind: input, shape index: {}]   ;;  %s2574_s5 = inlined_call_operand.vmem [shape: f32[160,80], index: 5, kind: input, shape index: {}]   ;;  %s2575_s6 = inlined_call_operand.vmem [shape: f32[1,80], index: 6, kind: input, shape index: {}]   ;;  %s2576_s7 = inlined_call_operand.vmem [shape: f32[8,5,80], index: 7, kind: output, shape index: {}]  }
   0x1 LB: > { %s1701_s25 = sadd.s32 4294967295, %s1975_s24   ;;  %p1705_p0 = scmp.ge.s32.totalorder %s1975_s24, 1  ;;  %s1975_s24 = sphi %s2019_s24, %s17_s24  }
   0x2   : > { %p238_p1 = scmp.lt.s32.totalorder %s1975_s24, 3 }
   0x4   : > { %p239_p2 = pnand %p1705_p0, %p238_p1 }
   0x6   : > { %242 = sbr.rel (%p239_p2) target bundleno = 793 (0x319), region = 48 }
   0xb   : > { %v1719_v0 = vld [vmem:[%s2570_s1 + $0xa8] sm:$0x33]  ;;  %vm396_vm0 = vcmask 1041408   ;;  %v304_v1 = vld [vmem:[%s2570_s1 + $0x50] sm:$0x33]  ;;  %s270_s9 = smul.u32 7, %s1701_s25 }
   0xc   : > { %v1731_v2 = vcombine.high %v1719_v0, %v1719_v0  ;;  %v1748_v3 = vcombine.high %v304_v1, %v304_v1  ;;  %v1730_v4 = vcombine.low %v1719_v0, %v1719_v0  ;;  %v1747_v5 = vcombine.low %v304_v1, %v304_v1  ;;  %v1876_v6 = vld [vmem:[%s2570_s1 + $0x9c] ss:$8 sps:$4 sm:$0xff]   ;;  %v1880_v8 = vld [vmem:[%s2570_s1 + $0x98] ss:$8 sps:$4 sm:$0xff]   ;;  %v1882_v12 = vld [vmem:[%s2570_s1 + $0x8c] ss:$8 sps:$4 sm:$0xff]  }
   0xd   : > { %v1878_v7 = vld [vmem:[%s2570_s1 + $0x44] ss:$8 sps:$4 sm:$0xff]   ;;  %v1881_v11 = vld [vmem:[%s2570_s1 + $0x40] ss:$8 sps:$4 sm:$0xff]   ;;  %v1884_v13 = vld [vmem:[%s2570_s1 + $0x34] ss:$8 sps:$4 sm:$0xff]  }
   0xe   : > { %1732 = vmatprep.subr.msk.bf16.mxu0 %vm396_vm0, %v1731_v2  ;;  %1749 = vmatprep.subr.msk.bf16.mxu1 %vm396_vm0, %v1748_v3  ;;  %v398_v9 = vsel %vm396_vm0, %v1730_v4, 0  ;;  %v542_v10 = vsel %vm396_vm0, %v1747_v5, 0  ;;  %p271_p3 = scmp.lt.s32.totalorder %s270_s9, 13  ;;  %v1977_v14 = vmov 0   ;;  %v1886_v15 = vld [vmem:[%s2570_s1 + $0x88] ss:$8 sps:$4 sm:$0xff]  }
   0xf   : > { %408 = vmatpush1.bf16.msra.mxu0 %v398_v9  ;;  %552 = vmatpush1.bf16.msra.mxu1 %v542_v10  ;;  %v1887_v16 = vld [vmem:[%s2570_s1 + $0x30] ss:$8 sps:$4 sm:$0xff]   ;;  %v1888_v17 = vld [vmem:[%s2570_s1 + $0x7c] ss:$8 sps:$4 sm:$0xff]   ;;  %v1893_v20 = vld [vmem:[%s2570_s1 + $0x20] ss:$8 sps:$4 sm:$0xff]  }
  0x10   : > { %409 = vmatprep.subr.bf16.mxu0 %v1876_v6  ;;  %553 = vmatprep.subr.bf16.mxu1 %v1878_v7  ;;  %v1890_v18 = vld [vmem:[%s2570_s1 + $0x24] ss:$8 sps:$4 sm:$0xff]   ;;  %s2583_s9 = smov (!%p271_p3, %s270_s9), 13  ;;  %v1892_v19 = vld [vmem:[%s2570_s1 + $0x78] ss:$8 sps:$4 sm:$0xff]   ;;  %vm383_vm1 = vcmask 687104  }
  0x11   : > { %435 = vmatprep.mubr.bf16.mxu0 %v1977_v14  ;;  %579 = vmatprep.mubr.bf16.mxu1 %v1977_v14  ;;  %v1894_v21 = vld [vmem:[%s2570_s1 + $0x6c] ss:$8 sps:$4 sm:$0xff]   ;;  %s1706_s16 = sshll.u32 %s2583_s9, 3  ;;  %v1898_v23 = vld [vmem:[%s2570_s1 + $0x68] ss:$8 sps:$4 sm:$0xff]   ;;  %vm1174_vm2 = vcmask 1043456  }
  0x12   : > { %v1896_v22 = vld [vmem:[%s2570_s1 + $0x14] ss:$8 sps:$4 sm:$0xff]   ;;  %v1899_v24 = vld [vmem:[%s2570_s1 + $0x10] ss:$8 sps:$4 sm:$0xff]   ;;  %s2095_s27 = scalar_lea.vmem %s2569_s0, %s1706_s16  ;;  %v1902_v26 = vld [vmem:[%s2570_s1 + $0x4] ss:$8 sps:$4 sm:$0xff]  }
  0x13   : > { %410 = vmatpush1.bf16.msra.mxu0 %v1880_v8  ;;  %554 = vmatpush1.bf16.msra.mxu1 %v1881_v11  ;;  %v1900_v25 = vld [vmem:[%s2570_s1 + $0x5c] ss:$8 sps:$4 sm:$0xff]   ;;  %v1904_v27 = vld [vmem:[%s2570_s1 + $0x58] ss:$8 sps:$4 sm:$0xff]   ;;  %v306_v32 = vld [vmem:[%s2095_s27 + $0x9] sm:$0xff]  ;;  %vm1164_vm3 = vcmask 424960  }
  0x14   : > { %411 = vmatprep.subr.bf16.mxu0 %v1882_v12  ;;  %555 = vmatprep.subr.bf16.mxu1 %v1884_v13  ;;  %v1764_v28 = vld [vmem:[%s2570_s1 + $0x100] sm:$0x33]  ;;  %v1792_v29 = vld [vmem:[%s2570_s1 + $0x158] sm:$0x33]  ;;  %v284_v34 = vld [vmem:[%s2095_s27 + $0x8] sm:$0xff]  ;;  %vm1385_vm4 = vcmask 261120  }
  0x15   : > { %v1905_v30 = vld [vmem:[%s2570_s1] ss:$8 sps:$4 sm:$0xff]   ;;  %v1776_v35 = vcombine.high %v1764_v28, %v1764_v28  ;;  %v1804_v36 = vcombine.high %v1792_v29, %v1792_v29  ;;  %v1775_v37 = vcombine.low %v1764_v28, %v1764_v28  ;;  %v1803_v38 = vcombine.low %v1792_v29, %v1792_v29  ;;  %v307_v41 = vld [vmem:[%s2095_s27 + $0x11] sm:$0xff]  ;;  %v1918_v51 = vld [vmem:[%s2570_s1 + $0xe4] ss:$8 sps:$4 sm:$0xff]   ;;  %s1707_s28 = sshll.u32 %s1701_s25, 2 }
  0x16   : > { %v305_v31 = vld [vmem:[%s2095_s27 + $0x1] sm:$0xff]  ;;  %v308_v42 = vld [vmem:[%s2095_s27 + $0x19] sm:$0xff]  ;;  %v1915_v46 = vld [vmem:[%s2570_s1 + $0x14c] ss:$8 sps:$4 sm:$0xff]   ;;  %p277_p4 = scmp.lt.s32.totalorder %s1707_s28, 7  ;;  %vm1630_vm6 = vcmask 651264  }
  0x17   : > { %412 = vmatpush1.bf16.msra.mxu0 %v1886_v15  ;;  %556 = vmatpush1.bf16.msra.mxu1 %v1887_v16  ;;  %v283_v33 = vld [vmem:[%s2095_s27] sm:$0xff]  ;;  %v312_v39 = vpack.c.bf16 %v306_v32, %v305_v31  ;;  %v709_v43 = vsel %vm396_vm0, %v1775_v37, 0  ;;  %v890_v44 = vsel %vm396_vm0, %v1803_v38, 0  ;;  %v1912_v45 = vld [vmem:[%s2570_s1 + $0xf4] ss:$8 sps:$4 sm:$0xff]   ;;  %v313_v53 = vpack.c.bf16 %v308_v42, %v307_v41  ;;  %v310_v60 = vld [vmem:[%s2095_s27 + $0x29] sm:$0xff] }
  0x18   : > { %413 = vmatprep.subr.bf16.mxu0 %v1888_v17  ;;  %557 = vmatprep.subr.bf16.mxu1 %v1890_v18  ;;  %v290_v40 = vpack.c.bf16 %v284_v34, %v283_v33  ;;  %v285_v47 = vld [vmem:[%s2095_s27 + $0x10] sm:$0xff]  ;;  %v286_v48 = vld [vmem:[%s2095_s27 + $0x18] sm:$0xff]  ;;  %v1916_v55 = vld [vmem:[%s2570_s1 + $0xe0] ss:$8 sps:$4 sm:$0xff]   ;;  %s2585_s28 = smov (!%p277_p4, %s1707_s28), 7  ;;  %vm1633_vm8 = vcmask 654341  }
  0x19   : > { %v1910_v49 = vld [vmem:[%s2570_s1 + $0xf0] ss:$8 sps:$4 sm:$0xff]   ;;  %v1921_v52 = vld [vmem:[%s2570_s1 + $0x13c] ss:$8 sps:$4 sm:$0xff]   ;;  %v291_v54 = vpack.c.bf16 %v286_v48, %v285_v47  ;;  %v1927_v58 = vld [vmem:[%s2570_s1 + $0x12c] ss:$8 sps:$4 sm:$0xff]  }
  0x1a   : > { %v1913_v50 = vld [vmem:[%s2570_s1 + $0x148] ss:$8 sps:$4 sm:$0xff]   ;;  %v1919_v56 = vld [vmem:[%s2570_s1 + $0x138] ss:$8 sps:$4 sm:$0xff]   ;;  %v1924_v57 = vld [vmem:[%s2570_s1 + $0xd4] ss:$8 sps:$4 sm:$0xff]  }
  0x1b   : > { %414 = vmatpush1.bf16.msra.mxu0 %v1892_v19  ;;  %558 = vmatpush1.bf16.msra.mxu1 %v1893_v20  ;;  %v309_v59 = vld [vmem:[%s2095_s27 + $0x21] sm:$0xff]  ;;  %v1922_v63 = vld [vmem:[%s2570_s1 + $0xd0] ss:$8 sps:$4 sm:$0xff]   ;;  %v1936_v7 = vld [vmem:[%s2570_s1 + $0xb4] ss:$8 sps:$4 sm:$0xff]   ;;  %s1708_s29 = sshll.u32 %s2585_s28, 3 }
  0x1c   : > { %415 = vmatprep.subr.bf16.mxu0 %v1894_v21  ;;  %559 = vmatprep.subr.bf16.mxu1 %v1896_v22  ;;  %v287_v61 = vld [vmem:[%s2095_s27 + $0x20] sm:$0xff]  ;;  %v288_v62 = vld [vmem:[%s2095_s27 + $0x28] sm:$0xff]  ;;  %v314_v3 = vpack.c.bf16 %v310_v60, %v309_v59  ;;  %v1820_v9 = vld [vmem:[%s2570_s1 + $0x1b0] sm:$0x33]  ;;  %s2558_s25 = scalar_lea.vmem %s2576_s7, %s1708_s29  ;;  %vm1635_vm10 = vcmask 648192   ;;  %vm1638_vm12 = vcmask 653314  }
  0x1d   : > { %v1925_v0 = vld [vmem:[%s2570_s1 + $0x128] ss:$8 sps:$4 sm:$0xff]   ;;  %v1930_v1 = vld [vmem:[%s2570_s1 + $0xc4] ss:$8 sps:$4 sm:$0xff]   ;;  %v292_v4 = vpack.c.bf16 %v288_v62, %v287_v61  ;;  %v1931_v6 = vld [vmem:[%s2570_s1 + $0x118] ss:$8 sps:$4 sm:$0xff]   ;;  %v1832_v15 = vcombine.high %v1820_v9, %v1820_v9  ;;  %v1831_v22 = vcombine.low %v1820_v9, %v1820_v9 }
  0x1e   : > { %v1933_v2 = vld [vmem:[%s2570_s1 + $0x11c] ss:$8 sps:$4 sm:$0xff]   ;;  %v1928_v5 = vld [vmem:[%s2570_s1 + $0xc0] ss:$8 sps:$4 sm:$0xff]   ;;  %v1939_v8 = vld [vmem:[%s2570_s1 + $0x10c] ss:$8 sps:$4 sm:$0xff]  }
  0x1f   : > { %416 = vmatpush1.bf16.msra.mxu0 %v1898_v23  ;;  %560 = vmatpush1.bf16.msra.mxu1 %v1899_v24  ;;  %v311_v10 = vld [vmem:[%s2095_s27 + $0x31] sm:$0xf]  ;;  %v618_v18 = vld [vmem:[%s2095_s27 + $0x2] sm:$0xff]  ;;  %v621_v28 = vld [vmem:[%s2095_s27 + $0x1a] sm:$0xff]  ;;  %vm1641_vm13 = vcmask 654343   ;;  %vm1643_vm15 = vcmask 650240  }
  0x20   : > { %417 = vmatprep.subr.bf16.mxu0 %v1900_v25  ;;  %561 = vmatprep.subr.bf16.mxu1 %v1902_v26  ;;  %v289_v11 = vld [vmem:[%s2095_s27 + $0x30] sm:$0xf]  ;;  %v315_v16 = vpack.c.bf16 %v311_v10, %v311_v10  ;;  %v799_v20 = vld [vmem:[%s2095_s27 + $0x3] sm:$0xff]  ;;  %v1071_v25 = vsel %vm396_vm0, %v1831_v22, 0  ;;  %v1947_v32 = vld [vmem:[%s2570_s1 + $0x194] ss:$8 sps:$4 sm:$0xff]  }
  0x21   : > { %v1934_v12 = vld [vmem:[%s2570_s1 + $0xb0] ss:$8 sps:$4 sm:$0xff]   ;;  %v293_v17 = vpack.c.bf16 %v289_v11, %v289_v11  ;;  %v1944_v26 = vld [vmem:[%s2570_s1 + $0x1a4] ss:$8 sps:$4 sm:$0xff]   ;;  %v1942_v31 = vld [vmem:[%s2570_s1 + $0x1a0] ss:$8 sps:$4 sm:$0xff]  }
  0x22   : > { %v1937_v13 = vld [vmem:[%s2570_s1 + $0x108] ss:$8 sps:$4 sm:$0xff]   ;;  %v1953_v42 = vld [vmem:[%s2570_s1 + $0x174] ss:$8 sps:$4 sm:$0xff]   ;;  %v1377_v11 = vld [vmem:[%s2573_s4 + $0x60] sm:$0xff] }
  0x23   : > { %418 = vmatpush1.bf16.msra.mxu0 %v1904_v27  ;;  %562 = vmatpush1.bf16.msra.mxu1 %v1905_v30  ;;  %v619_v19 = vld [vmem:[%s2095_s27 + $0xa] sm:$0xff]  ;;  %v620_v27 = vld [vmem:[%s2095_s27 + $0x12] sm:$0xff]  ;;  %v802_v30 = vld [vmem:[%s2095_s27 + $0x1b] sm:$0xff] }
  0x24   : > { %1777 = vmatprep.subr.msk.bf16.mxu0 %vm396_vm0, %v1776_v35  ;;  %1805 = vmatprep.subr.msk.bf16.mxu1 %vm396_vm0, %v1804_v36  ;;  %v800_v21 = vld [vmem:[%s2095_s27 + $0xb] sm:$0xff]  ;;  %v625_v23 = vpack.c.bf16 %v619_v19, %v618_v18  ;;  %v801_v29 = vld [vmem:[%s2095_s27 + $0x13] sm:$0xff]  ;;  %v626_v33 = vpack.c.bf16 %v621_v28, %v620_v27  ;;  %v622_v37 = vld [vmem:[%s2095_s27 + $0x22] sm:$0xff] }
  0x25   : > { %v806_v24 = vpack.c.bf16 %v800_v21, %v799_v20  ;;  %v807_v34 = vpack.c.bf16 %v802_v30, %v801_v29  ;;  %v1945_v35 = vld [vmem:[%s2570_s1 + $0x190] ss:$8 sps:$4 sm:$0xff]   ;;  %v1950_v36 = vld [vmem:[%s2570_s1 + $0x184] ss:$8 sps:$4 sm:$0xff]   ;;  %v1948_v41 = vld [vmem:[%s2570_s1 + $0x180] ss:$8 sps:$4 sm:$0xff]  }
  0x26   : > { %1733 = vmatmul.mubr.msk.bf16.vlgmr.msra.gmra.mxu0 %vm383_vm1, %v312_v39  ;;  %1750 = vmatmul.mubr.msk.bf16.vlgmr.msra.gmra.mxu1 %vm383_vm1, %v290_v40  ;;  %v623_v38 = vld [vmem:[%s2095_s27 + $0x2a] sm:$0xff]  ;;  %v624_v47 = vld [vmem:[%s2095_s27 + $0x32] sm:$0xf]  ;;  %v1373_v28 = vld [vmem:[%s2573_s4 + $0x40] sm:$0xff] }
  0x27   : > { %445 = vmatprep.mubr.bf16.mxu0 %v1977_v14  ;;  %589 = vmatprep.mubr.bf16.mxu1 %v1977_v14  ;;  %v803_v39 = vld [vmem:[%s2095_s27 + $0x23] sm:$0xff]  ;;  %v804_v40 = vld [vmem:[%s2095_s27 + $0x2b] sm:$0xff]  ;;  %v805_v48 = vld [vmem:[%s2095_s27 + $0x33] sm:$0xf] }
  0x28   : > { %719 = vmatpush1.bf16.msra.mxu0 %v709_v43  ;;  %900 = vmatpush1.bf16.msra.mxu1 %v890_v44  ;;  %v627_v43 = vpack.c.bf16 %v623_v38, %v622_v37  ;;  %v808_v44 = vpack.c.bf16 %v804_v40, %v803_v39  ;;  %v985_v59 = vld [vmem:[%s2095_s27 + $0x2c] sm:$0xff]  ;;  %v986_v61 = vld [vmem:[%s2095_s27 + $0x34] sm:$0xf] }
  0x29   : > { %720 = vmatprep.subr.bf16.mxu0 %v1912_v45  ;;  %901 = vmatprep.subr.bf16.mxu1 %v1915_v46  ;;  %v1951_v45 = vld [vmem:[%s2570_s1 + $0x170] ss:$8 sps:$4 sm:$0xff]   ;;  %v1956_v46 = vld [vmem:[%s2570_s1 + $0x164] ss:$8 sps:$4 sm:$0xff]   ;;  %v990_v62 = vpack.c.bf16 %v986_v61, %v986_v61 }
  0x2a   : > { %v1375_v20 = vld [vmem:[%s2573_s4 + $0x50] sm:$0xff]  ;;  %v1370_v40 = vld [vmem:[%s2573_s4 + $0x28] sm:$0xff] }
  0x2c   : > { %721 = vmatpush1.bf16.msra.mxu0 %v1910_v49  ;;  %902 = vmatpush1.bf16.msra.mxu1 %v1913_v50  ;;  %v1954_v49 = vld [vmem:[%s2570_s1 + $0x160] ss:$8 sps:$4 sm:$0xff]   ;;  %v628_v50 = vpack.c.bf16 %v624_v47, %v624_v47 }
  0x2d   : > { %722 = vmatprep.subr.bf16.mxu0 %v1918_v51  ;;  %903 = vmatprep.subr.bf16.mxu1 %v1921_v52  ;;  %v809_v51 = vpack.c.bf16 %v805_v48, %v805_v48  ;;  %v980_v52 = vld [vmem:[%s2095_s27 + $0x4] sm:$0xff] }
  0x2e   : > { %1734 = vmatmul.mubr.msk.bf16.gmra.mxu0 %vm383_vm1, %v313_v53  ;;  %1751 = vmatmul.mubr.msk.bf16.gmra.mxu1 %vm383_vm1, %v291_v54  ;;  %v981_v53 = vld [vmem:[%s2095_s27 + $0xc] sm:$0xff] }
  0x2f   : > { %455 = vmatprep.mubr.bf16.mxu0 %v1977_v14  ;;  %599 = vmatprep.mubr.bf16.mxu1 %v1977_v14  ;;  %v987_v54 = vpack.c.bf16 %v981_v53, %v980_v52 }
  0x30   : > { %723 = vmatpush1.bf16.msra.mxu0 %v1916_v55  ;;  %904 = vmatpush1.bf16.msra.mxu1 %v1919_v56  ;;  %v982_v55 = vld [vmem:[%s2095_s27 + $0x14] sm:$0xff]  ;;  %v983_v56 = vld [vmem:[%s2095_s27 + $0x1c] sm:$0xff] }
  0x31   : > { %724 = vmatprep.subr.bf16.mxu0 %v1924_v57  ;;  %905 = vmatprep.subr.bf16.mxu1 %v1927_v58  ;;  %v988_v57 = vpack.c.bf16 %v983_v56, %v982_v55  ;;  %v984_v58 = vld [vmem:[%s2095_s27 + $0x24] sm:$0xff] }
  0x32   : > { %v989_v60 = vpack.c.bf16 %v985_v59, %v984_v58 }
  0x34   : > { %725 = vmatpush1.bf16.msra.mxu0 %v1922_v63  ;;  %906 = vmatpush1.bf16.msra.mxu1 %v1925_v0  ;;  %v2577_v63 = vmov 0.0  }
  0x35   : > { %726 = vmatprep.subr.bf16.mxu0 %v1930_v1  ;;  %907 = vmatprep.subr.bf16.mxu1 %v1933_v2 }
  0x36   : > { %1735 = vmatmul.mubr.msk.bf16.gmra.mxu0 %vm383_vm1, %v314_v3  ;;  %1752 = vmatmul.mubr.msk.bf16.gmra.mxu1 %vm383_vm1, %v292_v4  ;;  %v1380_v3 = vld [vmem:[%s2573_s4 + $0x78] sm:$0xff] }
  0x37   : > { %465 = vmatprep.mubr.bf16.mxu0 %v1977_v14  ;;  %609 = vmatprep.mubr.bf16.mxu1 %v1977_v14 }
  0x38   : > { %727 = vmatpush1.bf16.msra.mxu0 %v1928_v5  ;;  %908 = vmatpush1.bf16.msra.mxu1 %v1931_v6 }
  0x39   : > { %728 = vmatprep.subr.bf16.mxu0 %v1936_v7  ;;  %909 = vmatprep.subr.bf16.mxu1 %v1939_v8  ;;  %v1378_v7 = vld [vmem:[%s2573_s4 + $0x68] sm:$0xff] }
  0x3c   : > { %729 = vmatpush1.bf16.msra.mxu0 %v1934_v12  ;;  %910 = vmatpush1.bf16.msra.mxu1 %v1937_v13 }
  0x3d   : > { %1833 = vmatprep.subr.msk.bf16.mxu0 %vm396_vm0, %v1832_v15 }
  0x3e   : > { %1736 = vmatmul.mubr.msk.bf16.gmra.mxu0 %vm383_vm1, %v315_v16  ;;  %1753 = vmatmul.mubr.msk.bf16.gmra.mxu1 %vm383_vm1, %v293_v17  ;;  %v1376_v16 = vld [vmem:[%s2573_s4 + $0x58] sm:$0xff] }
  0x3f   : > { %746 = vmatprep.mubr.bf16.mxu0 %v1977_v14  ;;  %927 = vmatprep.mubr.bf16.mxu1 %v1977_v14 }
  0x46   : > { %1778 = vmatmul.mubr.msk.bf16.vlgmr.msra.gmra.mxu0 %vm383_vm1, %v625_v23  ;;  %1806 = vmatmul.mubr.msk.bf16.vlgmr.msra.gmra.mxu1 %vm383_vm1, %v806_v24  ;;  %v1374_v24 = vld [vmem:[%s2573_s4 + $0x48] sm:$0xff] }
  0x47   : > { %756 = vmatprep.mubr.bf16.mxu0 %v1977_v14  ;;  %937 = vmatprep.mubr.bf16.mxu1 %v1977_v14 }
  0x48   : > { %1081 = vmatpush1.bf16.msra.mxu0 %v1071_v25 }
  0x49   : > { %1082 = vmatprep.subr.bf16.mxu0 %v1944_v26 }
  0x4c   : > { %1083 = vmatpush1.bf16.msra.mxu0 %v1942_v31 }
  0x4d   : > { %1084 = vmatprep.subr.bf16.mxu0 %v1947_v32  ;;  %v1372_v32 = vld [vmem:[%s2573_s4 + $0x38] sm:$0xff] }
  0x4e   : > { %1779 = vmatmul.mubr.msk.bf16.gmra.mxu0 %vm383_vm1, %v626_v33  ;;  %1807 = vmatmul.mubr.msk.bf16.gmra.mxu1 %vm383_vm1, %v807_v34 }
  0x4f   : > { %766 = vmatprep.mubr.bf16.mxu0 %v1977_v14  ;;  %947 = vmatprep.mubr.bf16.mxu1 %v1977_v14 }
  0x50   : > { %1085 = vmatpush1.bf16.msra.mxu0 %v1945_v35 }
  0x51   : > { %1086 = vmatprep.subr.bf16.mxu0 %v1950_v36  ;;  %v1371_v36 = vld [vmem:[%s2573_s4 + $0x30] sm:$0xff] }
  0x54   : > { %1087 = vmatpush1.bf16.msra.mxu0 %v1948_v41 }
  0x55   : > { %1088 = vmatprep.subr.bf16.mxu0 %v1953_v42 }
  0x56   : > { %1780 = vmatmul.mubr.msk.bf16.gmra.mxu0 %vm383_vm1, %v627_v43  ;;  %1808 = vmatmul.mubr.msk.bf16.gmra.mxu1 %vm383_vm1, %v808_v44 }
  0x57   : > { %776 = vmatprep.mubr.bf16.mxu0 %v1977_v14  ;;  %957 = vmatprep.mubr.bf16.mxu1 %v1977_v14 }
  0x58   : > { %1089 = vmatpush1.bf16.msra.mxu0 %v1951_v45 }
  0x59   : > { %1090 = vmatprep.subr.bf16.mxu0 %v1956_v46 }
  0x5c   : > { %1091 = vmatpush1.bf16.msra.mxu0 %v1954_v49 }
  0x5d   : > { %1395 = vmatprep.subr.mxu0 %v2577_v63 }
  0x5e   : > { %1781 = vmatmul.mubr.msk.bf16.gmra.mxu0 %vm383_vm1, %v628_v50  ;;  %1809 = vmatmul.mubr.msk.bf16.gmra.mxu1 %vm383_vm1, %v809_v51 }
  0x5f   : > { %1108 = vmatprep.mubr.bf16.mxu0 %v1977_v14  ;;  %1245 = vmatprep.mubr.f32.mxu1 %v2577_v63 }
  0x66   : > { %1834 = vmatmul.mubr.msk.bf16.vlgmr.msra.gmra.mxu0 %vm383_vm1, %v987_v54 }
  0x67   : > { %1118 = vmatprep.mubr.bf16.mxu0 %v1977_v14  ;;  %1396 = vmatpush1.msra.mxu0 %v1380_v3 }
  0x68   : > { %1397 = vmatprep.subr.mxu0 %v2577_v63 }
  0x6e   : > { %1835 = vmatmul.mubr.msk.bf16.gmra.mxu0 %vm383_vm1, %v988_v57 }
  0x6f   : > { %1128 = vmatprep.mubr.bf16.mxu0 %v1977_v14 }
  0x76   : > { %1836 = vmatmul.mubr.msk.bf16.gmra.mxu0 %vm383_vm1, %v989_v60 }
  0x77   : > { %1138 = vmatprep.mubr.bf16.mxu0 %v1977_v14  ;;  %v1379_v14 = vld [vmem:[%s2573_s4 + $0x70] sm:$0xff] }
  0x78   : > { %1398 = vmatpush1.msra.mxu0 %v1379_v14 }
  0x79   : > { %1399 = vmatprep.subr.mxu0 %v2577_v63 }
  0x7a   : > { %1400 = vmatpush1.msra.mxu0 %v1378_v7 }
  0x7b   : > { %1401 = vmatprep.subr.mxu0 %v2577_v63 }
  0x7c   : > { %1402 = vmatpush1.msra.mxu0 %v1377_v11 }
  0x7d   : > { %1403 = vmatprep.subr.mxu0 %v2577_v63 }
  0x7e   : > { %1837 = vmatmul.mubr.msk.bf16.gmra.mxu0 %vm383_vm1, %v990_v62 }
  0x7f   : > { %1404 = vmatpush1.msra.mxu0 %v1376_v16 }
  0x80   : > { %1405 = vmatprep.subr.mxu0 %v2577_v63 }
  0x81   : > { %1406 = vmatpush1.msra.mxu0 %v1375_v20 }
  0x82   : > { %1407 = vmatprep.subr.mxu0 %v2577_v63 }
  0x83   : > { %1408 = vmatpush1.msra.mxu0 %v1374_v24 }
  0x84   : > { %1409 = vmatprep.subr.mxu0 %v2577_v63 }
  0x85   : > { %1410 = vmatpush1.msra.mxu0 %v1373_v28 }
  0x86   : > { %1411 = vmatprep.subr.mxu0 %v2577_v63 }
  0x87   : > { %1412 = vmatpush1.msra.mxu0 %v1372_v32 }
  0x88   : > { %1413 = vmatprep.subr.mxu0 %v2577_v63 }
  0x89   : > { %1414 = vmatpush1.msra.mxu0 %v1371_v36 }
  0x8a   : > { %1415 = vmatprep.subr.mxu0 %v2577_v63 }
  0x8b   : > { %1416 = vmatpush1.msra.mxu0 %v1370_v40 }
  0x8c   : > { %1417 = vmatprep.subr.mxu0 %v2577_v63 }
  0xe6   : > { %v437_v0 = vpop.f32.mrf.mxu0  ;;  %v581_v1 = vpop.f32.mrf.mxu1 }
  0xe7   : > { %v2286_v2 = vadd.f32 %v581_v1, %v437_v0 }
  0xe8   : > { %v439_v4 = vpop.f32.mrf.mxu0  ;;  %v583_v5 = vpop.f32.mrf.mxu1 }
  0xe9   : > { %v2294_v6 = vadd.f32 %v583_v5, %v439_v4 }
  0xea   : > { %v441_v8 = vpop.f32.mrf.mxu0  ;;  %v585_v9 = vpop.f32.mrf.mxu1 }
  0xeb   : > { %v2300_v10 = vadd.f32 %v585_v9, %v441_v8 }
  0xec   : > { %v443_v12 = vpop.f32.mrf.mxu0  ;;  %v587_v13 = vpop.f32.mrf.mxu1 }
  0xed   : > { %v2306_v15 = vadd.f32 %v587_v13, %v443_v12 }
  0xee   : > { %v447_v17 = vpop.f32.mrf.mxu0  ;;  %v591_v18 = vpop.f32.mrf.mxu1 }
  0xef   : > { %v2312_v19 = vadd.f32 %v591_v18, %v447_v17 }
  0xf0   : > { %v449_v21 = vpop.f32.mrf.mxu0  ;;  %v593_v22 = vpop.f32.mrf.mxu1 }
  0xf1   : > { %v2318_v23 = vadd.f32 %v593_v22, %v449_v21 }
  0xf2   : > { %v451_v25 = vpop.f32.mrf.mxu0  ;;  %v595_v26 = vpop.f32.mrf.mxu1 }
  0xf3   : > { %v2324_v27 = vadd.f32 %v595_v26, %v451_v25 }
  0xf4   : > { %v453_v29 = vpop.f32.mrf.mxu0  ;;  %v597_v30 = vpop.f32.mrf.mxu1 }
  0xf5   : > { %v2330_v31 = vadd.f32 %v597_v30, %v453_v29 }
  0xf6   : > { %v457_v33 = vpop.f32.mrf.mxu0  ;;  %v601_v34 = vpop.f32.mrf.mxu1 }
  0xf7   : > { %v2336_v35 = vadd.f32 %v601_v34, %v457_v33 }
  0xf8   : > { %v459_v37 = vpop.f32.mrf.mxu0  ;;  %v603_v38 = vpop.f32.mrf.mxu1 }
  0xf9   : > { %v2342_v39 = vadd.f32 %v603_v38, %v459_v37 }
  0xfa   : > { %v461_v41 = vpop.f32.mrf.mxu0  ;;  %v605_v42 = vpop.f32.mrf.mxu1 }
  0xfb   : > { %v2348_v43 = vadd.f32 %v605_v42, %v461_v41 }
  0xfc   : > { %v463_v44 = vpop.f32.mrf.mxu0  ;;  %v607_v45 = vpop.f32.mrf.mxu1 }
  0xfd   : > { %v608_v46 = vadd.f32 %v607_v45, %v463_v44 }
  0xfe   : > { %v467_v47 = vpop.f32.mrf.mxu0  ;;  %v611_v48 = vpop.f32.mrf.mxu1 }
 0x100   : > { %v469_v49 = vpop.f32.mrf.mxu0  ;;  %v613_v50 = vpop.f32.mrf.mxu1 }
 0x102   : > { %v471_v51 = vpop.f32.mrf.mxu0  ;;  %v615_v52 = vpop.f32.mrf.mxu1 }
 0x103   : > { %v614_v52 = vadd.f32 %v613_v50, %v469_v49 }
 0x104   : > { %v472_v53 = vpop.f32.mrf.mxu0  ;;  %v616_v54 = vpop.f32.mrf.mxu1 }
 0x105   : > { %v612_v53 = vadd.f32 %v611_v48, %v467_v47 }
 0x106   : > { %v748_v55 = vpop.f32.mrf.mxu0  ;;  %v929_v56 = vpop.f32.mrf.mxu1 }
 0x107   : > { %v785_v57 = vadd.f32 %v748_v55, %v2286_v2 }
 0x108   : > { %v750_v58 = vpop.f32.mrf.mxu0  ;;  %v931_v59 = vpop.f32.mrf.mxu1 }
 0x109   : > { %v786_v60 = vadd.f32 %v750_v58, %v2294_v6  ;;  %v2354_v61 = vadd.f32 %v929_v56, %v785_v57 }
 0x10a   : > { %v2356_v62 = vpop.f32.mrf.mxu0  ;;  %v2358_v0 = vpop.f32.mrf.mxu1 }
 0x10b   : > { %v2360_v1 = vadd.f32 %v931_v59, %v786_v60 }
 0x10c   : > { %v2362_v3 = vpop.f32.mrf.mxu0  ;;  %v2364_v14 = vpop.f32.mrf.mxu1 }
 0x10e   : > { %v758_v4 = vpop.f32.mrf.mxu0  ;;  %v2366_v5 = vpop.f32.mrf.mxu1 }
 0x110   : > { %v760_v2 = vpop.f32.mrf.mxu0  ;;  %v2368_v7 = vpop.f32.mrf.mxu1 }
 0x112   : > { %v762_v8 = vpop.f32.mrf.mxu0  ;;  %v2370_v6 = vpop.f32.mrf.mxu1 }
 0x113   : > { %v791_v48 = vadd.f32 %v762_v8, %v2324_v27 }
 0x114   : > { %v764_v9 = vpop.f32.mrf.mxu0  ;;  %v945_v11 = vpop.f32.mrf.mxu1 }
 0x116   : > { %v768_v12 = vpop.f32.mrf.mxu0  ;;  %v949_v13 = vpop.f32.mrf.mxu1 }
 0x118   : > { %v770_v16 = vpop.f32.mrf.mxu0  ;;  %v951_v17 = vpop.f32.mrf.mxu1 }
 0x11a   : > { %v772_v18 = vpop.f32.mrf.mxu0  ;;  %v953_v20 = vpop.f32.mrf.mxu1 }
 0x11b   : > { %v795_v59 = vadd.f32 %v772_v18, %v2348_v43  ;;  %v790_v43 = vadd.f32 %v760_v2, %v2318_v23  ;;  %v787_v23 = vadd.f32 %v2356_v62, %v2300_v10  ;;  %v972_v2 = vadd.f32 %v2370_v6, %v791_v48  ;;  %v1381_v48 = vld [vmem:[%s2573_s4 + $0x80] sm:$0xff] }
 0x11c   : > { %v774_v21 = vpop.f32.mrf.mxu0  ;;  %v955_v22 = vpop.f32.mrf.mxu1 }
 0x11d   : > { %v796_v58 = vadd.f32 %v774_v21, %v608_v46  ;;  %v976_v50 = vadd.f32 %v953_v20, %v795_v59  ;;  %v1264_v20 = vld [vmem:[%s2572_s3] sm:$0xff] }
 0x11e   : > { %v778_v24 = vpop.f32.mrf.mxu0  ;;  %v959_v25 = vpop.f32.mrf.mxu1  ;;  %v1365_v59 = vld [vmem:[%s2573_s4] sm:$0xff] }
 0x11f   : > { %v797_v56 = vadd.f32 %v778_v24, %v612_v53  ;;  %v977_v49 = vadd.f32 %v955_v22, %v796_v58  ;;  %v1490_v22 = vld [vmem:[%s2574_s5 + $0x78] sm:$0xff]  ;;  %v1476_v58 = vld [vmem:[%s2574_s5 + $0x8] sm:$0xff] }
 0x120   : > { %v780_v26 = vpop.f32.mrf.mxu0  ;;  %v961_v28 = vpop.f32.mrf.mxu1  ;;  %v1368_v53 = vld [vmem:[%s2573_s4 + $0x18] sm:$0xff] }
 0x121   : > { %v798_v55 = vadd.f32 %v780_v26, %v614_v52  ;;  %v1265_v26 = vld [vmem:[%s2572_s3 + $0x8] sm:$0xff]  ;;  %v1479_v52 = vld [vmem:[%s2574_s5 + $0x20] sm:$0xff] }
 0x122   : > { %v782_v29 = vpop.f32.mrf.mxu0  ;;  %v963_v30 = vpop.f32.mrf.mxu1 }
 0x123   : > { %v794_v29 = vadd.f32 %v770_v16, %v2342_v39  ;;  %v979_v30 = vadd.f32 %v961_v28, %v798_v55  ;;  %v1488_v28 = vld [vmem:[%s2574_s5 + $0x68] sm:$0xff]  ;;  %v1367_v55 = vld [vmem:[%s2573_s4 + $0x10] sm:$0xff] }
 0x124   : > { %v783_v32 = vpop.f32.mrf.mxu0  ;;  %v964_v33 = vpop.f32.mrf.mxu1 }
 0x125   : > { %v793_v32 = vadd.f32 %v768_v12, %v2336_v35  ;;  %v978_v33 = vadd.f32 %v959_v25, %v797_v56  ;;  %v975_v18 = vadd.f32 %v951_v17, %v794_v29  ;;  %v789_v35 = vadd.f32 %v758_v4, %v2312_v19  ;;  %v1489_v25 = vld [vmem:[%s2574_s5 + $0x70] sm:$0xff]  ;;  %v1384_v29 = vld [vmem:[%s2573_s4 + $0x98] sm:$0xff] }
 0x126   : > { %v2372_v34 = vpop.f32.mrf.mxu0  ;;  %v971_v19 = vadd.f32 %v2368_v7, %v790_v43  ;;  %v1477_v56 = vld [vmem:[%s2574_s5 + $0x10] sm:$0xff] }
 0x127   : > { %2579 = vst [vmem:[#allocation2_spill] sm:$0xff] %v2372_v34  ;;  %v792_v34 = vadd.f32 %v764_v9, %v2330_v31  ;;  %v974_v39 = vadd.f32 %v949_v13, %v793_v32  ;;  %v970_v9 = vadd.f32 %v2366_v5, %v789_v35  ;;  %v1383_v32 = vld [vmem:[%s2573_s4 + $0x90] sm:$0xff] }
 0x128   : > { %v2374_v36 = vpop.f32.mrf.mxu0 }
 0x129   : > { %v973_v27 = vadd.f32 %v945_v11, %v792_v34  ;;  %v968_v11 = vadd.f32 %v2358_v0, %v787_v23  ;;  %v1148_v7 = vadd.f32 %v2374_v36, %v2360_v1  ;;  %v2581_v0 = vmov 0.0   ;;  %v1163_v1 = vld [vmem:[%s2571_s2 + $0x10] sm:$0xf]  ;;  %v1487_v34 = vld [vmem:[%s2574_s5 + $0x60] sm:$0xff] }
 0x12a   : > { %v1114_v37 = vpop.f32.mrf.mxu0  ;;  %v1266_v36 = vld [vmem:[%s2572_s3 + $0x10] sm:$0xf] }
 0x12b   : > { %v1149_v62 = vadd.f32 %v1114_v37, %v968_v11  ;;  %v1486_v37 = vld [vmem:[%s2574_s5 + $0x58] sm:$0xff] }
 0x12c   : > { %v1116_v38 = vpop.f32.mrf.mxu0 }
 0x12e   : > { %v1120_v40 = vpop.f32.mrf.mxu0  ;;  %v2580_v5 = vld [vmem:[#allocation2_spill] sm:$0xff] }
 0x12f   : > { %v1151_v17 = vadd.f32 %v1120_v40, %v970_v9  ;;  %v1147_v6 = vadd.f32 %v2580_v5, %v2354_v61  ;;  %v1162_v61 = vld [vmem:[%s2571_s2 + $0x8] sm:$0xff] }
 0x130   : > { %v1122_v41 = vpop.f32.mrf.mxu0  ;;  %v1484_v40 = vld [vmem:[%s2574_s5 + $0x48] sm:$0xff] }
 0x132   : > { %v1124_v42 = vpop.f32.mrf.mxu0 }
 0x133   : > { %v1153_v13 = vadd.f32 %v1124_v42, %v972_v2  ;;  %v1482_v42 = vld [vmem:[%s2574_s5 + $0x38] sm:$0xff] }
 0x134   : > { %v1126_v44 = vpop.f32.mrf.mxu0 }
 0x135   : > { %v1154_v4 = vadd.f32 %v1126_v44, %v973_v27  ;;  %v1481_v44 = vld [vmem:[%s2574_s5 + $0x30] sm:$0xff] }
 0x136   : > { %v1130_v45 = vpop.f32.mrf.mxu0 }
 0x137   : > { %v1155_v8 = vadd.f32 %v1130_v45, %v974_v39  ;;  %v1480_v45 = vld [vmem:[%s2574_s5 + $0x28] sm:$0xff] }
 0x138   : > { %v1132_v51 = vpop.f32.mrf.mxu0 }
 0x139   : > { %v1156_v31 = vadd.f32 %v1132_v51, %v975_v18  ;;  %v1369_v51 = vld [vmem:[%s2573_s4 + $0x20] sm:$0xff] }
 0x13a   : > { %v1134_v54 = vpop.f32.mrf.mxu0  ;;  %1418 = vmatpush1.msra.mxu0 %v1369_v51 }
 0x13b   : > { %v1157_v12 = vadd.f32 %v1134_v54, %v976_v50  ;;  %1419 = vmatprep.subr.mxu0 %v2581_v0  ;;  %v1478_v54 = vld [vmem:[%s2574_s5 + $0x18] sm:$0xff]  ;;  %v1491_v50 = vld [vmem:[%s2574_s5 + $0x80] sm:$0xff] }
 0x13c   : > { %v1136_v57 = vpop.f32.mrf.mxu0  ;;  %1420 = vmatpush1.msra.mxu0 %v1368_v53 }
 0x13d   : > { %v1158_v21 = vadd.f32 %v1136_v57, %v977_v49  ;;  %1421 = vmatprep.subr.mxu0 %v2581_v0  ;;  %v1366_v57 = vld [vmem:[%s2573_s4 + $0x8] sm:$0xff] }
 0x13e   : > { %v1140_v60 = vpop.f32.mrf.mxu0  ;;  %1422 = vmatpush1.msra.mxu0 %v1367_v55  ;;  %v1382_v49 = vld [vmem:[%s2573_s4 + $0x88] sm:$0xff] }
 0x13f   : > { %v1159_v24 = vadd.f32 %v1140_v60, %v978_v33  ;;  %1423 = vmatprep.subr.mxu0 %v2581_v0  ;;  %v1475_v60 = vld [vmem:[%s2574_s5] sm:$0xff]  ;;  %v1493_v33 = vld [vmem:[%s2574_s5 + $0x90] sm:$0xff] }
 0x140   : > { %v1142_v63 = vpop.f32.mrf.mxu0  ;;  %1424 = vmatpush1.msra.mxu0 %v1366_v57 }
 0x141   : > { %v1160_v47 = vadd.f32 %v1142_v63, %v979_v30  ;;  %v788_v63 = vadd.f32 %v2362_v3, %v2306_v15  ;;  %v1152_v3 = vadd.f32 %v1122_v41, %v971_v19  ;;  %v1483_v41 = vld [vmem:[%s2574_s5 + $0x40] sm:$0xff]  ;;  %1425 = vmatprep.subr.mxu0 %v2581_v0  ;;  %v1494_v30 = vld [vmem:[%s2574_s5 + $0x98] sm:$0xff] }
 0x142   : > { %v1144_v46 = vpop.f32.mrf.mxu0  ;;  %1426 = vmatpush1.msra.mxu0 %v1365_v59 }
 0x143   : > { %1838 = vmatprep.subr.msk.mxu1 %vm1174_vm2, %v1160_v47  ;;  %v969_v15 = vadd.f32 %v2364_v14, %v788_v63  ;;  %v1161_v14 = vld [vmem:[%s2571_s2] sm:$0xff]  ;;  %1451 = vmatprep.subr.mxu0 %v2581_v0 }
 0x144   : > { %v1145_v16 = vpop.f32.mrf.mxu0  ;;  %1839 = vmatpush1.msk.msra.mxu1 %vm1174_vm2, %v1159_v24  ;;  %1452 = vmatpush2.msra.mxu0 %v1384_v29 }
 0x145   : > { %1201 = vmatprep.subr.mxu1 %v1158_v21  ;;  %v1150_v10 = vadd.f32 %v1116_v38, %v969_v15  ;;  %v1485_v38 = vld [vmem:[%s2574_s5 + $0x50] sm:$0xff]  ;;  %1453 = vmatprep.subr.mxu0 %v2581_v0 }
 0x146   : > { %1202 = vmatpush1.msra.mxu1 %v1157_v12  ;;  %1454 = vmatpush2.msra.mxu0 %v1383_v32 }
 0x147   : > { %1203 = vmatprep.subr.mxu1 %v1156_v31  ;;  %1455 = vmatprep.subr.mxu0 %v2581_v0 }
 0x148   : > { %1204 = vmatpush1.msra.mxu1 %v1155_v8  ;;  %1456 = vmatpush2.msra.mxu0 %v1382_v49 }
 0x149   : > { %1205 = vmatprep.subr.mxu1 %v1154_v4  ;;  %1457 = vmatprep.subr.mxu0 %v2581_v0 }
 0x14a   : > { %1206 = vmatpush1.msra.mxu1 %v1153_v13  ;;  %1458 = vmatpush2.msra.mxu0 %v1381_v48 }
 0x14b   : > { %1207 = vmatprep.subr.mxu1 %v1152_v3 }
 0x14c   : > { %1208 = vmatpush1.msra.mxu1 %v1151_v17 }
 0x14d   : > { %1209 = vmatprep.subr.mxu1 %v1150_v10 }
 0x14e   : > { %1210 = vmatpush1.msra.mxu1 %v1149_v62 }
 0x14f   : > { %1211 = vmatprep.subr.mxu1 %v1148_v7 }
 0x150   : > { %1212 = vmatpush1.msra.mxu1 %v1147_v6 }
 0x151   : > { %1843 = vmatprep.subr.msk.mxu1 %vm1174_vm2, %v1160_v47  ;;  %1840 = vmatmul.mubr.msk.f32.vlgmr.msra.gmra.mxu1 %vm1164_vm3, %v1161_v14  ;;  %v1492_v47 = vld [vmem:[%s2574_s5 + $0x88] sm:$0xff] }
 0x152   : > { %1844 = vmatpush1.msk.msra.mxu1 %vm1174_vm2, %v1159_v24  ;;  %1251 = vmatprep.mubr.f32.mxu1 %v2581_v0 }
 0x153   : > { %1296 = vmatprep.subr.mxu1 %v1158_v21 }
 0x154   : > { %1297 = vmatpush1.msra.mxu1 %v1157_v12 }
 0x155   : > { %1298 = vmatprep.subr.mxu1 %v1156_v31  ;;  %1841 = vmatmul.mubr.msk.f32.gmra.mxu1 %vm1164_vm3, %v1162_v61 }
 0x156   : > { %1299 = vmatpush1.msra.mxu1 %v1155_v8  ;;  %1257 = vmatprep.mubr.f32.mxu1 %v2581_v0 }
 0x157   : > { %1300 = vmatprep.subr.mxu1 %v1154_v4 }
 0x158   : > { %1301 = vmatpush1.msra.mxu1 %v1153_v13 }
 0x159   : > { %1302 = vmatprep.subr.mxu1 %v1152_v3  ;;  %1842 = vmatmul.mubr.msk.f32.gmra.mxu1 %vm1164_vm3, %v1163_v1  ;;  %v1854_v3 = vld [vmem:[%s2575_s6] ss:$0 sm:$0xff] }
 0x15a   : > { %1303 = vmatpush1.msra.mxu1 %v1151_v17  ;;  %1340 = vmatprep.mubr.f32.mxu1 %v2581_v0 }
 0x15b   : > { %1304 = vmatprep.subr.mxu1 %v1150_v10 }
 0x15c   : > { %1305 = vmatpush1.msra.mxu1 %v1149_v62 }
 0x15d   : > { %1306 = vmatprep.subr.mxu1 %v1148_v7 }
 0x15e   : > { %1307 = vmatpush1.msra.mxu1 %v1147_v6 }
 0x15f   : > { %1845 = vmatmul.mubr.msk.f32.vlgmr.msra.gmra.mxu1 %vm1164_vm3, %v1264_v20  ;;  %1495 = vmatprep.subr.mxu1 %v2581_v0 }
 0x160   : > { %1346 = vmatprep.mubr.f32.mxu1 %v2581_v0  ;;  %1496 = vmatpush1.msra.mxu1 %v1490_v22 }
 0x161   : > { %1497 = vmatprep.subr.mxu1 %v2581_v0 }
 0x162   : > { %1498 = vmatpush1.msra.mxu1 %v1489_v25 }
 0x163   : > { %1846 = vmatmul.mubr.msk.f32.gmra.mxu1 %vm1164_vm3, %v1265_v26  ;;  %1499 = vmatprep.subr.mxu1 %v2581_v0 }
 0x164   : > { %1352 = vmatprep.mubr.f32.mxu1 %v2581_v0  ;;  %1500 = vmatpush1.msra.mxu1 %v1488_v28 }
 0x165   : > { %1501 = vmatprep.subr.mxu1 %v2581_v0 }
 0x166   : > { %1502 = vmatpush1.msra.mxu1 %v1487_v34 }
 0x167   : > { %1847 = vmatmul.mubr.msk.f32.gmra.mxu1 %vm1164_vm3, %v1266_v36  ;;  %1503 = vmatprep.subr.mxu1 %v2581_v0 }
 0x168   : > { %1504 = vmatpush1.msra.mxu1 %v1486_v37 }
 0x169   : > { %1505 = vmatprep.subr.mxu1 %v2581_v0 }
 0x16a   : > { %1506 = vmatpush1.msra.mxu1 %v1485_v38 }
 0x16b   : > { %1507 = vmatprep.subr.mxu1 %v2581_v0 }
 0x16c   : > { %1508 = vmatpush1.msra.mxu1 %v1484_v40 }
 0x16d   : > { %1509 = vmatprep.subr.mxu1 %v2581_v0 }
 0x16e   : > { %1510 = vmatpush1.msra.mxu1 %v1483_v41 }
 0x16f   : > { %1511 = vmatprep.subr.mxu1 %v2581_v0 }
 0x170   : > { %1512 = vmatpush1.msra.mxu1 %v1482_v42 }
 0x171   : > { %1513 = vmatprep.subr.mxu1 %v2581_v0 }
 0x172   : > { %1514 = vmatpush1.msra.mxu1 %v1481_v44 }
 0x173   : > { %1515 = vmatprep.subr.mxu1 %v2581_v0 }
 0x174   : > { %1516 = vmatpush1.msra.mxu1 %v1480_v45 }
 0x175   : > { %1517 = vmatprep.subr.mxu1 %v2581_v0 }
 0x176   : > { %1518 = vmatpush1.msra.mxu1 %v1479_v52 }
 0x177   : > { %1519 = vmatprep.subr.mxu1 %v2581_v0 }
 0x178   : > { %1520 = vmatpush1.msra.mxu1 %v1478_v54 }
 0x179   : > { %1521 = vmatprep.subr.mxu1 %v2581_v0 }
 0x17a   : > { %1522 = vmatpush1.msra.mxu1 %v1477_v56 }
 0x17b   : > { %1523 = vmatprep.subr.mxu1 %v2581_v0 }
 0x17c   : > { %1524 = vmatpush1.msra.mxu1 %v1476_v58 }
 0x17d   : > { %1525 = vmatprep.subr.mxu1 %v2581_v0 }
 0x17e   : > { %1526 = vmatpush1.msra.mxu1 %v1475_v60 }
 0x17f   : > { %1551 = vmatprep.subr.mxu1 %v2581_v0 }
 0x180   : > { %1552 = vmatpush2.msra.mxu1 %v1494_v30 }
 0x181   : > { %1553 = vmatprep.subr.mxu1 %v2581_v0 }
 0x182   : > { %1554 = vmatpush2.msra.mxu1 %v1493_v33 }
 0x183   : > { %1555 = vmatprep.subr.mxu1 %v2581_v0 }
 0x184   : > { %1556 = vmatpush2.msra.mxu1 %v1492_v47 }
 0x185   : > { %1557 = vmatprep.subr.mxu1 %v2581_v0 }
 0x186   : > { %1558 = vmatpush2.msra.mxu1 %v1491_v50 }
 0x211   : > { %v1247_v24 = vpop.f32.mrf.mxu1 }
 0x213   : > { %v1249_v46 = vpop.f32.mrf.mxu1 }
 0x215   : > { %v1253_v43 = vpop.f32.mrf.mxu1 }
 0x217   : > { %v1255_v18 = vpop.f32.mrf.mxu1 }
 0x219   : > { %v1259_v21 = vpop.f32.mrf.mxu1 }
 0x21b   : > { %v1261_v35 = vpop.f32.mrf.mxu1 }
 0x21f   : > { %v1342_v39 = vpop.f32.mrf.mxu1 }
 0x220   : > { %v1359_v63 = vmax.f32 %v1247_v24, %v1342_v39 }
 0x221   : > { %v1344_v12 = vpop.f32.mrf.mxu1 }
 0x222   : > { %v1360_v16 = vmax.f32 %v1249_v46, %v1344_v12 }
 0x223   : > { %v1348_v27 = vpop.f32.mrf.mxu1 }
 0x224   : > { %1848 = vmatprep.mubr.msk.f32.mxu0 %vm1385_vm4, %v1360_v16  ;;  %1851 = vmatprep.mubr.msk.f32.mxu1 %vm1385_vm4, %v1360_v16  ;;  %v1361_v2 = vmax.f32 %v1253_v43, %v1348_v27 }
 0x225   : > { %v1350_v31 = vpop.f32.mrf.mxu1  ;;  %1460 = vmatmul.mubr.f32.vlgmr.msra.gmra.mxu0 %v1359_v63  ;;  %1560 = vmatmul.mubr.f32.vlgmr.msra.gmra.mxu1 %v1359_v63 }
 0x226   : > { %v1362_v23 = vmax.f32 %v1255_v18, %v1350_v31 }
 0x227   : > { %v1354_v8 = vpop.f32.mrf.mxu1 }
 0x228   : > { %1849 = vmatprep.mubr.msk.f32.mxu0 %vm1385_vm4, %v1362_v23  ;;  %1852 = vmatprep.mubr.msk.f32.mxu1 %vm1385_vm4, %v1362_v23  ;;  %v1363_v9 = vmax.f32 %v1259_v21, %v1354_v8 }
 0x229   : > { %v1356_v19 = vpop.f32.mrf.mxu1  ;;  %1465 = vmatmul.mubr.f32.gmra.mxu0 %v1361_v2  ;;  %1565 = vmatmul.mubr.f32.gmra.mxu1 %v1361_v2 }
 0x22a   : > { %v1364_v4 = vmax.f32 %v1261_v35, %v1356_v19 }
 0x22c   : > { %1850 = vmatprep.mubr.msk.f32.mxu0 %vm1385_vm4, %v1364_v4  ;;  %1853 = vmatprep.mubr.msk.f32.mxu1 %vm1385_vm4, %v1364_v4 }
 0x22d   : > { %1470 = vmatmul.mubr.f32.gmra.mxu0 %v1363_v9  ;;  %1570 = vmatmul.mubr.f32.gmra.mxu1 %v1363_v9 }
 0x2e5   : > { %v1461_v13 = vpop.f32.mrf.mxu0  ;;  %v1561_v15 = vpop.f32.mrf.mxu1 }
 0x2e6   : > { %v1575_v11 = vmax.f32 %v1461_v13, %v1561_v15 }
 0x2e7   : > { %v1463_v17 = vpop.f32.mrf.mxu0  ;;  %v1563_v10 = vpop.f32.mrf.mxu1 }
 0x2e8   : > { %v1585_v62 = vadd.f32 %v1854_v3, %v1575_v11 }
 0x2e9   : > { %v1466_v7 = vpop.f32.mrf.mxu0  ;;  %v1566_v5 = vpop.f32.mrf.mxu1 }
 0x2ea   : > { %v1591_v6 = vmin.f32 %v1585_v62, 20.0  ;;  %v1576_v14 = vmax.f32 %v1466_v7, %v1566_v5  ;;  %vm1588_vm7 = vcmp.gt.f32.partialorder %v1585_v62, 20.0 }
 0x2eb   : > { %v1468_v0 = vpop.f32.mrf.mxu0  ;;  %v1568_v61 = vpop.f32.mrf.mxu1 }
 0x2ec   : > { %v1594_v1 = vmul.f32 1.442695, %v1591_v6  ;;  %v1586_v20 = vadd.f32 %v1854_v3, %v1576_v14 }
 0x2ed   : > { %v1471_v22 = vpop.f32.mrf.mxu0  ;;  %v1571_v25 = vpop.f32.mrf.mxu1 }
 0x2ee   : > { %1957 = vpow2.f32 %v1594_v1  ;;  %v1592_v26 = vmin.f32 %v1586_v20, 20.0  ;;  %v1577_v28 = vmax.f32 %v1471_v22, %v1571_v25  ;;  %vm1589_vm11 = vcmp.gt.f32.partialorder %v1586_v20, 20.0 }
 0x2ef   : > { %v1473_v34 = vpop.f32.mrf.mxu0  ;;  %v1573_v36 = vpop.f32.mrf.mxu1 }
 0x2f0   : > { %v1596_v37 = vmul.f32 1.442695, %v1592_v26  ;;  %v1587_v38 = vadd.f32 %v1854_v3, %v1577_v28 }
 0x2f2   : > { %1959 = vpow2.f32 %v1596_v37  ;;  %v1593_v40 = vmin.f32 %v1587_v38, 20.0  ;;  %vm1590_vm0 = vcmp.gt.f32.partialorder %v1587_v38, 20.0 }
 0x2f4   : > { %v1598_v41 = vmul.f32 1.442695, %v1593_v40 }
 0x2f6   : > { %1961 = vpow2.f32 %v1598_v41 }
 0x2fb   : > { %v1958_v42 = vpop.eup %1957 }
 0x2fc   : > { %v1600_v44 = vadd.f32 1.0, %v1958_v42  ;;  %v1603_v53 = vmul.f32 -0.5, %v1958_v42  ;;  %v1606_v57 = vand.u32 2147483647, %v1958_v42 }
 0x2fe   : > { %1963 = vlog2.f32 %v1600_v44  ;;  %v1604_v55 = vadd.f32 1.0, %v1603_v53  ;;  %vm1607_vm5 = vcmp.lt.f32.partialorder %v1606_v57, 0.0004427343 }
 0x2ff   : > { %v1960_v45 = vpop.eup %1959 }
 0x300   : > { %v1609_v51 = vadd.f32 1.0, %v1960_v45  ;;  %v1612_v56 = vmul.f32 -0.5, %v1960_v45  ;;  %v1605_v60 = vmul.f32 %v1958_v42, %v1604_v55  ;;  %v1615_v32 = vand.u32 2147483647, %v1960_v45 }
 0x302   : > { %1965 = vlog2.f32 %v1609_v51  ;;  %v1613_v29 = vadd.f32 1.0, %v1612_v56  ;;  %vm1616_vm9 = vcmp.lt.f32.partialorder %v1615_v32, 0.0004427343 }
 0x303   : > { %v1962_v52 = vpop.eup %1961 }
 0x304   : > { %v1618_v54 = vadd.f32 1.0, %v1962_v52  ;;  %v1621_v30 = vmul.f32 -0.5, %v1962_v52  ;;  %v1614_v50 = vmul.f32 %v1960_v45, %v1613_v29  ;;  %v1624_v46 = vand.u32 2147483647, %v1962_v52 }
 0x306   : > { %1967 = vlog2.f32 %v1618_v54  ;;  %v1622_v24 = vadd.f32 1.0, %v1621_v30  ;;  %vm1625_vm14 = vcmp.lt.f32.partialorder %v1624_v46, 0.0004427343 }
 0x308   : > { %v1623_v39 = vmul.f32 %v1962_v52, %v1622_v24 }
 0x30b   : > { %v1964_v58 = vpop.eup %1963 }
 0x30c   : > { %v1602_v59 = vmul.f32 0.6931472, %v1964_v58 }
 0x30e   : > { %v1608_v33 = vsel %vm1607_vm5, %v1605_v60, %v1602_v59 }
 0x30f   : > { %v1966_v49 = vpop.eup %1965  ;;  %v1627_v47 = vsel %vm1588_vm7, %v1585_v62, %v1608_v33 }
 0x310   : > { %1631 = vst.msk [vmem:[%s2558_s25] sm:$0x1f] %vm1630_vm6, %v1627_v47  ;;  %v1611_v48 = vmul.f32 0.6931472, %v1966_v49 }
 0x311   : > { %1855 = vst.msk [vmem:[%s2558_s25 + $0x3] sm:$0xe0] %vm1633_vm8, %v1627_v47 }
 0x312   : > { %v1617_v43 = vsel %vm1616_vm9, %v1614_v50, %v1611_v48 }
 0x313   : > { %v1968_v18 = vpop.eup %1967  ;;  %v1628_v21 = vsel %vm1589_vm11, %v1586_v20, %v1617_v43 }
 0x314   : > { %1856 = vst.msk [vmem:[%s2558_s25 + $0xb] sm:$0x3] %vm1635_vm10, %v1628_v21  ;;  %v1620_v35 = vmul.f32 0.6931472, %v1968_v18 }
 0x315   : > { %1857 = vst.msk [vmem:[%s2558_s25 + $0xe] sm:$0x7c] %vm1638_vm12, %v1628_v21 }
 0x316   : > { %1858 = vst.msk [vmem:[%s2558_s25 + $0x11] sm:$0x80] %vm1641_vm13, %v1628_v21  ;;  %v1626_v12 = vsel %vm1625_vm14, %v1623_v39, %v1620_v35 }
 0x317   : > { %v1629_v16 = vsel %vm1590_vm0, %v1587_v38, %v1626_v12 }
 0x318   : > { %1859 = vst.msk [vmem:[%s2558_s25 + $0x19] sm:$0xf] %vm1643_vm15, %v1629_v16 }
 0x319 PF: > { %s17_s24 = sadd.s32 1, %s1975_s24  }
 0x31a   : > { %p14_p5 = scmp.ge.s32.totalorder %s17_s24, 4  }
 0x31c   :  { %16 = sbr.rel (!%p14_p5) target bundleno = 1 (0x1), region = 85 }

// kernel: lenet_forward.3
= control target key start
LH: loop header
LB: loop body
LE: loop exit
PB: predicated region body
PF: predicated region fallthrough
CT: control target
= control target key end

     0   :  { %s2684_s24 = smov 0   ;;  %s3725_s0 = inlined_call_operand.vmem [shape: f32[256,96], index: 0, kind: input, shape index: {}]   ;;  %s3726_s1 = inlined_call_operand.vmem [shape: bf16[5,96,168], index: 1, kind: input, shape index: {}]   ;;  %s3727_s2 = inlined_call_operand.vmem [shape: f32[56,124], index: 2, kind: input, shape index: {}]   ;;  %s3728_s3 = inlined_call_operand.vmem [shape: f32[56,124], index: 3, kind: input, shape index: {}]   ;;  %s3729_s4 = inlined_call_operand.vmem [shape: f32[168,84], index: 4, kind: input, shape index: {}]   ;;  %s3730_s5 = inlined_call_operand.vmem [shape: f32[168,84], index: 5, kind: input, shape index: {}]   ;;  %s3731_s6 = inlined_call_operand.vmem [shape: f32[1,84], index: 6, kind: input, shape index: {}]   ;;  %s3732_s7 = inlined_call_operand.vmem [shape: f32[8,14,84], index: 7, kind: output, shape index: {}]  }
   0x1 LB: > { %s2304_s25 = sadd.s32 4294967295, %s2640_s24   ;;  %p2308_p0 = scmp.ge.s32.totalorder %s2640_s24, 1  ;;  %s2640_s24 = sphi %s2684_s24, %s17_s24  }
   0x2   : > { %p238_p1 = scmp.lt.s32.totalorder %s2640_s24, 3 }
   0x4   : > { %p239_p2 = pnand %p2308_p0, %p238_p1 }
   0x6   : > { %242 = sbr.rel (%p239_p2) target bundleno = 945 (0x3b1), region = 48 }
   0xb   : > { %v2516_v0 = vld [vmem:[%s3726_s1 + $0xb4] ss:$8 sps:$4 sm:$0xff]   ;;  %v2642_v2 = vmov 0   ;;  %v2520_v3 = vld [vmem:[%s3726_s1 + $0xb0] ss:$8 sps:$4 sm:$0xff]   ;;  %s2309_s11 = sshll.u32 %s2304_s25, 4 }
   0xc   : > { %v2518_v1 = vld [vmem:[%s3726_s1 + $0x54] ss:$8 sps:$4 sm:$0xff]   ;;  %475 = vmatprep.mubr.bf16.mxu0 %v2642_v2  ;;  %672 = vmatprep.mubr.bf16.mxu1 %v2642_v2  ;;  %v2521_v4 = vld [vmem:[%s3726_s1 + $0x50] ss:$8 sps:$4 sm:$0xff]   ;;  %v2522_v5 = vld [vmem:[%s3726_s1 + $0xa4] ss:$8 sps:$4 sm:$0xff]  }
   0xd   : > { %447 = vmatprep.subr.bf16.mxu0 %v2516_v0  ;;  %644 = vmatprep.subr.bf16.mxu1 %v2518_v1  ;;  %v2524_v6 = vld [vmem:[%s3726_s1 + $0x44] ss:$8 sps:$4 sm:$0xff]   ;;  %v2526_v7 = vld [vmem:[%s3726_s1 + $0xa0] ss:$8 sps:$4 sm:$0xff]   ;;  %p272_p3 = scmp.lt.s32.totalorder %s2309_s11, 31  ;;  %vm418_vm0 = vcmask 785408  }
   0xe   : > { %448 = vmatpush1.bf16.msra.mxu0 %v2520_v3  ;;  %645 = vmatpush1.bf16.msra.mxu1 %v2521_v4  ;;  %v2527_v8 = vld [vmem:[%s3726_s1 + $0x40] ss:$8 sps:$4 sm:$0xff]   ;;  %v2528_v9 = vld [vmem:[%s3726_s1 + $0x94] ss:$8 sps:$4 sm:$0xff]   ;;  %v2532_v11 = vld [vmem:[%s3726_s1 + $0x90] ss:$8 sps:$4 sm:$0xff]  }
   0xf   : > { %449 = vmatprep.subr.bf16.mxu0 %v2522_v5  ;;  %646 = vmatprep.subr.bf16.mxu1 %v2524_v6  ;;  %v2530_v10 = vld [vmem:[%s3726_s1 + $0x34] ss:$8 sps:$4 sm:$0xff]   ;;  %v2533_v12 = vld [vmem:[%s3726_s1 + $0x30] ss:$8 sps:$4 sm:$0xff]   ;;  %v2534_v13 = vld [vmem:[%s3726_s1 + $0x84] ss:$8 sps:$4 sm:$0xff]  }
  0x10   : > { %v2536_v14 = vld [vmem:[%s3726_s1 + $0x24] ss:$8 sps:$4 sm:$0xff]   ;;  %s3795_s11 = smov (!%p272_p3, %s2309_s11), 31  ;;  %v2538_v15 = vld [vmem:[%s3726_s1 + $0x80] ss:$8 sps:$4 sm:$0xff]   ;;  %vm1580_vm1 = vcmask 1043456  }
  0x11   : > { %v2539_v16 = vld [vmem:[%s3726_s1 + $0x20] ss:$8 sps:$4 sm:$0xff]   ;;  %v2540_v17 = vld [vmem:[%s3726_s1 + $0x74] ss:$8 sps:$4 sm:$0xff]   ;;  %s2310_s20 = sshll.u32 %s3795_s11, 3  ;;  %vm1558_vm2 = vcmask 1014784  }
  0x12   : > { %450 = vmatpush1.bf16.msra.mxu0 %v2526_v7  ;;  %647 = vmatpush1.bf16.msra.mxu1 %v2527_v8  ;;  %v2542_v18 = vld [vmem:[%s3726_s1 + $0x14] ss:$8 sps:$4 sm:$0xff]   ;;  %v2544_v19 = vld [vmem:[%s3726_s1 + $0x70] ss:$8 sps:$4 sm:$0xff]   ;;  %s2759_s29 = scalar_lea.vmem %s3725_s0, %s2310_s20  ;;  %v2546_v21 = vld [vmem:[%s3726_s1 + $0x64] ss:$8 sps:$4 sm:$0xff]  }
  0x13   : > { %451 = vmatprep.subr.bf16.mxu0 %v2528_v9  ;;  %648 = vmatprep.subr.bf16.mxu1 %v2530_v10  ;;  %v2545_v20 = vld [vmem:[%s3726_s1 + $0x10] ss:$8 sps:$4 sm:$0xff]   ;;  %v2548_v22 = vld [vmem:[%s3726_s1 + $0x4] ss:$8 sps:$4 sm:$0xff]   ;;  %v2550_v23 = vld [vmem:[%s3726_s1 + $0x60] ss:$8 sps:$4 sm:$0xff]  }
  0x14   : > { %v2551_v24 = vld [vmem:[%s3726_s1] ss:$8 sps:$4 sm:$0xff]   ;;  %v2554_v29 = vld [vmem:[%s3726_s1 + $0x114] ss:$8 sps:$4 sm:$0xff]   ;;  %v2552_v32 = vld [vmem:[%s3726_s1 + $0x110] ss:$8 sps:$4 sm:$0xff]  }
  0x15   : > { %v321_v25 = vld [vmem:[%s2759_s29 + $0x1] sm:$0xff]  ;;  %v322_v26 = vld [vmem:[%s2759_s29 + $0x9] sm:$0xff]  ;;  %v323_v33 = vld [vmem:[%s2759_s29 + $0x11] sm:$0xff]  ;;  %vm1864_vm3 = vcmask 326656   ;;  %s2311_s15 = sshll.u32 %s2304_s25, 2  ;;  %vm2226_vm5 = vcmask 687104  }
  0x16   : > { %452 = vmatpush1.bf16.msra.mxu0 %v2532_v11  ;;  %649 = vmatpush1.bf16.msra.mxu1 %v2533_v12  ;;  %v285_v27 = vld [vmem:[%s2759_s29] sm:$0xff]  ;;  %v286_v28 = vld [vmem:[%s2759_s29 + $0x8] sm:$0xff]  ;;  %v337_v30 = vpack.c.bf16 %v322_v26, %v321_v25  ;;  %v287_v35 = vld [vmem:[%s2759_s29 + $0x10] sm:$0xff]  ;;  %p278_p4 = scmp.lt.s32.totalorder %s2311_s15, 7  ;;  %vm2228_vm7 = vcmask 685056   ;;  %vm2231_vm9 = vcmask 687110  }
  0x17   : > { %453 = vmatprep.subr.bf16.mxu0 %v2534_v13  ;;  %650 = vmatprep.subr.bf16.mxu1 %v2536_v14  ;;  %v301_v31 = vpack.c.bf16 %v286_v28, %v285_v27  ;;  %v324_v34 = vld [vmem:[%s2759_s29 + $0x19] sm:$0xff]  ;;  %v2557_v36 = vld [vmem:[%s3726_s1 + $0x104] ss:$8 sps:$4 sm:$0xff]   ;;  %v327_v0 = vld [vmem:[%s2759_s29 + $0x31] sm:$0xff]  ;;  %vm2234_vm13 = vcmask 683008   ;;  %vm2237_vm15 = vcmask 687108  }
  0x18   : > { %v2558_v37 = vld [vmem:[%s3726_s1 + $0x170] ss:$8 sps:$4 sm:$0xff]   ;;  %v2560_v38 = vld [vmem:[%s3726_s1 + $0x174] ss:$8 sps:$4 sm:$0xff]   ;;  %v2555_v40 = vld [vmem:[%s3726_s1 + $0x100] ss:$8 sps:$4 sm:$0xff]   ;;  %v338_v43 = vpack.c.bf16 %v324_v34, %v323_v33 }
  0x19   : > { %v288_v39 = vld [vmem:[%s2759_s29 + $0x18] sm:$0xff]  ;;  %v2563_v41 = vld [vmem:[%s3726_s1 + $0x164] ss:$8 sps:$4 sm:$0xff]   ;;  %v2561_v42 = vld [vmem:[%s3726_s1 + $0x160] ss:$8 sps:$4 sm:$0xff]   ;;  %s3797_s15 = smov (!%p278_p4, %s2311_s15), 7 }
  0x1a   : > { %454 = vmatpush1.bf16.msra.mxu0 %v2538_v15  ;;  %651 = vmatpush1.bf16.msra.mxu1 %v2539_v16  ;;  %v302_v44 = vpack.c.bf16 %v288_v39, %v287_v35  ;;  %v2566_v45 = vld [vmem:[%s3726_s1 + $0xf4] ss:$8 sps:$4 sm:$0xff]   ;;  %v2564_v46 = vld [vmem:[%s3726_s1 + $0xf0] ss:$8 sps:$4 sm:$0xff]   ;;  %v2572_v49 = vld [vmem:[%s3726_s1 + $0xe4] ss:$8 sps:$4 sm:$0xff]  }
  0x1b   : > { %455 = vmatprep.subr.bf16.mxu0 %v2540_v17  ;;  %652 = vmatprep.subr.bf16.mxu1 %v2542_v18  ;;  %v2569_v47 = vld [vmem:[%s3726_s1 + $0x154] ss:$8 sps:$4 sm:$0xff]   ;;  %v2567_v48 = vld [vmem:[%s3726_s1 + $0x150] ss:$8 sps:$4 sm:$0xff]   ;;  %v325_v50 = vld [vmem:[%s2759_s29 + $0x21] sm:$0xff]  ;;  %s2505_s25 = sshll.u32 %s3797_s15, 4 }
  0x1c   : > { %v2575_v51 = vld [vmem:[%s3726_s1 + $0x144] ss:$8 sps:$4 sm:$0xff]   ;;  %v2570_v55 = vld [vmem:[%s3726_s1 + $0xe0] ss:$8 sps:$4 sm:$0xff]   ;;  %v2578_v57 = vld [vmem:[%s3726_s1 + $0xd4] ss:$8 sps:$4 sm:$0xff]   ;;  %s3687_s18 = scalar_lea.vmem %s3732_s7, %s2505_s25 }
  0x1d   : > { %v326_v52 = vld [vmem:[%s2759_s29 + $0x29] sm:$0xff]  ;;  %v289_v53 = vld [vmem:[%s2759_s29 + $0x20] sm:$0xff]  ;;  %v2581_v61 = vld [vmem:[%s3726_s1 + $0x134] ss:$8 sps:$4 sm:$0xff]  }
  0x1e   : > { %456 = vmatpush1.bf16.msra.mxu0 %v2544_v19  ;;  %653 = vmatpush1.bf16.msra.mxu1 %v2545_v20  ;;  %v290_v54 = vld [vmem:[%s2759_s29 + $0x28] sm:$0xff]  ;;  %v339_v58 = vpack.c.bf16 %v326_v52, %v325_v50  ;;  %v2576_v60 = vld [vmem:[%s3726_s1 + $0xd0] ss:$8 sps:$4 sm:$0xff]   ;;  %v2590_v10 = vld [vmem:[%s3726_s1 + $0x1d4] ss:$8 sps:$4 sm:$0xff]  }
  0x1f   : > { %457 = vmatprep.subr.bf16.mxu0 %v2546_v21  ;;  %654 = vmatprep.subr.bf16.mxu1 %v2548_v22  ;;  %v2573_v56 = vld [vmem:[%s3726_s1 + $0x140] ss:$8 sps:$4 sm:$0xff]   ;;  %v303_v59 = vpack.c.bf16 %v290_v54, %v289_v53  ;;  %v2579_v62 = vld [vmem:[%s3726_s1 + $0x130] ss:$8 sps:$4 sm:$0xff]   ;;  %v2584_v63 = vld [vmem:[%s3726_s1 + $0xc4] ss:$8 sps:$4 sm:$0xff]  }
  0x20   : > { %v2587_v1 = vld [vmem:[%s3726_s1 + $0x124] ss:$8 sps:$4 sm:$0xff]   ;;  %v328_v3 = vld [vmem:[%s2759_s29 + $0x39] sm:$0xff]  ;;  %v291_v4 = vld [vmem:[%s2759_s29 + $0x30] sm:$0xff] }
  0x21   : > { %v292_v5 = vld [vmem:[%s2759_s29 + $0x38] sm:$0xff]  ;;  %v2582_v6 = vld [vmem:[%s3726_s1 + $0xc0] ss:$8 sps:$4 sm:$0xff]   ;;  %v340_v8 = vpack.c.bf16 %v328_v3, %v327_v0  ;;  %v295_v19 = vld [vmem:[%s2759_s29 + $0x50] sm:$0xff] }
  0x22   : > { %458 = vmatpush1.bf16.msra.mxu0 %v2550_v23  ;;  %655 = vmatpush1.bf16.msra.mxu1 %v2551_v24  ;;  %v2585_v7 = vld [vmem:[%s3726_s1 + $0x120] ss:$8 sps:$4 sm:$0xff]   ;;  %v304_v9 = vpack.c.bf16 %v292_v5, %v291_v4  ;;  %v331_v17 = vld [vmem:[%s2759_s29 + $0x51] sm:$0xff]  ;;  %v2599_v52 = vld [vmem:[%s3726_s1 + $0x1a4] ss:$8 sps:$4 sm:$0xff]  }
  0x23   : > { %878 = vmatprep.subr.bf16.mxu0 %v2554_v29  ;;  %1144 = vmatprep.subr.bf16.mxu1 %v2560_v38  ;;  %v329_v11 = vld [vmem:[%s2759_s29 + $0x41] sm:$0xff]  ;;  %v330_v12 = vld [vmem:[%s2759_s29 + $0x49] sm:$0xff]  ;;  %v332_v18 = vld [vmem:[%s2759_s29 + $0x59] sm:$0xff] }
  0x24   : > { %v293_v13 = vld [vmem:[%s2759_s29 + $0x40] sm:$0xff]  ;;  %v294_v14 = vld [vmem:[%s2759_s29 + $0x48] sm:$0xff]  ;;  %v341_v15 = vpack.c.bf16 %v330_v12, %v329_v11  ;;  %v296_v20 = vld [vmem:[%s2759_s29 + $0x58] sm:$0xff]  ;;  %v342_v21 = vpack.c.bf16 %v332_v18, %v331_v17 }
  0x25   : > { %2338 = vmatmul.mubr.msk.bf16.vlgmr.msra.gmra.mxu0 %vm418_vm0, %v337_v30  ;;  %2358 = vmatmul.mubr.msk.bf16.vlgmr.msra.gmra.mxu1 %vm418_vm0, %v301_v31  ;;  %v305_v16 = vpack.c.bf16 %v294_v14, %v293_v13  ;;  %v306_v22 = vpack.c.bf16 %v296_v20, %v295_v19  ;;  %v333_v23 = vld [vmem:[%s2759_s29 + $0x61] sm:$0xff]  ;;  %v334_v24 = vld [vmem:[%s2759_s29 + $0x69] sm:$0xff]  ;;  %v335_v29 = vld [vmem:[%s2759_s29 + $0x71] sm:$0xff] }
  0x26   : > { %485 = vmatprep.mubr.bf16.mxu0 %v2642_v2  ;;  %682 = vmatprep.mubr.bf16.mxu1 %v2642_v2  ;;  %v297_v25 = vld [vmem:[%s2759_s29 + $0x60] sm:$0xff]  ;;  %v298_v26 = vld [vmem:[%s2759_s29 + $0x68] sm:$0xff]  ;;  %v343_v27 = vpack.c.bf16 %v334_v24, %v333_v23  ;;  %v336_v30 = vld [vmem:[%s2759_s29 + $0x79] sm:$0xf] }
  0x27   : > { %879 = vmatpush1.bf16.msra.mxu0 %v2552_v32  ;;  %1145 = vmatpush1.bf16.msra.mxu1 %v2558_v37  ;;  %v307_v28 = vpack.c.bf16 %v298_v26, %v297_v25  ;;  %v299_v31 = vld [vmem:[%s2759_s29 + $0x70] sm:$0xff]  ;;  %v300_v32 = vld [vmem:[%s2759_s29 + $0x78] sm:$0xf]  ;;  %v344_v33 = vpack.c.bf16 %v336_v30, %v335_v29  ;;  %v753_v35 = vld [vmem:[%s2759_s29 + $0x2] sm:$0xff] }
  0x28   : > { %880 = vmatprep.subr.bf16.mxu0 %v2557_v36  ;;  %1146 = vmatprep.subr.bf16.mxu1 %v2563_v41  ;;  %v308_v34 = vpack.c.bf16 %v300_v32, %v299_v31  ;;  %v754_v36 = vld [vmem:[%s2759_s29 + $0xa] sm:$0xff]  ;;  %v757_v53 = vld [vmem:[%s2759_s29 + $0x22] sm:$0xff]  ;;  %v760_v0 = vld [vmem:[%s2759_s29 + $0x3a] sm:$0xff] }
  0x29   : > { %v1019_v37 = vld [vmem:[%s2759_s29 + $0x3] sm:$0xff]  ;;  %v1020_v38 = vld [vmem:[%s2759_s29 + $0xb] sm:$0xff]  ;;  %v769_v39 = vpack.c.bf16 %v754_v36, %v753_v35  ;;  %v1026_v3 = vld [vmem:[%s2759_s29 + $0x3b] sm:$0xff] }
  0x2a   : > { %v2588_v41 = vld [vmem:[%s3726_s1 + $0x1d0] ss:$8 sps:$4 sm:$0xff]   ;;  %v2603_v4 = vld [vmem:[%s3726_s1 + $0x180] ss:$8 sps:$4 sm:$0xff]  }
  0x2b   : > { %881 = vmatpush1.bf16.msra.mxu0 %v2555_v40  ;;  %1147 = vmatpush1.bf16.msra.mxu1 %v2561_v42  ;;  %v1035_v40 = vpack.c.bf16 %v1020_v38, %v1019_v37  ;;  %v2593_v42 = vld [vmem:[%s3726_s1 + $0x1c4] ss:$8 sps:$4 sm:$0xff]   ;;  %v763_v13 = vld [vmem:[%s2759_s29 + $0x52] sm:$0xff]  ;;  %v764_v14 = vld [vmem:[%s2759_s29 + $0x5a] sm:$0xff] }
  0x2c   : > { %882 = vmatprep.subr.bf16.mxu0 %v2566_v45  ;;  %1148 = vmatprep.subr.bf16.mxu1 %v2569_v47  ;;  %v1021_v45 = vld [vmem:[%s2759_s29 + $0x13] sm:$0xff]  ;;  %v2591_v47 = vld [vmem:[%s3726_s1 + $0x1c0] ss:$8 sps:$4 sm:$0xff]   ;;  %v774_v17 = vpack.c.bf16 %v764_v14, %v763_v13 }
  0x2d   : > { %2339 = vmatmul.mubr.msk.bf16.gmra.mxu0 %vm418_vm0, %v338_v43  ;;  %2359 = vmatmul.mubr.msk.bf16.gmra.mxu1 %vm418_vm0, %v302_v44  ;;  %v755_v43 = vld [vmem:[%s2759_s29 + $0x12] sm:$0xff]  ;;  %v756_v44 = vld [vmem:[%s2759_s29 + $0x1a] sm:$0xff]  ;;  %v758_v54 = vld [vmem:[%s2759_s29 + $0x2a] sm:$0xff] }
  0x2e   : > { %495 = vmatprep.mubr.bf16.mxu0 %v2642_v2  ;;  %692 = vmatprep.mubr.bf16.mxu1 %v2642_v2  ;;  %v765_v19 = vld [vmem:[%s2759_s29 + $0x62] sm:$0xff]  ;;  %v766_v20 = vld [vmem:[%s2759_s29 + $0x6a] sm:$0xff]  ;;  %v767_v25 = vld [vmem:[%s2759_s29 + $0x72] sm:$0xff] }
  0x2f   : > { %883 = vmatpush1.bf16.msra.mxu0 %v2564_v46  ;;  %1149 = vmatpush1.bf16.msra.mxu1 %v2567_v48  ;;  %v1022_v46 = vld [vmem:[%s2759_s29 + $0x1b] sm:$0xff]  ;;  %v775_v23 = vpack.c.bf16 %v766_v20, %v765_v19  ;;  %v1285_v31 = vld [vmem:[%s2759_s29 + $0x4] sm:$0xff]  ;;  %v1286_v32 = vld [vmem:[%s2759_s29 + $0xc] sm:$0xff] }
  0x30   : > { %884 = vmatprep.subr.bf16.mxu0 %v2572_v49  ;;  %1150 = vmatprep.subr.bf16.mxu1 %v2575_v51  ;;  %v2596_v48 = vld [vmem:[%s3726_s1 + $0x1b4] ss:$8 sps:$4 sm:$0xff]   ;;  %v770_v49 = vpack.c.bf16 %v756_v44, %v755_v43  ;;  %v1036_v50 = vpack.c.bf16 %v1022_v46, %v1021_v45  ;;  %v2594_v51 = vld [vmem:[%s3726_s1 + $0x1b0] ss:$8 sps:$4 sm:$0xff]   ;;  %v1289_v37 = vld [vmem:[%s2759_s29 + $0x24] sm:$0xff] }
  0x31   : > { %v768_v26 = vld [vmem:[%s2759_s29 + $0x7a] sm:$0xf]  ;;  %v1290_v38 = vld [vmem:[%s2759_s29 + $0x2c] sm:$0xff]  ;;  %v1293_v43 = vld [vmem:[%s2759_s29 + $0x44] sm:$0xff] }
  0x32   : > { %v776_v29 = vpack.c.bf16 %v768_v26, %v767_v25  ;;  %v1288_v35 = vld [vmem:[%s2759_s29 + $0x1c] sm:$0xff]  ;;  %v1294_v44 = vld [vmem:[%s2759_s29 + $0x4c] sm:$0xff]  ;;  %v1295_v46 = vld [vmem:[%s2759_s29 + $0x54] sm:$0xff] }
  0x33   : > { %885 = vmatpush1.bf16.msra.mxu0 %v2570_v55  ;;  %1151 = vmatpush1.bf16.msra.mxu1 %v2573_v56  ;;  %v1023_v55 = vld [vmem:[%s2759_s29 + $0x23] sm:$0xff]  ;;  %v1024_v56 = vld [vmem:[%s2759_s29 + $0x2b] sm:$0xff]  ;;  %v1305_v45 = vpack.c.bf16 %v1294_v44, %v1293_v43 }
  0x34   : > { %886 = vmatprep.subr.bf16.mxu0 %v2578_v57  ;;  %1152 = vmatprep.subr.bf16.mxu1 %v2581_v61  ;;  %v2597_v57 = vld [vmem:[%s3726_s1 + $0x1a0] ss:$8 sps:$4 sm:$0xff]   ;;  %v2600_v61 = vld [vmem:[%s3726_s1 + $0x190] ss:$8 sps:$4 sm:$0xff]  }
  0x35   : > { %2340 = vmatmul.mubr.msk.bf16.gmra.mxu0 %vm418_vm0, %v339_v58  ;;  %2360 = vmatmul.mubr.msk.bf16.gmra.mxu1 %vm418_vm0, %v303_v59  ;;  %v2602_v58 = vld [vmem:[%s3726_s1 + $0x194] ss:$8 sps:$4 sm:$0xff]   ;;  %v771_v59 = vpack.c.bf16 %v758_v54, %v757_v53 }
  0x36   : > { %505 = vmatprep.mubr.bf16.mxu0 %v2642_v2  ;;  %702 = vmatprep.mubr.bf16.mxu1 %v2642_v2  ;;  %v1300_v53 = vld [vmem:[%s2759_s29 + $0x7c] sm:$0xf] }
  0x37   : > { %887 = vmatpush1.bf16.msra.mxu0 %v2576_v60  ;;  %1153 = vmatpush1.bf16.msra.mxu1 %v2579_v62  ;;  %v1037_v60 = vpack.c.bf16 %v1024_v56, %v1023_v55  ;;  %v2605_v62 = vld [vmem:[%s3726_s1 + $0x184] ss:$8 sps:$4 sm:$0xff]  }
  0x38   : > { %888 = vmatprep.subr.bf16.mxu0 %v2584_v63  ;;  %1154 = vmatprep.subr.bf16.mxu1 %v2587_v1  ;;  %v759_v63 = vld [vmem:[%s2759_s29 + $0x32] sm:$0xff] }
  0x39   : > { %v1025_v1 = vld [vmem:[%s2759_s29 + $0x33] sm:$0xff]  ;;  %v772_v5 = vpack.c.bf16 %v760_v0, %v759_v63 }
  0x3b   : > { %889 = vmatpush1.bf16.msra.mxu0 %v2582_v6  ;;  %1155 = vmatpush1.bf16.msra.mxu1 %v2585_v7  ;;  %v1038_v6 = vpack.c.bf16 %v1026_v3, %v1025_v1  ;;  %v761_v7 = vld [vmem:[%s2759_s29 + $0x42] sm:$0xff] }
  0x3c   : > { %1410 = vmatprep.subr.bf16.mxu0 %v2590_v10  ;;  %v1028_v10 = vld [vmem:[%s2759_s29 + $0x4b] sm:$0xff] }
  0x3d   : > { %2341 = vmatmul.mubr.msk.bf16.gmra.mxu0 %vm418_vm0, %v340_v8  ;;  %2361 = vmatmul.mubr.msk.bf16.gmra.mxu1 %vm418_vm0, %v304_v9  ;;  %v762_v8 = vld [vmem:[%s2759_s29 + $0x4a] sm:$0xff] }
  0x3e   : > { %515 = vmatprep.mubr.bf16.mxu0 %v2642_v2  ;;  %712 = vmatprep.mubr.bf16.mxu1 %v2642_v2  ;;  %v1027_v9 = vld [vmem:[%s2759_s29 + $0x43] sm:$0xff]  ;;  %v773_v11 = vpack.c.bf16 %v762_v8, %v761_v7 }
  0x3f   : > { %v1039_v12 = vpack.c.bf16 %v1028_v10, %v1027_v9 }
  0x45   : > { %2342 = vmatmul.mubr.msk.bf16.gmra.mxu0 %vm418_vm0, %v341_v15  ;;  %2362 = vmatmul.mubr.msk.bf16.gmra.mxu1 %vm418_vm0, %v305_v16  ;;  %v1029_v15 = vld [vmem:[%s2759_s29 + $0x53] sm:$0xff]  ;;  %v1030_v16 = vld [vmem:[%s2759_s29 + $0x5b] sm:$0xff] }
  0x46   : > { %525 = vmatprep.mubr.bf16.mxu0 %v2642_v2  ;;  %722 = vmatprep.mubr.bf16.mxu1 %v2642_v2  ;;  %v1040_v18 = vpack.c.bf16 %v1030_v16, %v1029_v15 }
  0x4d   : > { %2343 = vmatmul.mubr.msk.bf16.gmra.mxu0 %vm418_vm0, %v342_v21  ;;  %2363 = vmatmul.mubr.msk.bf16.gmra.mxu1 %vm418_vm0, %v306_v22  ;;  %v1031_v21 = vld [vmem:[%s2759_s29 + $0x63] sm:$0xff]  ;;  %v1032_v22 = vld [vmem:[%s2759_s29 + $0x6b] sm:$0xff] }
  0x4e   : > { %535 = vmatprep.mubr.bf16.mxu0 %v2642_v2  ;;  %732 = vmatprep.mubr.bf16.mxu1 %v2642_v2  ;;  %v1041_v24 = vpack.c.bf16 %v1032_v22, %v1031_v21 }
  0x55   : > { %2344 = vmatmul.mubr.msk.bf16.gmra.mxu0 %vm418_vm0, %v343_v27  ;;  %2364 = vmatmul.mubr.msk.bf16.gmra.mxu1 %vm418_vm0, %v307_v28  ;;  %v1033_v27 = vld [vmem:[%s2759_s29 + $0x73] sm:$0xff]  ;;  %v1034_v28 = vld [vmem:[%s2759_s29 + $0x7b] sm:$0xf] }
  0x56   : > { %545 = vmatprep.mubr.bf16.mxu0 %v2642_v2  ;;  %742 = vmatprep.mubr.bf16.mxu1 %v2642_v2  ;;  %v1042_v30 = vpack.c.bf16 %v1034_v28, %v1033_v27 }
  0x5d   : > { %2345 = vmatmul.mubr.msk.bf16.gmra.mxu0 %vm418_vm0, %v344_v33  ;;  %2365 = vmatmul.mubr.msk.bf16.gmra.mxu1 %vm418_vm0, %v308_v34  ;;  %v1301_v33 = vpack.c.bf16 %v1286_v32, %v1285_v31  ;;  %v1287_v34 = vld [vmem:[%s2759_s29 + $0x14] sm:$0xff] }
  0x5e   : > { %906 = vmatprep.mubr.bf16.mxu0 %v2642_v2  ;;  %1172 = vmatprep.mubr.bf16.mxu1 %v2642_v2  ;;  %v1302_v36 = vpack.c.bf16 %v1288_v35, %v1287_v34 }
  0x65   : > { %2390 = vmatmul.mubr.msk.bf16.vlgmr.msra.gmra.mxu0 %vm418_vm0, %v769_v39  ;;  %2422 = vmatmul.mubr.msk.bf16.vlgmr.msra.gmra.mxu1 %vm418_vm0, %v1035_v40  ;;  %v1303_v39 = vpack.c.bf16 %v1290_v38, %v1289_v37  ;;  %v1291_v40 = vld [vmem:[%s2759_s29 + $0x34] sm:$0xff] }
  0x66   : > { %916 = vmatprep.mubr.bf16.mxu0 %v2642_v2  ;;  %1182 = vmatprep.mubr.bf16.mxu1 %v2642_v2 }
  0x67   : > { %1411 = vmatpush1.bf16.msra.mxu0 %v2588_v41  ;;  %v1292_v41 = vld [vmem:[%s2759_s29 + $0x3c] sm:$0xff] }
  0x68   : > { %1412 = vmatprep.subr.bf16.mxu0 %v2593_v42  ;;  %v1304_v42 = vpack.c.bf16 %v1292_v41, %v1291_v40 }
  0x6b   : > { %1413 = vmatpush1.bf16.msra.mxu0 %v2591_v47  ;;  %v1296_v47 = vld [vmem:[%s2759_s29 + $0x5c] sm:$0xff] }
  0x6c   : > { %1414 = vmatprep.subr.bf16.mxu0 %v2596_v48  ;;  %v1306_v48 = vpack.c.bf16 %v1296_v47, %v1295_v46 }
  0x6d   : > { %2391 = vmatmul.mubr.msk.bf16.gmra.mxu0 %vm418_vm0, %v770_v49  ;;  %2423 = vmatmul.mubr.msk.bf16.gmra.mxu1 %vm418_vm0, %v1036_v50  ;;  %v1297_v49 = vld [vmem:[%s2759_s29 + $0x64] sm:$0xff]  ;;  %v1298_v50 = vld [vmem:[%s2759_s29 + $0x6c] sm:$0xff] }
  0x6e   : > { %926 = vmatprep.mubr.bf16.mxu0 %v2642_v2  ;;  %1192 = vmatprep.mubr.bf16.mxu1 %v2642_v2 }
  0x6f   : > { %1415 = vmatpush1.bf16.msra.mxu0 %v2594_v51  ;;  %v1307_v51 = vpack.c.bf16 %v1298_v50, %v1297_v49 }
  0x70   : > { %1416 = vmatprep.subr.bf16.mxu0 %v2599_v52  ;;  %v1299_v52 = vld [vmem:[%s2759_s29 + $0x74] sm:$0xff] }
  0x71   : > { %v1308_v54 = vpack.c.bf16 %v1300_v53, %v1299_v52 }
  0x73   : > { %1417 = vmatpush1.bf16.msra.mxu0 %v2597_v57 }
  0x74   : > { %1418 = vmatprep.subr.bf16.mxu0 %v2602_v58 }
  0x75   : > { %2392 = vmatmul.mubr.msk.bf16.gmra.mxu0 %vm418_vm0, %v771_v59  ;;  %2424 = vmatmul.mubr.msk.bf16.gmra.mxu1 %vm418_vm0, %v1037_v60 }
  0x76   : > { %936 = vmatprep.mubr.bf16.mxu0 %v2642_v2  ;;  %1202 = vmatprep.mubr.bf16.mxu1 %v2642_v2 }
  0x77   : > { %1419 = vmatpush1.bf16.msra.mxu0 %v2600_v61 }
  0x78   : > { %1420 = vmatprep.subr.bf16.mxu0 %v2605_v62 }
  0x7b   : > { %1421 = vmatpush1.bf16.msra.mxu0 %v2603_v4 }
  0x7d   : > { %2393 = vmatmul.mubr.msk.bf16.gmra.mxu0 %vm418_vm0, %v772_v5  ;;  %2425 = vmatmul.mubr.msk.bf16.gmra.mxu1 %vm418_vm0, %v1038_v6 }
  0x7e   : > { %946 = vmatprep.mubr.bf16.mxu0 %v2642_v2  ;;  %1212 = vmatprep.mubr.bf16.mxu1 %v2642_v2 }
  0x85   : > { %2394 = vmatmul.mubr.msk.bf16.gmra.mxu0 %vm418_vm0, %v773_v11  ;;  %2426 = vmatmul.mubr.msk.bf16.gmra.mxu1 %vm418_vm0, %v1039_v12 }
  0x86   : > { %956 = vmatprep.mubr.bf16.mxu0 %v2642_v2  ;;  %1222 = vmatprep.mubr.bf16.mxu1 %v2642_v2 }
  0x8d   : > { %2395 = vmatmul.mubr.msk.bf16.gmra.mxu0 %vm418_vm0, %v774_v17  ;;  %2427 = vmatmul.mubr.msk.bf16.gmra.mxu1 %vm418_vm0, %v1040_v18 }
  0x8e   : > { %966 = vmatprep.mubr.bf16.mxu0 %v2642_v2  ;;  %1232 = vmatprep.mubr.bf16.mxu1 %v2642_v2 }
  0x95   : > { %2396 = vmatmul.mubr.msk.bf16.gmra.mxu0 %vm418_vm0, %v775_v23  ;;  %2428 = vmatmul.mubr.msk.bf16.gmra.mxu1 %vm418_vm0, %v1041_v24 }
  0x96   : > { %976 = vmatprep.mubr.bf16.mxu0 %v2642_v2  ;;  %1242 = vmatprep.mubr.bf16.mxu1 %v2642_v2 }
  0x9d   : > { %2397 = vmatmul.mubr.msk.bf16.gmra.mxu0 %vm418_vm0, %v776_v29  ;;  %2429 = vmatmul.mubr.msk.bf16.gmra.mxu1 %vm418_vm0, %v1042_v30 }
  0x9e   : > { %1438 = vmatprep.mubr.bf16.mxu0 %v2642_v2 }
  0xa5   : > { %2454 = vmatmul.mubr.msk.bf16.vlgmr.msra.gmra.mxu0 %vm418_vm0, %v1301_v33 }
  0xa6   : > { %1448 = vmatprep.mubr.bf16.mxu0 %v2642_v2 }
  0xad   : > { %2455 = vmatmul.mubr.msk.bf16.gmra.mxu0 %vm418_vm0, %v1302_v36 }
  0xae   : > { %1458 = vmatprep.mubr.bf16.mxu0 %v2642_v2 }
  0xb5   : > { %2456 = vmatmul.mubr.msk.bf16.gmra.mxu0 %vm418_vm0, %v1303_v39 }
  0xb6   : > { %1468 = vmatprep.mubr.bf16.mxu0 %v2642_v2 }
  0xbd   : > { %2457 = vmatmul.mubr.msk.bf16.gmra.mxu0 %vm418_vm0, %v1304_v42 }
  0xbe   : > { %1478 = vmatprep.mubr.bf16.mxu0 %v2642_v2 }
  0xc5   : > { %2458 = vmatmul.mubr.msk.bf16.gmra.mxu0 %vm418_vm0, %v1305_v45 }
  0xc6   : > { %1488 = vmatprep.mubr.bf16.mxu0 %v2642_v2 }
  0xcd   : > { %2459 = vmatmul.mubr.msk.bf16.gmra.mxu0 %vm418_vm0, %v1306_v48 }
  0xce   : > { %1498 = vmatprep.mubr.bf16.mxu0 %v2642_v2 }
  0xd5   : > { %2460 = vmatmul.mubr.msk.bf16.gmra.mxu0 %vm418_vm0, %v1307_v51 }
  0xd6   : > { %1508 = vmatprep.mubr.bf16.mxu0 %v2642_v2 }
  0xdd   : > { %2461 = vmatmul.mubr.msk.bf16.gmra.mxu0 %vm418_vm0, %v1308_v54 }
  0xe5   : > { %v477_v55 = vpop.f32.mrf.mxu0  ;;  %v674_v56 = vpop.f32.mrf.mxu1 }
  0xe6   : > { %v3039_v57 = vadd.f32 %v674_v56, %v477_v55 }
  0xe7   : > { %v479_v58 = vpop.f32.mrf.mxu0  ;;  %v676_v59 = vpop.f32.mrf.mxu1 }
  0xe8   : > { %v3041_v60 = vadd.f32 %v676_v59, %v479_v58 }
  0xe9   : > { %v481_v61 = vpop.f32.mrf.mxu0  ;;  %v678_v62 = vpop.f32.mrf.mxu1 }
  0xea   : > { %v3043_v63 = vadd.f32 %v678_v62, %v481_v61 }
  0xeb   : > { %v483_v0 = vpop.f32.mrf.mxu0  ;;  %v680_v1 = vpop.f32.mrf.mxu1 }
  0xec   : > { %v3045_v2 = vadd.f32 %v680_v1, %v483_v0 }
  0xed   : > { %v487_v3 = vpop.f32.mrf.mxu0  ;;  %v684_v4 = vpop.f32.mrf.mxu1 }
  0xee   : > { %v3047_v5 = vadd.f32 %v684_v4, %v487_v3 }
  0xef   : > { %v489_v6 = vpop.f32.mrf.mxu0  ;;  %v686_v7 = vpop.f32.mrf.mxu1 }
  0xf0   : > { %v3049_v8 = vadd.f32 %v686_v7, %v489_v6 }
  0xf1   : > { %v491_v9 = vpop.f32.mrf.mxu0  ;;  %v688_v10 = vpop.f32.mrf.mxu1 }
  0xf2   : > { %v3051_v11 = vadd.f32 %v688_v10, %v491_v9 }
  0xf3   : > { %v493_v12 = vpop.f32.mrf.mxu0  ;;  %v690_v13 = vpop.f32.mrf.mxu1 }
  0xf4   : > { %v3053_v14 = vadd.f32 %v690_v13, %v493_v12 }
  0xf5   : > { %v497_v15 = vpop.f32.mrf.mxu0  ;;  %v694_v16 = vpop.f32.mrf.mxu1 }
  0xf6   : > { %v3055_v17 = vadd.f32 %v694_v16, %v497_v15 }
  0xf7   : > { %v499_v18 = vpop.f32.mrf.mxu0  ;;  %v696_v19 = vpop.f32.mrf.mxu1 }
  0xf8   : > { %v3057_v20 = vadd.f32 %v696_v19, %v499_v18 }
  0xf9   : > { %v501_v21 = vpop.f32.mrf.mxu0  ;;  %v698_v22 = vpop.f32.mrf.mxu1 }
  0xfa   : > { %v3059_v23 = vadd.f32 %v698_v22, %v501_v21 }
  0xfb   : > { %v503_v24 = vpop.f32.mrf.mxu0  ;;  %v700_v25 = vpop.f32.mrf.mxu1 }
  0xfc   : > { %v3061_v26 = vadd.f32 %v700_v25, %v503_v24 }
  0xfd   : > { %v507_v27 = vpop.f32.mrf.mxu0  ;;  %v704_v28 = vpop.f32.mrf.mxu1 }
  0xfe   : > { %v3063_v29 = vadd.f32 %v704_v28, %v507_v27 }
  0xff   : > { %v509_v30 = vpop.f32.mrf.mxu0  ;;  %v706_v31 = vpop.f32.mrf.mxu1 }
 0x100   : > { %v3065_v32 = vadd.f32 %v706_v31, %v509_v30 }
 0x101   : > { %v511_v33 = vpop.f32.mrf.mxu0  ;;  %v708_v34 = vpop.f32.mrf.mxu1 }
 0x102   : > { %v3067_v35 = vadd.f32 %v708_v34, %v511_v33 }
 0x103   : > { %v513_v36 = vpop.f32.mrf.mxu0  ;;  %v710_v37 = vpop.f32.mrf.mxu1 }
 0x104   : > { %v3069_v38 = vadd.f32 %v710_v37, %v513_v36 }
 0x105   : > { %v517_v39 = vpop.f32.mrf.mxu0  ;;  %v714_v40 = vpop.f32.mrf.mxu1 }
 0x106   : > { %v3071_v41 = vadd.f32 %v714_v40, %v517_v39 }
 0x107   : > { %v519_v42 = vpop.f32.mrf.mxu0  ;;  %v716_v43 = vpop.f32.mrf.mxu1 }
 0x108   : > { %v3073_v44 = vadd.f32 %v716_v43, %v519_v42 }
 0x109   : > { %v521_v45 = vpop.f32.mrf.mxu0  ;;  %v718_v46 = vpop.f32.mrf.mxu1 }
 0x10a   : > { %v3075_v47 = vadd.f32 %v718_v46, %v521_v45 }
 0x10b   : > { %v523_v48 = vpop.f32.mrf.mxu0  ;;  %v720_v49 = vpop.f32.mrf.mxu1 }
 0x10c   : > { %v3077_v50 = vadd.f32 %v720_v49, %v523_v48 }
 0x10d   : > { %v527_v51 = vpop.f32.mrf.mxu0  ;;  %v724_v52 = vpop.f32.mrf.mxu1 }
 0x10e   : > { %v3079_v53 = vadd.f32 %v724_v52, %v527_v51 }
 0x10f   : > { %v529_v54 = vpop.f32.mrf.mxu0  ;;  %v726_v55 = vpop.f32.mrf.mxu1 }
 0x110   : > { %v3081_v56 = vadd.f32 %v726_v55, %v529_v54 }
 0x111   : > { %v531_v58 = vpop.f32.mrf.mxu0  ;;  %v728_v59 = vpop.f32.mrf.mxu1 }
 0x112   : > { %v3083_v61 = vadd.f32 %v728_v59, %v531_v58 }
 0x113   : > { %v533_v62 = vpop.f32.mrf.mxu0  ;;  %v730_v0 = vpop.f32.mrf.mxu1 }
 0x114   : > { %v3085_v1 = vadd.f32 %v730_v0, %v533_v62 }
 0x115   : > { %v537_v3 = vpop.f32.mrf.mxu0  ;;  %v734_v4 = vpop.f32.mrf.mxu1 }
 0x116   : > { %v3087_v6 = vadd.f32 %v734_v4, %v537_v3 }
 0x117   : > { %v539_v7 = vpop.f32.mrf.mxu0  ;;  %v736_v9 = vpop.f32.mrf.mxu1 }
 0x118   : > { %v3089_v10 = vadd.f32 %v736_v9, %v539_v7 }
 0x119   : > { %v541_v12 = vpop.f32.mrf.mxu0  ;;  %v738_v13 = vpop.f32.mrf.mxu1 }
 0x11a   : > { %v3091_v15 = vadd.f32 %v738_v13, %v541_v12 }
 0x11b   : > { %v543_v16 = vpop.f32.mrf.mxu0  ;;  %v740_v18 = vpop.f32.mrf.mxu1 }
 0x11c   : > { %v3093_v19 = vadd.f32 %v740_v18, %v543_v16 }
 0x11d   : > { %v547_v21 = vpop.f32.mrf.mxu0  ;;  %v744_v22 = vpop.f32.mrf.mxu1 }
 0x11e   : > { %v3095_v24 = vadd.f32 %v744_v22, %v547_v21 }
 0x11f   : > { %v549_v25 = vpop.f32.mrf.mxu0  ;;  %v746_v27 = vpop.f32.mrf.mxu1 }
 0x120   : > { %v3097_v28 = vadd.f32 %v746_v27, %v549_v25 }
 0x121   : > { %v3099_v30 = vpop.f32.mrf.mxu0  ;;  %v3101_v31 = vpop.f32.mrf.mxu1 }
 0x123   : > { %v3103_v33 = vpop.f32.mrf.mxu0  ;;  %v3105_v34 = vpop.f32.mrf.mxu1 }
 0x125   : > { %v908_v36 = vpop.f32.mrf.mxu0  ;;  %v1174_v37 = vpop.f32.mrf.mxu1 }
 0x126   : > { %v987_v39 = vadd.f32 %v908_v36, %v3039_v57 }
 0x127   : > { %v910_v40 = vpop.f32.mrf.mxu0  ;;  %v1176_v42 = vpop.f32.mrf.mxu1 }
 0x128   : > { %v988_v43 = vadd.f32 %v910_v40, %v3041_v60  ;;  %v3109_v45 = vadd.f32 %v1174_v37, %v987_v39 }
 0x129   : > { %v912_v46 = vpop.f32.mrf.mxu0  ;;  %v1178_v48 = vpop.f32.mrf.mxu1 }
 0x12a   : > { %v989_v49 = vadd.f32 %v912_v46, %v3043_v63  ;;  %v3112_v51 = vadd.f32 %v1176_v42, %v988_v43 }
 0x12b   : > { %v914_v52 = vpop.f32.mrf.mxu0  ;;  %v1180_v54 = vpop.f32.mrf.mxu1 }
 0x12c   : > { %v990_v55 = vadd.f32 %v914_v52, %v3045_v2  ;;  %v3115_v58 = vadd.f32 %v1178_v48, %v989_v49 }
 0x12d   : > { %v918_v59 = vpop.f32.mrf.mxu0  ;;  %v1184_v57 = vpop.f32.mrf.mxu1 }
 0x12e   : > { %v991_v62 = vadd.f32 %v918_v59, %v3047_v5  ;;  %v3118_v0 = vadd.f32 %v1180_v54, %v990_v55  ;;  %v3743_v59 = vmov 0.0  }
 0x12f   : > { %v920_v60 = vpop.f32.mrf.mxu0  ;;  %v1186_v3 = vpop.f32.mrf.mxu1  ;;  %1651 = vmatprep.mubr.f32.mxu1 %v3743_v59  ;;  %1886 = vmatprep.subr.mxu0 %v3743_v59 }
 0x130   : > { %v992_v4 = vadd.f32 %v920_v60, %v3049_v8  ;;  %v3121_v7 = vadd.f32 %v1184_v57, %v991_v62 }
 0x131   : > { %v922_v63 = vpop.f32.mrf.mxu0  ;;  %v1188_v9 = vpop.f32.mrf.mxu1 }
 0x132   : > { %v993_v12 = vadd.f32 %v922_v63, %v3051_v11  ;;  %v3124_v13 = vadd.f32 %v1186_v3, %v992_v4 }
 0x133   : > { %v924_v2 = vpop.f32.mrf.mxu0  ;;  %v1190_v16 = vpop.f32.mrf.mxu1 }
 0x134   : > { %v994_v18 = vadd.f32 %v924_v2, %v3053_v14  ;;  %v3127_v21 = vadd.f32 %v1188_v9, %v993_v12 }
 0x135   : > { %v928_v5 = vpop.f32.mrf.mxu0  ;;  %v1194_v22 = vpop.f32.mrf.mxu1 }
 0x136   : > { %v995_v25 = vadd.f32 %v928_v5, %v3055_v17  ;;  %v3130_v27 = vadd.f32 %v1190_v16, %v994_v18 }
 0x137   : > { %v930_v8 = vpop.f32.mrf.mxu0  ;;  %v1196_v36 = vpop.f32.mrf.mxu1 }
 0x138   : > { %v996_v37 = vadd.f32 %v930_v8, %v3057_v20  ;;  %v3133_v39 = vadd.f32 %v1194_v22, %v995_v25 }
 0x139   : > { %v932_v11 = vpop.f32.mrf.mxu0  ;;  %v3166_v62 = vpop.f32.mrf.mxu1 }
 0x13a   : > { %v3136_v40 = vadd.f32 %v932_v11, %v3059_v23  ;;  %v3138_v42 = vadd.f32 %v1196_v36, %v996_v37  ;;  %3749 = vst [vmem:[#allocation6_spill] sm:$0xff] %v3166_v62 }
 0x13b   : > { %v934_v14 = vpop.f32.mrf.mxu0 }
 0x13c   : > { %3745 = vst [vmem:[#allocation2_spill] sm:$0xff] %v3136_v40  ;;  %v3141_v43 = vadd.f32 %v934_v14, %v3061_v26 }
 0x13d   : > { %v938_v46 = vpop.f32.mrf.mxu0 }
 0x13e   : > { %3746 = vst [vmem:[#allocation3_spill] sm:$0xff] %v3141_v43  ;;  %v3144_v17 = vadd.f32 %v938_v46, %v3063_v29 }
 0x13f   : > { %v940_v48 = vpop.f32.mrf.mxu0 }
 0x140   : > { %3747 = vst [vmem:[#allocation4_spill] sm:$0xff] %v3144_v17  ;;  %v3147_v49 = vadd.f32 %v940_v48, %v3065_v32 }
 0x141   : > { %v942_v20 = vpop.f32.mrf.mxu0 }
 0x142   : > { %3748 = vst [vmem:[#allocation5_spill] sm:$0xff] %v3147_v49  ;;  %v3150_v52 = vadd.f32 %v942_v20, %v3067_v35 }
 0x143   : > { %v944_v23 = vpop.f32.mrf.mxu0 }
 0x144   : > { %v3153_v54 = vadd.f32 %v944_v23, %v3069_v38 }
 0x145   : > { %v948_v55 = vpop.f32.mrf.mxu0 }
 0x146   : > { %v3158_v26 = vadd.f32 %v948_v55, %v3071_v41  ;;  %v3174_v41 = vpop.f32.mrf.mxu1 }
 0x147   : > { %v950_v29 = vpop.f32.mrf.mxu0  ;;  %3750 = vst [vmem:[#allocation7_spill] sm:$0xff] %v3174_v41 }
 0x148   : > { %v3161_v32 = vadd.f32 %v950_v29, %v3073_v44  ;;  %v3182_v12 = vpop.f32.mrf.mxu1 }
 0x149   : > { %v952_v57 = vpop.f32.mrf.mxu0  ;;  %3751 = vst [vmem:[#allocation8_spill] sm:$0xff] %v3182_v12 }
 0x14a   : > { %v3164_v35 = vadd.f32 %v952_v57, %v3075_v47  ;;  %v3190_v18 = vpop.f32.mrf.mxu1 }
 0x14b   : > { %v954_v38 = vpop.f32.mrf.mxu0  ;;  %3752 = vst [vmem:[#allocation9_spill] sm:$0xff] %v3190_v18 }
 0x14c   : > { %v3169_v60 = vadd.f32 %v954_v38, %v3077_v50  ;;  %v3198_v25 = vpop.f32.mrf.mxu1 }
 0x14d   : > { %v958_v3 = vpop.f32.mrf.mxu0 }
 0x14e   : > { %v3172_v4 = vadd.f32 %v958_v3, %v3079_v53  ;;  %v3206_v37 = vpop.f32.mrf.mxu1 }
 0x14f   : > { %v960_v63 = vpop.f32.mrf.mxu0 }
 0x150   : > { %v3177_v44 = vadd.f32 %v960_v63, %v3081_v56 }
 0x151   : > { %v962_v9 = vpop.f32.mrf.mxu0 }
 0x152   : > { %v3180_v47 = vadd.f32 %v962_v9, %v3083_v61 }
 0x153   : > { %v964_v2 = vpop.f32.mrf.mxu0 }
 0x154   : > { %v3185_v50 = vadd.f32 %v964_v2, %v3085_v1 }
 0x155   : > { %v968_v16 = vpop.f32.mrf.mxu0 }
 0x156   : > { %v3188_v53 = vadd.f32 %v968_v16, %v3087_v6 }
 0x157   : > { %v970_v5 = vpop.f32.mrf.mxu0 }
 0x158   : > { %v3193_v56 = vadd.f32 %v970_v5, %v3089_v10 }
 0x159   : > { %v972_v22 = vpop.f32.mrf.mxu0 }
 0x15a   : > { %v3196_v61 = vadd.f32 %v972_v22, %v3091_v15  ;;  %v3213_v15 = vpop.f32.mrf.mxu1 }
 0x15b   : > { %v974_v8 = vpop.f32.mrf.mxu0 }
 0x15c   : > { %v3201_v1 = vadd.f32 %v974_v8, %v3093_v19  ;;  %v3220_v20 = vpop.f32.mrf.mxu1 }
 0x15d   : > { %v978_v36 = vpop.f32.mrf.mxu0 }
 0x15e   : > { %v3204_v6 = vadd.f32 %v978_v36, %v3095_v24  ;;  %v3228_v29 = vpop.f32.mrf.mxu1 }
 0x15f   : > { %v980_v11 = vpop.f32.mrf.mxu0 }
 0x160   : > { %v3209_v10 = vadd.f32 %v980_v11, %v3097_v28  ;;  %v3236_v63 = vpop.f32.mrf.mxu1 }
 0x161   : > { %v3211_v14 = vpop.f32.mrf.mxu0 }
 0x162   : > { %v3244_v16 = vpop.f32.mrf.mxu1 }
 0x163   : > { %v3215_v46 = vpop.f32.mrf.mxu0 }
 0x164   : > { %v3252_v8 = vpop.f32.mrf.mxu1 }
 0x165   : > { %v1440_v48 = vpop.f32.mrf.mxu0 }
 0x166   : > { %v3218_v19 = vadd.f32 %v1440_v48, %v3109_v45 }
 0x167   : > { %v1442_v24 = vpop.f32.mrf.mxu0 }
 0x168   : > { %3753 = vst [vmem:[#allocation10_spill] sm:$0xff] %v3218_v19  ;;  %v3223_v23 = vadd.f32 %v1442_v24, %v3112_v51 }
 0x169   : > { %v1444_v55 = vpop.f32.mrf.mxu0 }
 0x16a   : > { %3754 = vst [vmem:[#allocation11_spill] sm:$0xff] %v3223_v23  ;;  %v3226_v28 = vadd.f32 %v1444_v55, %v3115_v58 }
 0x16b   : > { %v1446_v57 = vpop.f32.mrf.mxu0 }
 0x16c   : > { %3755 = vst [vmem:[#allocation12_spill] sm:$0xff] %v3226_v28  ;;  %v3231_v38 = vadd.f32 %v1446_v57, %v3118_v0 }
 0x16d   : > { %v1450_v3 = vpop.f32.mrf.mxu0 }
 0x16e   : > { %3756 = vst [vmem:[#allocation13_spill] sm:$0xff] %v3231_v38  ;;  %v3234_v45 = vadd.f32 %v1450_v3, %v3121_v7 }
 0x16f   : > { %v1452_v9 = vpop.f32.mrf.mxu0 }
 0x170   : > { %3757 = vst [vmem:[#allocation14_spill] sm:$0xff] %v3234_v45  ;;  %v3239_v51 = vadd.f32 %v1452_v9, %v3124_v13  ;;  %v1855_v9 = vld [vmem:[%s3729_s4 + $0x60] sm:$0xff] }
 0x171   : > { %v1454_v2 = vpop.f32.mrf.mxu0 }
 0x172   : > { %3758 = vst [vmem:[#allocation15_spill] sm:$0xff] %v3239_v51  ;;  %v3242_v58 = vadd.f32 %v1454_v2, %v3127_v21  ;;  %v3259_v21 = vpop.f32.mrf.mxu1 }
 0x173   : > { %v1456_v5 = vpop.f32.mrf.mxu0 }
 0x174   : > { %3759 = vst [vmem:[#allocation16_spill] sm:$0xff] %v3242_v58  ;;  %v3247_v0 = vadd.f32 %v1456_v5, %v3130_v27  ;;  %v1858_v27 = vld [vmem:[%s3729_s4 + $0x78] sm:$0xff]  ;;  %v1230_v55 = vpop.f32.mrf.mxu1 }
 0x175   : > { %v1460_v22 = vpop.f32.mrf.mxu0  ;;  %1887 = vmatpush1.msra.mxu0 %v1858_v27 }
 0x176   : > { %3760 = vst [vmem:[#allocation17_spill] sm:$0xff] %v3247_v0  ;;  %v3250_v7 = vadd.f32 %v1460_v22, %v3133_v39  ;;  %v1857_v39 = vld [vmem:[%s3729_s4 + $0x70] sm:$0xff]  ;;  %1888 = vmatprep.subr.mxu0 %v3743_v59  ;;  %v1234_v2 = vpop.f32.mrf.mxu1 }
 0x177   : > { %v1462_v36 = vpop.f32.mrf.mxu0  ;;  %1889 = vmatpush1.msra.mxu0 %v1857_v39 }
 0x178   : > { %3761 = vst [vmem:[#allocation18_spill] sm:$0xff] %v3250_v7  ;;  %v3255_v13 = vadd.f32 %v1462_v36, %v3138_v42  ;;  %v1856_v42 = vld [vmem:[%s3729_s4 + $0x68] sm:$0xff]  ;;  %1890 = vmatprep.subr.mxu0 %v3743_v59  ;;  %v1236_v36 = vpop.f32.mrf.mxu1 }
 0x179   : > { %v3257_v11 = vpop.f32.mrf.mxu0  ;;  %1891 = vmatpush1.msra.mxu0 %v1856_v42 }
 0x17a   : > { %3762 = vst [vmem:[#allocation19_spill] sm:$0xff] %v3255_v13  ;;  %3763 = vst [vmem:[#allocation20_spill] sm:$0xff] %v3257_v11  ;;  %1892 = vmatprep.subr.mxu0 %v3743_v59  ;;  %v1238_v19 = vpop.f32.mrf.mxu1 }
 0x17b   : > { %v3261_v48 = vpop.f32.mrf.mxu0  ;;  %1893 = vmatpush1.msra.mxu0 %v1855_v9 }
 0x17c   : > { %3764 = vst [vmem:[#allocation21_spill] sm:$0xff] %v3261_v48  ;;  %1894 = vmatprep.subr.mxu0 %v3743_v59  ;;  %v1240_v38 = vpop.f32.mrf.mxu1  ;;  %v751_v59 = vadd.f32 %v3105_v34, %v3103_v33 }
 0x17d   : > { %v3263_v24 = vpop.f32.mrf.mxu0 }
 0x17e   : > { %3765 = vst [vmem:[#allocation22_spill] sm:$0xff] %v3263_v24  ;;  %v1244_v58 = vpop.f32.mrf.mxu1  ;;  %v749_v24 = vadd.f32 %v3101_v31, %v3099_v30  ;;  %v1018_v40 = vadd.f32 %v3215_v46, %v751_v59  ;;  %v1280_v30 = vadd.f32 %v1240_v38, %v3201_v1 }
 0x17f   : > { %v3271_v57 = vpop.f32.mrf.mxu0  ;;  %v1281_v33 = vadd.f32 %v1244_v58, %v3204_v6 }
 0x180   : > { %3766 = vst [vmem:[#allocation23_spill] sm:$0xff] %v3271_v57  ;;  %v1246_v7 = vpop.f32.mrf.mxu1  ;;  %v1017_v57 = vadd.f32 %v3211_v14, %v749_v24 }
 0x181   : > { %v3277_v3 = vpop.f32.mrf.mxu0  ;;  %v1282_v18 = vadd.f32 %v1246_v7, %v3209_v10 }
 0x182   : > { %3767 = vst [vmem:[#allocation24_spill] sm:$0xff] %v3277_v3  ;;  %v1248_v9 = vpop.f32.mrf.mxu1 }
 0x183   : > { %v3283_v5 = vpop.f32.mrf.mxu0  ;;  %v1283_v17 = vadd.f32 %v1248_v9, %v1017_v57  ;;  %v1551_v9 = vld [vmem:[%s3727_s2] sm:$0xff] }
 0x184   : > { %3768 = vst [vmem:[#allocation25_spill] sm:$0xff] %v3283_v5  ;;  %v1250_v41 = vpop.f32.mrf.mxu1 }
 0x185   : > { %v3286_v22 = vpop.f32.mrf.mxu0  ;;  %v1284_v12 = vadd.f32 %v1250_v41, %v1018_v40  ;;  %v1279_v40 = vadd.f32 %v1238_v19, %v3196_v61  ;;  %v1278_v41 = vadd.f32 %v1236_v36, %v3193_v56  ;;  %v3787_v36 = vld [vmem:[#allocation15_spill] sm:$0xff] }
 0x187   : > { %v3289_v27 = vpop.f32.mrf.mxu0  ;;  %v3777_v7 = vld [vmem:[#allocation23_spill] sm:$0xff] }
 0x189   : > { %v3291_v39 = vpop.f32.mrf.mxu0  ;;  %v3774_v58 = vld [vmem:[#allocation24_spill] sm:$0xff] }
 0x18b   : > { %v1486_v23 = vpop.f32.mrf.mxu0 }
 0x18d   : > { %v1490_v28 = vpop.f32.mrf.mxu0 }
 0x18f   : > { %v1492_v45 = vpop.f32.mrf.mxu0 }
 0x191   : > { %v1494_v51 = vpop.f32.mrf.mxu0 }
 0x193   : > { %v1496_v42 = vpop.f32.mrf.mxu0 }
 0x195   : > { %v1500_v0 = vpop.f32.mrf.mxu0 }
 0x197   : > { %v1502_v13 = vpop.f32.mrf.mxu0 }
 0x198   : > { %v3324_v61 = vadd.f32 %v1502_v13, %v1278_v41  ;;  %v1552_v41 = vld [vmem:[%s3727_s2 + $0x8] sm:$0xff] }
 0x199   : > { %v1504_v11 = vpop.f32.mrf.mxu0 }
 0x19b   : > { %v1506_v48 = vpop.f32.mrf.mxu0 }
 0x19d   : > { %v1510_v62 = vpop.f32.mrf.mxu0 }
 0x19e   : > { %v3311_v59 = vadd.f32 %v1510_v62, %v1281_v33  ;;  %v1275_v62 = vadd.f32 %v3259_v21, %v3180_v47  ;;  %v1272_v47 = vadd.f32 %v3236_v63, %v3169_v60  ;;  %v1269_v60 = vadd.f32 %v3213_v15, %v3158_v26  ;;  %v3771_v26 = vld [vmem:[#allocation25_spill] sm:$0xff]  ;;  %v3773_v63 = vld [vmem:[#allocation8_spill] sm:$0xff]  ;;  %v3791_v33 = vld [vmem:[#allocation11_spill] sm:$0xff] }
 0x19f   : > { %v1512_v43 = vpop.f32.mrf.mxu0 }
 0x1a0   : > { %v3306_v31 = vadd.f32 %v1512_v43, %v1282_v18  ;;  %v3320_v43 = vadd.f32 %v1504_v11, %v1279_v40  ;;  %v1276_v18 = vadd.f32 %v1230_v55, %v3185_v50  ;;  %v1273_v50 = vadd.f32 %v3244_v16, %v3172_v4  ;;  %v3776_v16 = vld [vmem:[#allocation7_spill] sm:$0xff]  ;;  %v3780_v11 = vld [vmem:[#allocation22_spill] sm:$0xff]  ;;  %v3782_v55 = vld [vmem:[#allocation20_spill] sm:$0xff] }
 0x1a1   : > { %v1514_v3 = vpop.f32.mrf.mxu0  ;;  %v3339_v6 = vadd.f32 %v1494_v51, %v1275_v62  ;;  %v1270_v4 = vadd.f32 %v3220_v20, %v3161_v32  ;;  %v1538_v46 = vadd.f32 %v1486_v23, %v1272_v47  ;;  %v1535_v32 = vadd.f32 %v3286_v22, %v1269_v60  ;;  %v3769_v20 = vld [vmem:[#allocation5_spill] sm:$0xff]  ;;  %v3786_v22 = vld [vmem:[#allocation16_spill] sm:$0xff]  ;;  %v1999_v62 = vld [vmem:[%s3730_s5 + $0x68] sm:$0xff] }
 0x1a2   : > { %v3303_v34 = vadd.f32 %v1514_v3, %v1283_v17  ;;  %v1277_v17 = vadd.f32 %v1234_v2, %v3188_v53  ;;  %v1274_v53 = vadd.f32 %v3252_v8, %v3177_v44  ;;  %v3334_v1 = vadd.f32 %v1496_v42, %v1276_v18  ;;  %v3770_v23 = vld [vmem:[#allocation9_spill] sm:$0xff]  ;;  %v3779_v8 = vld [vmem:[#allocation6_spill] sm:$0xff]  ;;  %v3783_v3 = vld [vmem:[#allocation19_spill] sm:$0xff] }
 0x1a3   : > { %v1516_v5 = vpop.f32.mrf.mxu0  ;;  %v1271_v44 = vadd.f32 %v3228_v29, %v3164_v35  ;;  %v3349_v14 = vadd.f32 %v1490_v28, %v1273_v50  ;;  %v1268_v35 = vadd.f32 %v3206_v37, %v3153_v54  ;;  %v1536_v28 = vadd.f32 %v3289_v27, %v1270_v4  ;;  %v3775_v37 = vld [vmem:[#allocation3_spill] sm:$0xff]  ;;  %v3784_v2 = vld [vmem:[#allocation18_spill] sm:$0xff]  ;;  %v3790_v42 = vld [vmem:[#allocation12_spill] sm:$0xff] }
 0x1a4   : > { %v3300_v49 = vadd.f32 %v1516_v5, %v1284_v12  ;;  %v3316_v12 = vadd.f32 %v1506_v48, %v1280_v30  ;;  %v3329_v56 = vadd.f32 %v1500_v0, %v1277_v17  ;;  %v3344_v10 = vadd.f32 %v1492_v45, %v1274_v53  ;;  %v3772_v45 = vld [vmem:[#allocation4_spill] sm:$0xff]  ;;  %v3781_v48 = vld [vmem:[#allocation21_spill] sm:$0xff]  ;;  %v3788_v27 = vld [vmem:[#allocation14_spill] sm:$0xff] }
 0x1a5   : > { %v1537_v19 = vadd.f32 %v3291_v39, %v1271_v44  ;;  %v1267_v29 = vadd.f32 %v3198_v25, %v3150_v52  ;;  %v1266_v38 = vadd.f32 %v3770_v23, %v3769_v20  ;;  %v1534_v15 = vadd.f32 %v3771_v26, %v1268_v35  ;;  %v3778_v25 = vld [vmem:[#allocation2_spill] sm:$0xff]  ;;  %v3785_v5 = vld [vmem:[#allocation17_spill] sm:$0xff]  ;;  %v2000_v18 = vld [vmem:[%s3730_s5 + $0x70] sm:$0xff] }
 0x1a6   : > { %2462 = vmatprep.subr.msk.mxu1 %vm1580_vm1, %v3300_v49  ;;  %v1265_v51 = vadd.f32 %v3773_v63, %v3772_v45  ;;  %v1264_v0 = vadd.f32 %v3776_v16, %v3775_v37  ;;  %v1263_v13 = vadd.f32 %v3779_v8, %v3778_v25  ;;  %v3789_v39 = vld [vmem:[#allocation13_spill] sm:$0xff]  ;;  %v3792_v30 = vld [vmem:[#allocation10_spill] sm:$0xff]  ;;  %v3793_v40 = vmov 0.0   ;;  %v1696_v53 = vld [vmem:[%s3728_s3 + $0x10] sm:$0xff] }
 0x1a7   : > { %2463 = vmatpush1.msk.msra.mxu1 %vm1580_vm1, %v3303_v34  ;;  %v1533_v54 = vadd.f32 %v3774_v58, %v1267_v29  ;;  %v1532_v52 = vadd.f32 %v3777_v7, %v1266_v38  ;;  %v1694_v17 = vld [vmem:[%s3728_s3] sm:$0xff]  ;;  %v1700_v47 = vld [vmem:[%s3728_s3 + $0x30] sm:$0xff]  ;;  %v1997_v44 = vld [vmem:[%s3730_s5 + $0x58] sm:$0xff] }
 0x1a8   : > { %1589 = vmatprep.subr.mxu1 %v3306_v31  ;;  %v1531_v21 = vadd.f32 %v3780_v11, %v1265_v51  ;;  %v1530_v24 = vadd.f32 %v3781_v48, %v1264_v0  ;;  %v1529_v57 = vadd.f32 %v3782_v55, %v1263_v13  ;;  %v1698_v50 = vld [vmem:[%s3728_s3 + $0x20] sm:$0xff]  ;;  %v1996_v4 = vld [vmem:[%s3730_s5 + $0x50] sm:$0xff]  ;;  %v1995_v60 = vld [vmem:[%s3730_s5 + $0x48] sm:$0xff] }
 0x1a9   : > { %1590 = vmatpush1.msra.mxu1 %v3311_v59  ;;  %v1994_v35 = vld [vmem:[%s3730_s5 + $0x40] sm:$0xff]  ;;  %v1993_v29 = vld [vmem:[%s3730_s5 + $0x38] sm:$0xff]  ;;  %v1992_v20 = vld [vmem:[%s3730_s5 + $0x30] sm:$0xff] }
 0x1aa   : > { %1591 = vmatprep.subr.mxu1 %v3316_v12  ;;  %v1848_v23 = vld [vmem:[%s3729_s4 + $0x28] sm:$0xff]  ;;  %v1847_v26 = vld [vmem:[%s3729_s4 + $0x20] sm:$0xff]  ;;  %v1846_v45 = vld [vmem:[%s3729_s4 + $0x18] sm:$0xff] }
 0x1ab   : > { %1592 = vmatpush1.msra.mxu1 %v3320_v43  ;;  %v1991_v38 = vld [vmem:[%s3730_s5 + $0x28] sm:$0xff]  ;;  %v1989_v63 = vld [vmem:[%s3730_s5 + $0x18] sm:$0xff]  ;;  %v1845_v51 = vld [vmem:[%s3729_s4 + $0x10] sm:$0xff] }
 0x1ac   : > { %1593 = vmatprep.subr.mxu1 %v3324_v61  ;;  %v1988_v58 = vld [vmem:[%s3730_s5 + $0x10] sm:$0xff]  ;;  %v1987_v37 = vld [vmem:[%s3730_s5 + $0x8] sm:$0xff]  ;;  %v1843_v16 = vld [vmem:[%s3729_s4] sm:$0xff] }
 0x1ad   : > { %1594 = vmatpush1.msra.mxu1 %v3329_v56  ;;  %v1986_v0 = vld [vmem:[%s3730_s5] sm:$0xff]  ;;  %v1862_v25 = vld [vmem:[%s3729_s4 + $0x98] sm:$0xff]  ;;  %v1861_v13 = vld [vmem:[%s3729_s4 + $0x90] sm:$0xff] }
 0x1ae   : > { %1595 = vmatprep.subr.mxu1 %v3334_v1  ;;  %v1863_v7 = vld [vmem:[%s3729_s4 + $0xa0] sm:$0xff]  ;;  %v2005_v8 = vld [vmem:[%s3730_s5 + $0x98] sm:$0xff]  ;;  %v2004_v11 = vld [vmem:[%s3730_s5 + $0x90] sm:$0xff] }
 0x1af   : > { %1596 = vmatpush1.msra.mxu1 %v3339_v6  ;;  %v2003_v48 = vld [vmem:[%s3730_s5 + $0x88] sm:$0xff]  ;;  %v2002_v55 = vld [vmem:[%s3730_s5 + $0x80] sm:$0xff] }
 0x1b0   : > { %1597 = vmatprep.subr.mxu1 %v3344_v10 }
 0x1b1   : > { %1598 = vmatpush1.msra.mxu1 %v3349_v14 }
 0x1b2   : > { %1599 = vmatprep.subr.mxu1 %v1538_v46 }
 0x1b3   : > { %1600 = vmatpush1.msra.mxu1 %v1537_v19 }
 0x1b4   : > { %1601 = vmatprep.subr.mxu1 %v1536_v28 }
 0x1b5   : > { %1602 = vmatpush1.msra.mxu1 %v1535_v32 }
 0x1b6   : > { %1603 = vmatprep.subr.mxu1 %v1534_v15 }
 0x1b7   : > { %1604 = vmatpush1.msra.mxu1 %v1533_v54 }
 0x1b8   : > { %1605 = vmatprep.subr.mxu1 %v1532_v52 }
 0x1b9   : > { %1606 = vmatpush1.msra.mxu1 %v1531_v21 }
 0x1ba   : > { %1607 = vmatprep.subr.mxu1 %v1530_v24 }
 0x1bb   : > { %1608 = vmatpush1.msra.mxu1 %v1529_v57 }
 0x1bc   : > { %1609 = vmatprep.subr.mxu1 %v3783_v3 }
 0x1bd   : > { %1610 = vmatpush1.msra.mxu1 %v3784_v2 }
 0x1be   : > { %1611 = vmatprep.subr.mxu1 %v3785_v5 }
 0x1bf   : > { %1612 = vmatpush1.msra.mxu1 %v3786_v22 }
 0x1c0   : > { %1613 = vmatprep.subr.mxu1 %v3787_v36 }
 0x1c1   : > { %1614 = vmatpush1.msra.mxu1 %v3788_v27 }
 0x1c2   : > { %1615 = vmatprep.subr.mxu1 %v3789_v39 }
 0x1c3   : > { %1616 = vmatpush1.msra.mxu1 %v3790_v42 }
 0x1c4   : > { %1617 = vmatprep.subr.mxu1 %v3791_v33 }
 0x1c5   : > { %1618 = vmatpush1.msra.mxu1 %v3792_v30 }
 0x1c6   : > { %2471 = vmatprep.subr.msk.mxu1 %vm1580_vm1, %v3300_v49  ;;  %2464 = vmatmul.mubr.msk.f32.vlgmr.msra.gmra.mxu1 %vm1558_vm2, %v1551_v9  ;;  %v1553_v49 = vld [vmem:[%s3727_s2 + $0x10] sm:$0xff] }
 0x1c7   : > { %2472 = vmatpush1.msk.msra.mxu1 %vm1580_vm1, %v3303_v34  ;;  %1657 = vmatprep.mubr.f32.mxu1 %v3793_v40  ;;  %v1554_v34 = vld [vmem:[%s3727_s2 + $0x18] sm:$0xff] }
 0x1c8   : > { %1724 = vmatprep.subr.mxu1 %v3306_v31  ;;  %v1555_v31 = vld [vmem:[%s3727_s2 + $0x20] sm:$0xff] }
 0x1c9   : > { %1725 = vmatpush1.msra.mxu1 %v3311_v59  ;;  %v1556_v59 = vld [vmem:[%s3727_s2 + $0x28] sm:$0xff] }
 0x1ca   : > { %1726 = vmatprep.subr.mxu1 %v3316_v12  ;;  %2465 = vmatmul.mubr.msk.f32.gmra.mxu1 %vm1558_vm2, %v1552_v41  ;;  %v1557_v12 = vld [vmem:[%s3727_s2 + $0x30] sm:$0xff] }
 0x1cb   : > { %1727 = vmatpush1.msra.mxu1 %v3320_v43  ;;  %1663 = vmatprep.mubr.f32.mxu1 %v3793_v40  ;;  %v2001_v43 = vld [vmem:[%s3730_s5 + $0x78] sm:$0xff] }
 0x1cc   : > { %1728 = vmatprep.subr.mxu1 %v3324_v61  ;;  %v1695_v61 = vld [vmem:[%s3728_s3 + $0x8] sm:$0xff] }
 0x1cd   : > { %1729 = vmatpush1.msra.mxu1 %v3329_v56  ;;  %v1998_v56 = vld [vmem:[%s3730_s5 + $0x60] sm:$0xff] }
 0x1ce   : > { %1730 = vmatprep.subr.mxu1 %v3334_v1  ;;  %2466 = vmatmul.mubr.msk.f32.gmra.mxu1 %vm1558_vm2, %v1553_v49  ;;  %v1697_v1 = vld [vmem:[%s3728_s3 + $0x18] sm:$0xff] }
 0x1cf   : > { %1731 = vmatpush1.msra.mxu1 %v3339_v6  ;;  %1669 = vmatprep.mubr.f32.mxu1 %v3793_v40  ;;  %v1699_v6 = vld [vmem:[%s3728_s3 + $0x28] sm:$0xff] }
 0x1d0   : > { %1732 = vmatprep.subr.mxu1 %v3344_v10  ;;  %v1854_v10 = vld [vmem:[%s3729_s4 + $0x58] sm:$0xff] }
 0x1d1   : > { %1733 = vmatpush1.msra.mxu1 %v3349_v14  ;;  %1895 = vmatpush1.msra.mxu0 %v1854_v10  ;;  %v1853_v14 = vld [vmem:[%s3729_s4 + $0x50] sm:$0xff] }
 0x1d2   : > { %1734 = vmatprep.subr.mxu1 %v1538_v46  ;;  %2467 = vmatmul.mubr.msk.f32.gmra.mxu1 %vm1558_vm2, %v1554_v34  ;;  %v1852_v46 = vld [vmem:[%s3729_s4 + $0x48] sm:$0xff] }
 0x1d3   : > { %1735 = vmatpush1.msra.mxu1 %v1537_v19  ;;  %1675 = vmatprep.mubr.f32.mxu1 %v3793_v40  ;;  %v1851_v19 = vld [vmem:[%s3729_s4 + $0x40] sm:$0xff] }
 0x1d4   : > { %1736 = vmatprep.subr.mxu1 %v1536_v28  ;;  %1896 = vmatprep.subr.mxu0 %v3793_v40  ;;  %v1850_v28 = vld [vmem:[%s3729_s4 + $0x38] sm:$0xff] }
 0x1d5   : > { %1737 = vmatpush1.msra.mxu1 %v1535_v32  ;;  %1897 = vmatpush1.msra.mxu0 %v1853_v14  ;;  %v1849_v32 = vld [vmem:[%s3729_s4 + $0x30] sm:$0xff] }
 0x1d6   : > { %1738 = vmatprep.subr.mxu1 %v1534_v15  ;;  %2468 = vmatmul.mubr.msk.f32.gmra.mxu1 %vm1558_vm2, %v1555_v31  ;;  %v1990_v15 = vld [vmem:[%s3730_s5 + $0x20] sm:$0xff] }
 0x1d7   : > { %1739 = vmatpush1.msra.mxu1 %v1533_v54  ;;  %1681 = vmatprep.mubr.f32.mxu1 %v3793_v40  ;;  %v1844_v54 = vld [vmem:[%s3729_s4 + $0x8] sm:$0xff] }
 0x1d8   : > { %1740 = vmatprep.subr.mxu1 %v1532_v52  ;;  %1898 = vmatprep.subr.mxu0 %v3793_v40  ;;  %v2006_v52 = vld [vmem:[%s3730_s5 + $0xa0] sm:$0xff] }
 0x1d9   : > { %1741 = vmatpush1.msra.mxu1 %v1531_v21  ;;  %1899 = vmatpush1.msra.mxu0 %v1852_v46  ;;  %v1860_v21 = vld [vmem:[%s3729_s4 + $0x88] sm:$0xff] }
 0x1da   : > { %1742 = vmatprep.subr.mxu1 %v1530_v24  ;;  %2469 = vmatmul.mubr.msk.f32.gmra.mxu1 %vm1558_vm2, %v1556_v59  ;;  %v1859_v24 = vld [vmem:[%s3729_s4 + $0x80] sm:$0xff] }
 0x1db   : > { %1743 = vmatpush1.msra.mxu1 %v1529_v57  ;;  %1687 = vmatprep.mubr.f32.mxu1 %v3793_v40 }
 0x1dc   : > { %1744 = vmatprep.subr.mxu1 %v3783_v3  ;;  %1900 = vmatprep.subr.mxu0 %v3793_v40 }
 0x1dd   : > { %1745 = vmatpush1.msra.mxu1 %v3784_v2  ;;  %1901 = vmatpush1.msra.mxu0 %v1851_v19 }
 0x1de   : > { %1746 = vmatprep.subr.mxu1 %v3785_v5  ;;  %2470 = vmatmul.mubr.msk.f32.gmra.mxu1 %vm1558_vm2, %v1557_v12 }
 0x1df   : > { %1747 = vmatpush1.msra.mxu1 %v3786_v22  ;;  %1786 = vmatprep.mubr.f32.mxu1 %v3793_v40 }
 0x1e0   : > { %1748 = vmatprep.subr.mxu1 %v3787_v36  ;;  %1902 = vmatprep.subr.mxu0 %v3793_v40 }
 0x1e1   : > { %1749 = vmatpush1.msra.mxu1 %v3788_v27  ;;  %1903 = vmatpush1.msra.mxu0 %v1850_v28 }
 0x1e2   : > { %1750 = vmatprep.subr.mxu1 %v3789_v39  ;;  %1904 = vmatprep.subr.mxu0 %v3793_v40 }
 0x1e3   : > { %1751 = vmatpush1.msra.mxu1 %v3790_v42  ;;  %1905 = vmatpush1.msra.mxu0 %v1849_v32 }
 0x1e4   : > { %1752 = vmatprep.subr.mxu1 %v3791_v33  ;;  %1906 = vmatprep.subr.mxu0 %v3793_v40 }
 0x1e5   : > { %1753 = vmatpush1.msra.mxu1 %v3792_v30  ;;  %1907 = vmatpush1.msra.mxu0 %v1848_v23 }
 0x1e6   : > { %2473 = vmatmul.mubr.msk.f32.vlgmr.msra.gmra.mxu1 %vm1558_vm2, %v1694_v17  ;;  %2007 = vmatprep.subr.mxu1 %v3793_v40 }
 0x1e7   : > { %1792 = vmatprep.mubr.f32.mxu1 %v3793_v40  ;;  %2008 = vmatpush1.msra.mxu1 %v2001_v43 }
 0x1e8   : > { %2009 = vmatprep.subr.mxu1 %v3793_v40  ;;  %1908 = vmatprep.subr.mxu0 %v3793_v40 }
 0x1e9   : > { %2010 = vmatpush1.msra.mxu1 %v2000_v18  ;;  %1909 = vmatpush1.msra.mxu0 %v1847_v26  ;;  %v3650_v26 = vld [vmem:[%s3731_s6] ss:$0 sm:$0xff] }
 0x1ea   : > { %2474 = vmatmul.mubr.msk.f32.gmra.mxu1 %vm1558_vm2, %v1695_v61  ;;  %2011 = vmatprep.subr.mxu1 %v3793_v40 }
 0x1eb   : > { %1798 = vmatprep.mubr.f32.mxu1 %v3793_v40  ;;  %2012 = vmatpush1.msra.mxu1 %v1999_v62 }
 0x1ec   : > { %2013 = vmatprep.subr.mxu1 %v3793_v40  ;;  %1910 = vmatprep.subr.mxu0 %v3793_v40 }
 0x1ed   : > { %2014 = vmatpush1.msra.mxu1 %v1998_v56  ;;  %1911 = vmatpush1.msra.mxu0 %v1846_v45 }
 0x1ee   : > { %2475 = vmatmul.mubr.msk.f32.gmra.mxu1 %vm1558_vm2, %v1696_v53  ;;  %2015 = vmatprep.subr.mxu1 %v3793_v40 }
 0x1ef   : > { %1804 = vmatprep.mubr.f32.mxu1 %v3793_v40  ;;  %2016 = vmatpush1.msra.mxu1 %v1997_v44 }
 0x1f0   : > { %2017 = vmatprep.subr.mxu1 %v3793_v40  ;;  %1912 = vmatprep.subr.mxu0 %v3793_v40 }
 0x1f1   : > { %2018 = vmatpush1.msra.mxu1 %v1996_v4  ;;  %1913 = vmatpush1.msra.mxu0 %v1845_v51 }
 0x1f2   : > { %2476 = vmatmul.mubr.msk.f32.gmra.mxu1 %vm1558_vm2, %v1697_v1  ;;  %2019 = vmatprep.subr.mxu1 %v3793_v40 }
 0x1f3   : > { %1810 = vmatprep.mubr.f32.mxu1 %v3793_v40  ;;  %2020 = vmatpush1.msra.mxu1 %v1995_v60 }
 0x1f4   : > { %2021 = vmatprep.subr.mxu1 %v3793_v40  ;;  %1914 = vmatprep.subr.mxu0 %v3793_v40 }
 0x1f5   : > { %2022 = vmatpush1.msra.mxu1 %v1994_v35  ;;  %1915 = vmatpush1.msra.mxu0 %v1844_v54 }
 0x1f6   : > { %2477 = vmatmul.mubr.msk.f32.gmra.mxu1 %vm1558_vm2, %v1698_v50  ;;  %2023 = vmatprep.subr.mxu1 %v3793_v40 }
 0x1f7   : > { %1816 = vmatprep.mubr.f32.mxu1 %v3793_v40  ;;  %2024 = vmatpush1.msra.mxu1 %v1993_v29 }
 0x1f8   : > { %2025 = vmatprep.subr.mxu1 %v3793_v40  ;;  %1916 = vmatprep.subr.mxu0 %v3793_v40 }
 0x1f9   : > { %2026 = vmatpush1.msra.mxu1 %v1992_v20  ;;  %1917 = vmatpush1.msra.mxu0 %v1843_v16 }
 0x1fa   : > { %2478 = vmatmul.mubr.msk.f32.gmra.mxu1 %vm1558_vm2, %v1699_v6  ;;  %2027 = vmatprep.subr.mxu1 %v3793_v40 }
 0x1fb   : > { %1822 = vmatprep.mubr.f32.mxu1 %v3793_v40  ;;  %2028 = vmatpush1.msra.mxu1 %v1991_v38 }
 0x1fc   : > { %2029 = vmatprep.subr.mxu1 %v3793_v40  ;;  %1940 = vmatprep.subr.mxu0 %v3793_v40 }
 0x1fd   : > { %2030 = vmatpush1.msra.mxu1 %v1990_v15  ;;  %1941 = vmatpush2.msra.mxu0 %v1863_v7 }
 0x1fe   : > { %2479 = vmatmul.mubr.msk.f32.gmra.mxu1 %vm1558_vm2, %v1700_v47  ;;  %2031 = vmatprep.subr.mxu1 %v3793_v40 }
 0x1ff   : > { %2032 = vmatpush1.msra.mxu1 %v1989_v63  ;;  %1942 = vmatprep.subr.mxu0 %v3793_v40 }
 0x200   : > { %2033 = vmatprep.subr.mxu1 %v3793_v40  ;;  %1943 = vmatpush2.msra.mxu0 %v1862_v25 }
 0x201   : > { %2034 = vmatpush1.msra.mxu1 %v1988_v58  ;;  %1944 = vmatprep.subr.mxu0 %v3793_v40 }
 0x202   : > { %2035 = vmatprep.subr.mxu1 %v3793_v40  ;;  %1945 = vmatpush2.msra.mxu0 %v1861_v13 }
 0x203   : > { %2036 = vmatpush1.msra.mxu1 %v1987_v37  ;;  %1946 = vmatprep.subr.mxu0 %v3793_v40 }
 0x204   : > { %2037 = vmatprep.subr.mxu1 %v3793_v40  ;;  %1947 = vmatpush2.msra.mxu0 %v1860_v21 }
 0x205   : > { %2038 = vmatpush1.msra.mxu1 %v1986_v0  ;;  %1948 = vmatprep.subr.mxu0 %v3793_v40 }
 0x206   : > { %2061 = vmatprep.subr.mxu1 %v3793_v40  ;;  %1949 = vmatpush2.msra.mxu0 %v1859_v24 }
 0x207   : > { %2062 = vmatpush2.msra.mxu1 %v2006_v52 }
 0x208   : > { %2063 = vmatprep.subr.mxu1 %v3793_v40 }
 0x209   : > { %2064 = vmatpush2.msra.mxu1 %v2005_v8 }
 0x20a   : > { %2065 = vmatprep.subr.mxu1 %v3793_v40 }
 0x20b   : > { %2066 = vmatpush2.msra.mxu1 %v2004_v11 }
 0x20c   : > { %2067 = vmatprep.subr.mxu1 %v3793_v40 }
 0x20d   : > { %2068 = vmatpush2.msra.mxu1 %v2003_v48 }
 0x20e   : > { %2069 = vmatprep.subr.mxu1 %v3793_v40 }
 0x20f   : > { %2070 = vmatpush2.msra.mxu1 %v2002_v55 }
 0x286   : > { %v1653_v57 = vpop.f32.mrf.mxu1 }
 0x288   : > { %v1655_v3 = vpop.f32.mrf.mxu1 }
 0x28a   : > { %v1659_v2 = vpop.f32.mrf.mxu1 }
 0x28c   : > { %v1661_v5 = vpop.f32.mrf.mxu1 }
 0x28e   : > { %v1665_v22 = vpop.f32.mrf.mxu1 }
 0x290   : > { %v1667_v36 = vpop.f32.mrf.mxu1 }
 0x292   : > { %v1671_v27 = vpop.f32.mrf.mxu1 }
 0x294   : > { %v1673_v39 = vpop.f32.mrf.mxu1 }
 0x296   : > { %v1677_v42 = vpop.f32.mrf.mxu1 }
 0x298   : > { %v1679_v9 = vpop.f32.mrf.mxu1 }
 0x29a   : > { %v1683_v33 = vpop.f32.mrf.mxu1 }
 0x29c   : > { %v1685_v30 = vpop.f32.mrf.mxu1 }
 0x29e   : > { %v1689_v40 = vpop.f32.mrf.mxu1 }
 0x2a0   : > { %v1691_v41 = vpop.f32.mrf.mxu1 }
 0x2a6   : > { %v1788_v49 = vpop.f32.mrf.mxu1 }
 0x2a7   : > { %v1829_v59 = vmax.f32 %v1653_v57, %v1788_v49 }
 0x2a8   : > { %v1790_v34 = vpop.f32.mrf.mxu1 }
 0x2a9   : > { %v1830_v31 = vmax.f32 %v1655_v3, %v1790_v34 }
 0x2aa   : > { %v1794_v12 = vpop.f32.mrf.mxu1 }
 0x2ab   : > { %2480 = vmatprep.mubr.msk.f32.mxu0 %vm1864_vm3, %v1830_v31  ;;  %2487 = vmatprep.mubr.msk.f32.mxu1 %vm1864_vm3, %v1830_v31  ;;  %v1831_v18 = vmax.f32 %v1659_v2, %v1794_v12 }
 0x2ac   : > { %v1796_v17 = vpop.f32.mrf.mxu1  ;;  %1951 = vmatmul.mubr.f32.vlgmr.msra.gmra.mxu0 %v1829_v59  ;;  %2072 = vmatmul.mubr.f32.vlgmr.msra.gmra.mxu1 %v1829_v59 }
 0x2ad   : > { %v1832_v43 = vmax.f32 %v1661_v5, %v1796_v17 }
 0x2ae   : > { %v1800_v61 = vpop.f32.mrf.mxu1 }
 0x2af   : > { %2481 = vmatprep.mubr.msk.f32.mxu0 %vm1864_vm3, %v1832_v43  ;;  %2488 = vmatprep.mubr.msk.f32.mxu1 %vm1864_vm3, %v1832_v43  ;;  %v1833_v53 = vmax.f32 %v1665_v22, %v1800_v61 }
 0x2b0   : > { %v1802_v62 = vpop.f32.mrf.mxu1  ;;  %1956 = vmatmul.mubr.f32.gmra.mxu0 %v1831_v18  ;;  %2077 = vmatmul.mubr.f32.gmra.mxu1 %v1831_v18 }
 0x2b1   : > { %v1834_v56 = vmax.f32 %v1667_v36, %v1802_v62 }
 0x2b2   : > { %v1806_v1 = vpop.f32.mrf.mxu1 }
 0x2b3   : > { %2482 = vmatprep.mubr.msk.f32.mxu0 %vm1864_vm3, %v1834_v56  ;;  %2489 = vmatprep.mubr.msk.f32.mxu1 %vm1864_vm3, %v1834_v56  ;;  %v1835_v47 = vmax.f32 %v1671_v27, %v1806_v1 }
 0x2b4   : > { %v1808_v50 = vpop.f32.mrf.mxu1  ;;  %1961 = vmatmul.mubr.f32.gmra.mxu0 %v1833_v53  ;;  %2082 = vmatmul.mubr.f32.gmra.mxu1 %v1833_v53 }
 0x2b5   : > { %v1836_v6 = vmax.f32 %v1673_v39, %v1808_v50 }
 0x2b6   : > { %v1812_v10 = vpop.f32.mrf.mxu1 }
 0x2b7   : > { %2483 = vmatprep.mubr.msk.f32.mxu0 %vm1864_vm3, %v1836_v6  ;;  %2490 = vmatprep.mubr.msk.f32.mxu1 %vm1864_vm3, %v1836_v6  ;;  %v1837_v4 = vmax.f32 %v1677_v42, %v1812_v10 }
 0x2b8   : > { %v1814_v44 = vpop.f32.mrf.mxu1  ;;  %1966 = vmatmul.mubr.f32.gmra.mxu0 %v1835_v47  ;;  %2087 = vmatmul.mubr.f32.gmra.mxu1 %v1835_v47 }
 0x2b9   : > { %v1838_v14 = vmax.f32 %v1679_v9, %v1814_v44 }
 0x2ba   : > { %v1818_v46 = vpop.f32.mrf.mxu1 }
 0x2bb   : > { %2484 = vmatprep.mubr.msk.f32.mxu0 %vm1864_vm3, %v1838_v14  ;;  %2491 = vmatprep.mubr.msk.f32.mxu1 %vm1864_vm3, %v1838_v14  ;;  %v1839_v35 = vmax.f32 %v1683_v33, %v1818_v46 }
 0x2bc   : > { %v1820_v60 = vpop.f32.mrf.mxu1  ;;  %1971 = vmatmul.mubr.f32.gmra.mxu0 %v1837_v4  ;;  %2092 = vmatmul.mubr.f32.gmra.mxu1 %v1837_v4 }
 0x2bd   : > { %v1840_v19 = vmax.f32 %v1685_v30, %v1820_v60 }
 0x2be   : > { %v1824_v28 = vpop.f32.mrf.mxu1 }
 0x2bf   : > { %2485 = vmatprep.mubr.msk.f32.mxu0 %vm1864_vm3, %v1840_v19  ;;  %2492 = vmatprep.mubr.msk.f32.mxu1 %vm1864_vm3, %v1840_v19  ;;  %v1841_v20 = vmax.f32 %v1689_v40, %v1824_v28 }
 0x2c0   : > { %v1826_v29 = vpop.f32.mrf.mxu1  ;;  %1976 = vmatmul.mubr.f32.gmra.mxu0 %v1839_v35  ;;  %2097 = vmatmul.mubr.f32.gmra.mxu1 %v1839_v35 }
 0x2c1   : > { %v1842_v32 = vmax.f32 %v1691_v41, %v1826_v29 }
 0x2c3   : > { %2486 = vmatprep.mubr.msk.f32.mxu0 %vm1864_vm3, %v1842_v32  ;;  %2493 = vmatprep.mubr.msk.f32.mxu1 %vm1864_vm3, %v1842_v32 }
 0x2c4   : > { %1981 = vmatmul.mubr.f32.gmra.mxu0 %v1841_v20  ;;  %2102 = vmatmul.mubr.f32.gmra.mxu1 %v1841_v20 }
 0x36c   : > { %v1952_v23 = vpop.f32.mrf.mxu0  ;;  %v2073_v38 = vpop.f32.mrf.mxu1 }
 0x36d   : > { %v2107_v15 = vmax.f32 %v1952_v23, %v2073_v38 }
 0x36e   : > { %v1954_v45 = vpop.f32.mrf.mxu0  ;;  %v2075_v63 = vpop.f32.mrf.mxu1 }
 0x36f   : > { %v3653_v51 = vadd.f32 %v3650_v26, %v2107_v15 }
 0x370   : > { %v1957_v58 = vpop.f32.mrf.mxu0  ;;  %v2078_v54 = vpop.f32.mrf.mxu1 }
 0x371   : > { %v2135_v37 = vmin.f32 %v3653_v51, 20.0  ;;  %v2108_v16 = vmax.f32 %v1957_v58, %v2078_v54  ;;  %vm2128_vm6 = vcmp.gt.f32.partialorder %v3653_v51, 20.0 }
 0x372   : > { %v1959_v0 = vpop.f32.mrf.mxu0  ;;  %v2080_v7 = vpop.f32.mrf.mxu1 }
 0x373   : > { %v2142_v52 = vmul.f32 1.442695, %v2135_v37  ;;  %v3657_v25 = vadd.f32 %v3650_v26, %v2108_v16 }
 0x374   : > { %v1962_v8 = vpop.f32.mrf.mxu0  ;;  %v2083_v13 = vpop.f32.mrf.mxu1 }
 0x375   : > { %2606 = vpow2.f32 %v2142_v52  ;;  %v2136_v11 = vmin.f32 %v3657_v25, 20.0  ;;  %v2109_v21 = vmax.f32 %v1962_v8, %v2083_v13  ;;  %vm2129_vm10 = vcmp.gt.f32.partialorder %v3657_v25, 20.0 }
 0x376   : > { %v1964_v48 = vpop.f32.mrf.mxu0  ;;  %v2085_v24 = vpop.f32.mrf.mxu1 }
 0x377   : > { %v2144_v55 = vmul.f32 1.442695, %v2136_v11  ;;  %v3661_v57 = vadd.f32 %v3650_v26, %v2109_v21 }
 0x378   : > { %v1967_v3 = vpop.f32.mrf.mxu0  ;;  %v2088_v2 = vpop.f32.mrf.mxu1 }
 0x379   : > { %2608 = vpow2.f32 %v2144_v55  ;;  %v2137_v5 = vmin.f32 %v3661_v57, 20.0  ;;  %v2110_v22 = vmax.f32 %v1967_v3, %v2088_v2  ;;  %vm2130_vm12 = vcmp.gt.f32.partialorder %v3661_v57, 20.0 }
 0x37a   : > { %v1969_v36 = vpop.f32.mrf.mxu0  ;;  %v2090_v27 = vpop.f32.mrf.mxu1 }
 0x37b   : > { %v2146_v39 = vmul.f32 1.442695, %v2137_v5  ;;  %v3665_v42 = vadd.f32 %v3650_v26, %v2110_v22 }
 0x37c   : > { %v1972_v9 = vpop.f32.mrf.mxu0  ;;  %v2093_v33 = vpop.f32.mrf.mxu1 }
 0x37d   : > { %2610 = vpow2.f32 %v2146_v39  ;;  %v2138_v30 = vmin.f32 %v3665_v42, 20.0  ;;  %v2111_v40 = vmax.f32 %v1972_v9, %v2093_v33  ;;  %vm2131_vm0 = vcmp.gt.f32.partialorder %v3665_v42, 20.0 }
 0x37e   : > { %v1974_v41 = vpop.f32.mrf.mxu0  ;;  %v2095_v49 = vpop.f32.mrf.mxu1 }
 0x37f   : > { %v2148_v34 = vmul.f32 1.442695, %v2138_v30  ;;  %v3669_v31 = vadd.f32 %v3650_v26, %v2111_v40 }
 0x380   : > { %v1977_v59 = vpop.f32.mrf.mxu0  ;;  %v2098_v12 = vpop.f32.mrf.mxu1 }
 0x381   : > { %2612 = vpow2.f32 %v2148_v34  ;;  %v2139_v17 = vmin.f32 %v3669_v31, 20.0  ;;  %v2112_v43 = vmax.f32 %v1977_v59, %v2098_v12  ;;  %vm2132_vm2 = vcmp.gt.f32.partialorder %v3669_v31, 20.0 }
 0x382   : > { %v2607_v18 = vpop.eup %2606  ;;  %v1979_v61 = vpop.f32.mrf.mxu0 }
 0x383   : > { %v2100_v62 = vpop.f32.mrf.mxu1  ;;  %v2156_v56 = vadd.f32 1.0, %v2607_v18  ;;  %v2150_v53 = vmul.f32 1.442695, %v2139_v17  ;;  %v3673_v1 = vadd.f32 %v3650_v26, %v2112_v43  ;;  %v2159_v29 = vmul.f32 -0.5, %v2607_v18 }
 0x384   : > { %v1982_v50 = vpop.f32.mrf.mxu0  ;;  %v2162_v63 = vand.u32 2147483647, %v2607_v18 }
 0x385   : > { %v2103_v6 = vpop.f32.mrf.mxu1  ;;  %2614 = vlog2.f32 %v2156_v56  ;;  %v2140_v44 = vmin.f32 %v3673_v1, 20.0  ;;  %v2160_v38 = vadd.f32 1.0, %v2159_v29 }
 0x386   : > { %v2113_v47 = vmax.f32 %v1982_v50, %v2103_v6  ;;  %v2609_v10 = vpop.eup %2608  ;;  %2616 = vpow2.f32 %v2150_v53  ;;  %v1984_v14 = vpop.f32.mrf.mxu0  ;;  %vm2163_vm4 = vcmp.lt.f32.partialorder %v2162_v63, 0.0004427343 }
 0x387   : > { %v2105_v4 = vpop.f32.mrf.mxu1  ;;  %v2165_v46 = vadd.f32 1.0, %v2609_v10  ;;  %v2152_v60 = vmul.f32 1.442695, %v2140_v44  ;;  %v2168_v15 = vmul.f32 -0.5, %v2609_v10  ;;  %v2161_v37 = vmul.f32 %v2607_v18, %v2160_v38 }
 0x388   : > { %v3679_v19 = vadd.f32 %v3650_v26, %v2113_v47  ;;  %v2171_v7 = vand.u32 2147483647, %v2609_v10 }
 0x389   : > { %2618 = vlog2.f32 %v2165_v46  ;;  %v2169_v16 = vadd.f32 1.0, %v2168_v15 }
 0x38a   : > { %v2611_v35 = vpop.eup %2610  ;;  %2620 = vpow2.f32 %v2152_v60  ;;  %v2141_v28 = vmin.f32 %v3679_v19, 20.0  ;;  %vm2172_vm8 = vcmp.lt.f32.partialorder %v2171_v7, 0.0004427343 }
 0x38b   : > { %v2174_v32 = vadd.f32 1.0, %v2611_v35  ;;  %v2177_v0 = vmul.f32 -0.5, %v2611_v35  ;;  %v2170_v24 = vmul.f32 %v2609_v10, %v2169_v16  ;;  %v2180_v2 = vand.u32 2147483647, %v2611_v35 }
 0x38c   : > { %v2154_v20 = vmul.f32 1.442695, %v2141_v28 }
 0x38d   : > { %2622 = vlog2.f32 %v2174_v32  ;;  %v2178_v55 = vadd.f32 1.0, %v2177_v0  ;;  %vm2181_vm11 = vcmp.lt.f32.partialorder %v2180_v2, 0.0004427343 }
 0x38e   : > { %v2613_v23 = vpop.eup %2612  ;;  %2624 = vpow2.f32 %v2154_v20 }
 0x38f   : > { %v2183_v45 = vadd.f32 1.0, %v2613_v23  ;;  %v2186_v3 = vmul.f32 -0.5, %v2613_v23  ;;  %v2179_v9 = vmul.f32 %v2611_v35, %v2178_v55  ;;  %v2189_v30 = vand.u32 2147483647, %v2613_v23 }
 0x391   : > { %2626 = vlog2.f32 %v2183_v45  ;;  %v2187_v33 = vadd.f32 1.0, %v2186_v3  ;;  %vm2190_vm14 = vcmp.lt.f32.partialorder %v2189_v30, 0.0004427343 }
 0x392   : > { %v2615_v26 = vpop.eup %2614 }
 0x393   : > { %v3682_v58 = vpop.eup %2616  ;;  %v2158_v54 = vmul.f32 0.6931472, %v2615_v26  ;;  %v2188_v12 = vmul.f32 %v2613_v23, %v2187_v33 }
 0x394   : > { %v2192_v52 = vadd.f32 1.0, %v3682_v58  ;;  %v2195_v40 = vmul.f32 -0.5, %v3682_v58  ;;  %v2198_v61 = vand.u32 2147483647, %v3682_v58 }
 0x395   : > { %v2164_v8 = vsel %vm2163_vm4, %v2161_v37, %v2158_v54  ;;  %vm2240_vm4 = vcmask 680960  }
 0x396   : > { %v2619_v13 = vpop.eup %2618  ;;  %v2219_v11 = vsel %vm2128_vm6, %v3653_v51, %v2164_v8  ;;  %2628 = vlog2.f32 %v2192_v52  ;;  %v2196_v17 = vadd.f32 1.0, %v2195_v40  ;;  %vm2199_vm1 = vcmp.lt.f32.partialorder %v2198_v61, 0.0004427343 }
 0x397   : > { %v2621_v21 = vpop.eup %2620  ;;  %2227 = vst.msk [vmem:[%s3687_s18] sm:$0xff] %vm2226_vm5, %v2219_v11  ;;  %v2167_v48 = vmul.f32 0.6931472, %v2619_v13  ;;  %vm2243_vm6 = vcmask 687106  }
 0x398   : > { %v2201_v5 = vadd.f32 1.0, %v2621_v21  ;;  %v2204_v43 = vmul.f32 -0.5, %v2621_v21  ;;  %v2197_v53 = vmul.f32 %v3682_v58, %v2196_v17  ;;  %v2207_v47 = vand.u32 2147483647, %v2621_v21 }
 0x399   : > { %v2173_v22 = vsel %vm2172_vm8, %v2170_v24, %v2167_v48 }
 0x39a   : > { %v2623_v36 = vpop.eup %2622  ;;  %v2220_v51 = vsel %vm2129_vm10, %v3657_v25, %v2173_v22  ;;  %2630 = vlog2.f32 %v2201_v5  ;;  %v2205_v50 = vadd.f32 1.0, %v2204_v43  ;;  %vm2208_vm3 = vcmp.lt.f32.partialorder %v2207_v47, 0.0004427343 }
 0x39b   : > { %v2625_v27 = vpop.eup %2624  ;;  %2229 = vst.msk [vmem:[%s3687_s18 + $0x8] sm:$0x3f] %vm2228_vm7, %v2220_v51  ;;  %v2176_v39 = vmul.f32 0.6931472, %v2623_v36  ;;  %vm2133_vm7 = vcmp.gt.f32.partialorder %v3673_v1, 20.0 }
 0x39c   : > { %2495 = vst.msk [vmem:[%s3687_s18 + $0xa] sm:$0xc0] %vm2231_vm9, %v2220_v51  ;;  %v2210_v41 = vadd.f32 1.0, %v2625_v27  ;;  %v2213_v6 = vmul.f32 -0.5, %v2625_v27  ;;  %v2206_v4 = vmul.f32 %v2621_v21, %v2205_v50  ;;  %v2216_v60 = vand.u32 2147483647, %v2625_v27 }
 0x39d   : > { %v2182_v49 = vsel %vm2181_vm11, %v2179_v9, %v2176_v39  ;;  %vm2134_vm9 = vcmp.gt.f32.partialorder %v3679_v19, 20.0 }
 0x39e   : > { %v2627_v34 = vpop.eup %2626  ;;  %v2221_v25 = vsel %vm2130_vm12, %v3661_v57, %v2182_v49  ;;  %2632 = vlog2.f32 %v2210_v41  ;;  %v2214_v46 = vadd.f32 1.0, %v2213_v6  ;;  %vm2217_vm8 = vcmp.lt.f32.partialorder %v2216_v60, 0.0004427343 }
 0x39f   : > { %2496 = vst.msk [vmem:[%s3687_s18 + $0x12] sm:$0xff] %vm2226_vm5, %v2221_v25  ;;  %v2185_v59 = vmul.f32 0.6931472, %v2627_v34 }
 0x3a1   : > { %v2191_v18 = vsel %vm2190_vm14, %v2188_v12, %v2185_v59 }
 0x3a2   : > { %v2222_v62 = vsel %vm2131_vm0, %v3665_v42, %v2191_v18 }
 0x3a3   : > { %v2629_v57 = vpop.eup %2628  ;;  %2497 = vst.msk [vmem:[%s3687_s18 + $0x1a] sm:$0xf] %vm2234_vm13, %v2222_v62 }
 0x3a4   : > { %2498 = vst.msk [vmem:[%s3687_s18 + $0x1c] sm:$0xf0] %vm2237_vm15, %v2222_v62  ;;  %v2194_v56 = vmul.f32 0.6931472, %v2629_v57 }
 0x3a6   : > { %v2200_v10 = vsel %vm2199_vm1, %v2197_v53, %v2194_v56 }
 0x3a7   : > { %v2631_v44 = vpop.eup %2630  ;;  %v2223_v14 = vsel %vm2132_vm2, %v3669_v31, %v2200_v10  ;;  %v2215_v31 = vmul.f32 %v2625_v27, %v2214_v46 }
 0x3a8   : > { %2499 = vst.msk [vmem:[%s3687_s18 + $0x24] sm:$0xff] %vm2226_vm5, %v2223_v14  ;;  %v2203_v42 = vmul.f32 0.6931472, %v2631_v44 }
 0x3aa   : > { %v2209_v35 = vsel %vm2208_vm3, %v2206_v4, %v2203_v42 }
 0x3ab   : > { %v2633_v28 = vpop.eup %2632  ;;  %v2224_v29 = vsel %vm2133_vm7, %v3673_v1, %v2209_v35 }
 0x3ac   : > { %2500 = vst.msk [vmem:[%s3687_s18 + $0x2c] sm:$0x3] %vm2240_vm4, %v2224_v29  ;;  %v2212_v32 = vmul.f32 0.6931472, %v2633_v28 }
 0x3ad   : > { %2501 = vst.msk [vmem:[%s3687_s18 + $0x2e] sm:$0xfc] %vm2243_vm6, %v2224_v29 }
 0x3ae   : > { %v2218_v20 = vsel %vm2217_vm8, %v2215_v31, %v2212_v32 }
 0x3af   : > { %v2225_v23 = vsel %vm2134_vm9, %v3679_v19, %v2218_v20 }
 0x3b0   : > { %2502 = vst.msk [vmem:[%s3687_s18 + $0x36] sm:$0xff] %vm2226_vm5, %v2225_v23 }
 0x3b1 PF: > { %s17_s24 = sadd.s32 1, %s2640_s24  }
 0x3b2   : > { %p14_p5 = scmp.ge.s32.totalorder %s17_s24, 4  }
 0x3b4   :  { %16 = sbr.rel (!%p14_p5) target bundleno = 1 (0x1), region = 85 }

</bundles_post_ra>
